<compile_context>
chip_gen: v7x
topology: tpu7x:2x2x1
jax: 0.10.0
libtpu: 0.0.40
codegen_flags: <defaults>
</compile_context>

<pallas_src>
import functools

import jax
import jax.numpy as jnp
from jax.experimental import pallas as pl
from jax.experimental.pallas import tpu as pltpu

_EPS = 1e-5
_VMEM = pl.BlockSpec(memory_space=pltpu.MemorySpace.VMEM)


# ----------------------------------------------------------------------------------------
# Fused conv (3x3 pad=1 or 1x1 pad=0) + BatchNorm(train) [+ residual] [+ ReLU] kernel.
# ----------------------------------------------------------------------------------------

def _conv_bn_kernel(xin_ref, w_ref, gb_ref, *rest, taps, TR, Wo, Cout, relu, has_res,
                    inv_m, eps):
    if has_res:
        res_ref, out_ref, sum_ref, ssq_ref = rest
    else:
        out_ref, sum_ref, ssq_ref = rest
        res_ref = None

    p = pl.program_id(0)        # 0: accumulate BN stats, 1: normalize + store
    n = pl.program_id(1)        # image
    r = pl.program_id(2)        # output row-tile within the image

    @pl.when((p == 0) & (n == 0) & (r == 0))
    def _init_stats():
        sum_ref[...] = jnp.zeros_like(sum_ref)
        ssq_ref[...] = jnp.zeros_like(ssq_ref)

    # ---- conv for this (image, row-tile): shifted-matmul accumulation over the taps.
    h0 = r * TR
    Cin = w_ref.shape[1]
    acc = jnp.zeros((TR * Wo, Cout), jnp.float32)
    for t, (ph, dy, dx) in enumerate(taps):
        sl = xin_ref[ph, pl.ds(h0 + dy, TR), pl.ds(dx, Wo), :]          # (TR, Wo, Cin) f32
        lhs = sl.reshape(TR * Wo, Cin).astype(jnp.bfloat16)             # bf16 MXU operand
        acc = acc + jnp.dot(lhs, w_ref[t], preferred_element_type=jnp.float32)

    @pl.when(p == 0)
    def _accum_stats():
        sum_ref[...] += jnp.sum(acc, axis=0, keepdims=True)
        ssq_ref[...] += jnp.sum(acc * acc, axis=0, keepdims=True)

    @pl.when(p == 1)
    def _normalize_store():
        mean = sum_ref[...] * inv_m                                     # (1, Cout)
        var = ssq_ref[...] * inv_m - mean * mean                        # biased (PyTorch BN)
        scale = gb_ref[0:1, :] * jax.lax.rsqrt(var + eps)
        shift = gb_ref[1:2, :] - mean * scale
        y = acc * scale + shift
        if has_res:
            y = y + res_ref[...].reshape(TR * Wo, Cout).astype(jnp.float32)
        if relu:
            y = jnp.maximum(y, 0.0)
        out_ref[...] = y.reshape(1, TR, Wo, Cout).astype(out_ref.dtype)


def conv_bn_act(x, w_taps, gb, *, stride, residual=None, relu=True):
    """x: (N, H, W, Cin) f32 NHWC.  w_taps: (kh*kw, Cin, Cout) bf16.  gb: (2, Cout) f32.

    Training-mode BatchNorm over the full N*Ho*Wo axis, optional residual add + ReLU,
    all fused into one pallas_call.  Returns (N, Ho, Wo, Cout) f32."""
    N, H, W, Cin = x.shape
    T, _, Cout = w_taps.shape

    # JAX glue: spatial pad + (for stride 2) phase de-interleave so the kernel only does
    # stride-1 slicing.  Extra HBM traffic ~1x the input (vs ~9x for im2col).
    if T == 9:                                      # 3x3 conv, padding=1
        xp = jnp.pad(x, ((0, 0), (1, 1), (1, 1), (0, 0)))
        if stride == 1:
            Ho, Wo = H, W
            xin, P = xp, 1
            taps = tuple((0, i, j) for i in range(3) for j in range(3))
        else:
            Ho, Wo = H // 2, W // 2
            phases = [xp[:, a::2, b::2, :] for a in (0, 1) for b in (0, 1)]
            xin = jnp.stack(phases, axis=1).reshape(N * 4, Ho + 1, Wo + 1, Cin)
            P = 4
            taps = tuple(((i % 2) * 2 + (j % 2), i // 2, j // 2)
                         for i in range(3) for j in range(3))
    else:                                           # 1x1 conv, padding=0 (shortcut)
        if stride == 1:
            Ho, Wo = H, W
            xin = x
        else:
            Ho, Wo = H // 2, W // 2
            xin = x[:, ::2, ::2, :]
        P = 1
        taps = ((0, 0, 0),)

    Hpp, Wpp = xin.shape[1], xin.shape[2]

    # Row tile: ~512 output rows per grid step, divisor of Ho (all layers here: 8 or 16).
    TR = min(Ho, max(1, 512 // Wo))
    while Ho % TR:
        TR -= 1
    RB = Ho // TR

    kernel = functools.partial(
        _conv_bn_kernel, taps=taps, TR=TR, Wo=Wo, Cout=Cout, relu=relu,
        has_res=residual is not None, inv_m=1.0 / float(N * Ho * Wo), eps=_EPS)

    in_specs = [
        # per-image padded / phased input: VMEM-resident across the row loop
        pl.BlockSpec((P, Hpp, Wpp, Cin), lambda p, n, r: (n, 0, 0, 0)),
        # per-tap weight matrices and stacked (gamma, beta): resident
        pl.BlockSpec((T, Cin, Cout), lambda p, n, r: (0, 0, 0)),
        pl.BlockSpec((2, Cout), lambda p, n, r: (0, 0)),
    ]
    inputs = [xin, w_taps, gb]
    if residual is not None:
        # streamed per row tile; pinned to block (0, 0) during the stats pass
        in_specs.append(pl.BlockSpec((1, TR, Wo, Cout),
                                     lambda p, n, r: (n * p, r * p, 0, 0)))
        inputs.append(residual)

    grid_spec = pltpu.PrefetchScalarGridSpec(
        num_scalar_prefetch=0,
        grid=(2, N, RB),                            # (pass, image, row-tile)
        in_specs=in_specs,
        out_specs=pl.BlockSpec((1, TR, Wo, Cout),
                               lambda p, n, r: (n * p, r * p, 0, 0)),
        scratch_shapes=[pltpu.VMEM((1, Cout), jnp.float32),    # per-channel sum
                        pltpu.VMEM((1, Cout), jnp.float32)],   # per-channel sum of squares
    )

    return pl.pallas_call(
        kernel,
        out_shape=jax.ShapeDtypeStruct((N, Ho, Wo, Cout), jnp.float32),
        grid_spec=grid_spec,
        compiler_params=pltpu.CompilerParams(
            # BN stats reduction spans the whole grid -> must run sequentially.
            dimension_semantics=("arbitrary", "arbitrary", "arbitrary"),
            vmem_limit_bytes=32 * 1024 * 1024),
    )(*inputs)


# ----------------------------------------------------------------------------------------
# Fused AdaptiveAvgPool2d((1,1)) + Linear tail kernel.
# ----------------------------------------------------------------------------------------

def _pool_fc_kernel(x_ref, w_ref, b_ref, o_ref):
    pooled = jnp.mean(x_ref[...], axis=1)                               # (N, C)
    o_ref[...] = jnp.dot(pooled, w_ref[...],
                         preferred_element_type=jnp.float32) + b_ref[...]


def pool_fc(feat, w, b):
    N, _, C = feat.shape
    nclass = w.shape[1]
    return pl.pallas_call(
        _pool_fc_kernel,
        out_shape=jax.ShapeDtypeStruct((N, nclass), jnp.float32),
        in_specs=[_VMEM, _VMEM, _VMEM],
        out_specs=_VMEM,
    )(feat, w, b)


# ----------------------------------------------------------------------------------------
# Model definition (parameters hoisted / pre-laid-out at init time).
# ----------------------------------------------------------------------------------------

def _prep_conv(w_oihw):
    """(Cout, Cin, kh, kw) -> (kh*kw, Cin, Cout) bf16, tap t = i*kw + j."""
    cout, cin, kh, kw = w_oihw.shape
    w = jnp.transpose(w_oihw, (2, 3, 1, 0)).reshape(kh * kw, cin, cout)
    return w.astype(jnp.bfloat16)


def _prep_bn(c):
    return jnp.stack([jnp.ones((c,), jnp.float32), jnp.zeros((c,), jnp.float32)])  # (2, C)


def init_params(key, nf=8, nclass=10, num_blocks=(2, 2, 2, 2)):
    keys = iter(jax.random.split(key, 64))

    def conv_w(cout, cin, k):
        # kaiming_normal_(mode='fan_out', nonlinearity='relu')
        fan_out = cout * k * k
        std = (2.0 / fan_out) ** 0.5
        w = jax.random.normal(next(keys), (cout, cin, k, k), jnp.float32) * std
        return _prep_conv(w)

    params = {'w1': conv_w(nf, 3, 3), 'gb1': _prep_bn(nf)}

    in_planes = nf
    layers = []
    for li, (mult, stride0) in enumerate(zip((1, 2, 4, 8), (1, 2, 2, 2))):
        planes = nf * mult
        strides = [stride0] + [1] * (num_blocks[li] - 1)
        blocks = []
        for s in strides:
            blk = {
                'stride': s,
                'w1': conv_w(planes, in_planes, 3),
                'gb1': _prep_bn(planes),
                'w2': conv_w(planes, planes, 3),
                'gb2': _prep_bn(planes),
            }
            if s != 1 or in_planes != planes:
                blk['wsc'] = conv_w(planes, in_planes, 1)
                blk['gbsc'] = _prep_bn(planes)
            blocks.append(blk)
            in_planes = planes
        layers.append(blocks)
    params['layers'] = layers

    fan_in = nf * 8
    bound = 1.0 / (fan_in ** 0.5)
    # fc weight pre-transposed to (C, nclass); bias as (1, nclass)
    params['fc_w'] = jnp.transpose(
        jax.random.uniform(next(keys), (nclass, fan_in), jnp.float32, -bound, bound))
    params['fc_b'] = jax.random.uniform(next(keys), (1, nclass), jnp.float32, -bound, bound)
    return params


def basic_block_forward(x, blk):
    stride = blk['stride']
    out1 = conv_bn_act(x, blk['w1'], blk['gb1'], stride=stride, relu=True)
    if 'wsc' in blk:
        sc = conv_bn_act(x, blk['wsc'], blk['gbsc'], stride=stride, relu=False)
    else:
        sc = x
    # conv2 + bn2 + residual add + relu fused in one call
    return conv_bn_act(out1, blk['w2'], blk['gb2'], stride=1, residual=sc, relu=True)


def resnet_forward(params, x_nchw):
    """Equivalent of ResNet.forward(x): view(bsz,3,64,64) -> conv/bn/relu -> layers ->
    avgpool -> fc (training-mode BatchNorm, as in the functional reference)."""
    bsz = x_nchw.shape[0]
    x = x_nchw.reshape(bsz, 3, 64, 64).astype(jnp.float32)
    x = jnp.transpose(x, (0, 2, 3, 1))                                  # NCHW -> NHWC

    out = conv_bn_act(x, params['w1'], params['gb1'], stride=1, relu=True)
    for blocks in params['layers']:
        for blk in blocks:
            out = basic_block_forward(out, blk)

    N, H, W, C = out.shape
    feat = out.reshape(N, H * W, C)
    return pool_fc(feat, params['fc_w'], params['fc_b'])                # (N, nclass)

# TODO(synk): replay-buffer / SVD-GPM / meta-update methods of the module are training-time
# machinery with no forward-pass compute and are intentionally not translated.


if __name__ == "__main__":
    key = jax.random.PRNGKey(0)
    k_param, k_x = jax.random.split(key)
    params = init_params(k_param, nf=8, nclass=10, num_blocks=(2, 2, 2, 2))
    # batch=2, channels=3, spatial=64 (the forward hard-codes a 3x64x64 view)
    x = jax.random.normal(k_x, (2, 3, 64, 64), jnp.float32)
    logits = resnet_forward(params, x)
    logits = jax.block_until_ready(logits)
    assert logits.shape == (2, 10) and logits.dtype == jnp.float32
    print("KERNEL_OK")
</pallas_src>

<mosaic_0001>
module attributes {stable_mosaic.version = 11 : i64} {
  func.func @_conv_bn_kernel(%arg0: i32, %arg1: i32, %arg2: i32, %arg3: memref<1x66x66x3xf32, #tpu.memory_space<vmem>>, %arg4: memref<9x3x8xbf16, #tpu.memory_space<vmem>>, %arg5: memref<2x8xf32, #tpu.memory_space<vmem>>, %arg6: memref<1x8x64x8xf32, #tpu.memory_space<vmem>>, %arg7: memref<1x8xf32, #tpu.memory_space<vmem>>, %arg8: memref<1x8xf32, #tpu.memory_space<vmem>>) attributes {dimension_semantics = [#tpu.dimension_semantics<arbitrary>, #tpu.dimension_semantics<arbitrary>, #tpu.dimension_semantics<arbitrary>], iteration_bounds = array<i64: 2, 2, 8>, scalar_prefetch = 0 : i64, scratch_operands = 2 : i64, tpu.core_type = #tpu.core_type<tc>, window_params = [{transform_indices = @transform_0, window_bounds = array<i64: 1, 66, 66, 3>}, {pipeline_mode = #tpu.pipeline_mode<synchronous>, transform_indices = @transform_1, window_bounds = array<i64: 9, 3, 8>}, {pipeline_mode = #tpu.pipeline_mode<synchronous>, transform_indices = @transform_2, window_bounds = array<i64: 2, 8>}, {transform_indices = @transform_3, window_bounds = array<i64: 1, 8, 64, 8>}]} {
    %c0_i32 = arith.constant 0 : i32
    %0 = arith.cmpi eq, %arg0, %c0_i32 : i32
    %c0_i32_0 = arith.constant 0 : i32
    %1 = arith.cmpi eq, %arg1, %c0_i32_0 : i32
    %2 = arith.andi %0, %1 : i1
    %c0_i32_1 = arith.constant 0 : i32
    %3 = arith.cmpi eq, %arg2, %c0_i32_1 : i32
    %4 = arith.andi %2, %3 : i1
    %5 = arith.extui %4 : i1 to i32
    %c0_i32_2 = arith.constant 0 : i32
    %6 = arith.cmpi ne, %5, %c0_i32_2 : i32
    scf.if %6 {
      %cst_68 = arith.constant 0.000000e+00 : f32
      %105 = vector.broadcast %cst_68 : f32 to vector<1x8xf32>
      %c0_69 = arith.constant 0 : index
      %c0_70 = arith.constant 0 : index
      %106 = vector.load %arg7[%c0_69, %c0_70] : memref<1x8xf32, #tpu.memory_space<vmem>>, vector<1x8xf32>
      tpu.vector_store %arg7[%c0_69, %c0_70], %105 {strides = array<i32>} : memref<1x8xf32, #tpu.memory_space<vmem>>, vector<1x8xf32>,
      %cst_71 = arith.constant 0.000000e+00 : f32
      %107 = vector.broadcast %cst_71 : f32 to vector<1x8xf32>
      %c0_72 = arith.constant 0 : index
      %c0_73 = arith.constant 0 : index
      %108 = vector.load %arg8[%c0_72, %c0_73] : memref<1x8xf32, #tpu.memory_space<vmem>>, vector<1x8xf32>
      tpu.vector_store %arg8[%c0_72, %c0_73], %107 {strides = array<i32>} : memref<1x8xf32, #tpu.memory_space<vmem>>, vector<1x8xf32>,
    } else {
    }
    %c8_i32 = arith.constant 8 : i32
    %7 = arith.muli %arg2, %c8_i32 : i32
    %cst = arith.constant 0.000000e+00 : f32
    %8 = vector.broadcast %cst : f32 to vector<512x8xf32>
    %c0_i32_3 = arith.constant 0 : i32
    %9 = arith.addi %7, %c0_i32_3 : i32
    %c0 = arith.constant 0 : index
    %10 = arith.index_cast %9 : i32 to index
    %c0_4 = arith.constant 0 : index
    %c0_5 = arith.constant 0 : index
    %11 = vector.load %arg3[%c0, %10, %c0_4, %c0_5] : memref<1x66x66x3xf32, #tpu.memory_space<vmem>>, vector<1x8x64x3xf32>
    %12 = vector.shape_cast %11 : vector<1x8x64x3xf32> to vector<8x64x3xf32>
    %13 = vector.shape_cast %12 : vector<8x64x3xf32> to vector<512x3xf32>
    %14 = arith.truncf %13 : vector<512x3xf32> to vector<512x3xbf16>
    %c0_6 = arith.constant 0 : index
    %c0_7 = arith.constant 0 : index
    %c0_8 = arith.constant 0 : index
    %15 = vector.load %arg4[%c0_6, %c0_7, %c0_8] : memref<9x3x8xbf16, #tpu.memory_space<vmem>>, vector<1x3x8xbf16>
    %16 = vector.shape_cast %15 : vector<1x3x8xbf16> to vector<3x8xbf16>
    %cst_9 = arith.constant dense<0.000000e+00> : vector<512x8xf32>
    %17 = tpu.matmul %14, %16, %cst_9 {dimension_numbers = #tpu.dot_dimension_numbers<[1], [0], [0], [1], [0, 0, 1, 1], [], []>} : vector<512x3xbf16>, vector<3x8xbf16>, vector<512x8xf32> -> vector<512x8xf32>
    %18 = arith.addf %8, %17 : vector<512x8xf32>
    %c0_i32_10 = arith.constant 0 : i32
    %19 = arith.addi %7, %c0_i32_10 : i32
    %c0_11 = arith.constant 0 : index
    %20 = arith.index_cast %19 : i32 to index
    %c1 = arith.constant 1 : index
    %c0_12 = arith.constant 0 : index
    %21 = vector.load %arg3[%c0_11, %20, %c1, %c0_12] : memref<1x66x66x3xf32, #tpu.memory_space<vmem>>, vector<1x8x64x3xf32>
    %22 = vector.shape_cast %21 : vector<1x8x64x3xf32> to vector<8x64x3xf32>
    %23 = vector.shape_cast %22 : vector<8x64x3xf32> to vector<512x3xf32>
    %24 = arith.truncf %23 : vector<512x3xf32> to vector<512x3xbf16>
    %c1_13 = arith.constant 1 : index
    %c0_14 = arith.constant 0 : index
    %c0_15 = arith.constant 0 : index
    %25 = vector.load %arg4[%c1_13, %c0_14, %c0_15] : memref<9x3x8xbf16, #tpu.memory_space<vmem>>, vector<1x3x8xbf16>
    %26 = vector.shape_cast %25 : vector<1x3x8xbf16> to vector<3x8xbf16>
    %cst_16 = arith.constant dense<0.000000e+00> : vector<512x8xf32>
    %27 = tpu.matmul %24, %26, %cst_16 {dimension_numbers = #tpu.dot_dimension_numbers<[1], [0], [0], [1], [0, 0, 1, 1], [], []>} : vector<512x3xbf16>, vector<3x8xbf16>, vector<512x8xf32> -> vector<512x8xf32>
    %28 = arith.addf %18, %27 : vector<512x8xf32>
    %c0_i32_17 = arith.constant 0 : i32
    %29 = arith.addi %7, %c0_i32_17 : i32
    %c0_18 = arith.constant 0 : index
    %30 = arith.index_cast %29 : i32 to index
    %c2 = arith.constant 2 : index
    %c0_19 = arith.constant 0 : index
    %31 = vector.load %arg3[%c0_18, %30, %c2, %c0_19] : memref<1x66x66x3xf32, #tpu.memory_space<vmem>>, vector<1x8x64x3xf32>
    %32 = vector.shape_cast %31 : vector<1x8x64x3xf32> to vector<8x64x3xf32>
    %33 = vector.shape_cast %32 : vector<8x64x3xf32> to vector<512x3xf32>
    %34 = arith.truncf %33 : vector<512x3xf32> to vector<512x3xbf16>
    %c2_20 = arith.constant 2 : index
    %c0_21 = arith.constant 0 : index
    %c0_22 = arith.constant 0 : index
    %35 = vector.load %arg4[%c2_20, %c0_21, %c0_22] : memref<9x3x8xbf16, #tpu.memory_space<vmem>>, vector<1x3x8xbf16>
    %36 = vector.shape_cast %35 : vector<1x3x8xbf16> to vector<3x8xbf16>
    %cst_23 = arith.constant dense<0.000000e+00> : vector<512x8xf32>
    %37 = tpu.matmul %34, %36, %cst_23 {dimension_numbers = #tpu.dot_dimension_numbers<[1], [0], [0], [1], [0, 0, 1, 1], [], []>} : vector<512x3xbf16>, vector<3x8xbf16>, vector<512x8xf32> -> vector<512x8xf32>
    %38 = arith.addf %28, %37 : vector<512x8xf32>
    %c1_i32 = arith.constant 1 : i32
    %39 = arith.addi %7, %c1_i32 : i32
    %c0_24 = arith.constant 0 : index
    %40 = arith.index_cast %39 : i32 to index
    %c0_25 = arith.constant 0 : index
    %c0_26 = arith.constant 0 : index
    %41 = vector.load %arg3[%c0_24, %40, %c0_25, %c0_26] : memref<1x66x66x3xf32, #tpu.memory_space<vmem>>, vector<1x8x64x3xf32>
    %42 = vector.shape_cast %41 : vector<1x8x64x3xf32> to vector<8x64x3xf32>
    %43 = vector.shape_cast %42 : vector<8x64x3xf32> to vector<512x3xf32>
    %44 = arith.truncf %43 : vector<512x3xf32> to vector<512x3xbf16>
    %c3 = arith.constant 3 : index
    %c0_27 = arith.constant 0 : index
    %c0_28 = arith.constant 0 : index
    %45 = vector.load %arg4[%c3, %c0_27, %c0_28] : memref<9x3x8xbf16, #tpu.memory_space<vmem>>, vector<1x3x8xbf16>
    %46 = vector.shape_cast %45 : vector<1x3x8xbf16> to vector<3x8xbf16>
    %cst_29 = arith.constant dense<0.000000e+00> : vector<512x8xf32>
    %47 = tpu.matmul %44, %46, %cst_29 {dimension_numbers = #tpu.dot_dimension_numbers<[1], [0], [0], [1], [0, 0, 1, 1], [], []>} : vector<512x3xbf16>, vector<3x8xbf16>, vector<512x8xf32> -> vector<512x8xf32>
    %48 = arith.addf %38, %47 : vector<512x8xf32>
    %c1_i32_30 = arith.constant 1 : i32
    %49 = arith.addi %7, %c1_i32_30 : i32
    %c0_31 = arith.constant 0 : index
    %50 = arith.index_cast %49 : i32 to index
    %c1_32 = arith.constant 1 : index
    %c0_33 = arith.constant 0 : index
    %51 = vector.load %arg3[%c0_31, %50, %c1_32, %c0_33] : memref<1x66x66x3xf32, #tpu.memory_space<vmem>>, vector<1x8x64x3xf32>
    %52 = vector.shape_cast %51 : vector<1x8x64x3xf32> to vector<8x64x3xf32>
    %53 = vector.shape_cast %52 : vector<8x64x3xf32> to vector<512x3xf32>
    %54 = arith.truncf %53 : vector<512x3xf32> to vector<512x3xbf16>
    %c4 = arith.constant 4 : index
    %c0_34 = arith.constant 0 : index
    %c0_35 = arith.constant 0 : index
    %55 = vector.load %arg4[%c4, %c0_34, %c0_35] : memref<9x3x8xbf16, #tpu.memory_space<vmem>>, vector<1x3x8xbf16>
    %56 = vector.shape_cast %55 : vector<1x3x8xbf16> to vector<3x8xbf16>
    %cst_36 = arith.constant dense<0.000000e+00> : vector<512x8xf32>
    %57 = tpu.matmul %54, %56, %cst_36 {dimension_numbers = #tpu.dot_dimension_numbers<[1], [0], [0], [1], [0, 0, 1, 1], [], []>} : vector<512x3xbf16>, vector<3x8xbf16>, vector<512x8xf32> -> vector<512x8xf32>
    %58 = arith.addf %48, %57 : vector<512x8xf32>
    %c1_i32_37 = arith.constant 1 : i32
    %59 = arith.addi %7, %c1_i32_37 : i32
    %c0_38 = arith.constant 0 : index
    %60 = arith.index_cast %59 : i32 to index
    %c2_39 = arith.constant 2 : index
    %c0_40 = arith.constant 0 : index
    %61 = vector.load %arg3[%c0_38, %60, %c2_39, %c0_40] : memref<1x66x66x3xf32, #tpu.memory_space<vmem>>, vector<1x8x64x3xf32>
    %62 = vector.shape_cast %61 : vector<1x8x64x3xf32> to vector<8x64x3xf32>
    %63 = vector.shape_cast %62 : vector<8x64x3xf32> to vector<512x3xf32>
    %64 = arith.truncf %63 : vector<512x3xf32> to vector<512x3xbf16>
    %c5 = arith.constant 5 : index
    %c0_41 = arith.constant 0 : index
    %c0_42 = arith.constant 0 : index
    %65 = vector.load %arg4[%c5, %c0_41, %c0_42] : memref<9x3x8xbf16, #tpu.memory_space<vmem>>, vector<1x3x8xbf16>
    %66 = vector.shape_cast %65 : vector<1x3x8xbf16> to vector<3x8xbf16>
    %cst_43 = arith.constant dense<0.000000e+00> : vector<512x8xf32>
    %67 = tpu.matmul %64, %66, %cst_43 {dimension_numbers = #tpu.dot_dimension_numbers<[1], [0], [0], [1], [0, 0, 1, 1], [], []>} : vector<512x3xbf16>, vector<3x8xbf16>, vector<512x8xf32> -> vector<512x8xf32>
    %68 = arith.addf %58, %67 : vector<512x8xf32>
    %c2_i32 = arith.constant 2 : i32
    %69 = arith.addi %7, %c2_i32 : i32
    %c0_44 = arith.constant 0 : index
    %70 = arith.index_cast %69 : i32 to index
    %c0_45 = arith.constant 0 : index
    %c0_46 = arith.constant 0 : index
    %71 = vector.load %arg3[%c0_44, %70, %c0_45, %c0_46] : memref<1x66x66x3xf32, #tpu.memory_space<vmem>>, vector<1x8x64x3xf32>
    %72 = vector.shape_cast %71 : vector<1x8x64x3xf32> to vector<8x64x3xf32>
    %73 = vector.shape_cast %72 : vector<8x64x3xf32> to vector<512x3xf32>
    %74 = arith.truncf %73 : vector<512x3xf32> to vector<512x3xbf16>
    %c6 = arith.constant 6 : index
    %c0_47 = arith.constant 0 : index
    %c0_48 = arith.constant 0 : index
    %75 = vector.load %arg4[%c6, %c0_47, %c0_48] : memref<9x3x8xbf16, #tpu.memory_space<vmem>>, vector<1x3x8xbf16>
    %76 = vector.shape_cast %75 : vector<1x3x8xbf16> to vector<3x8xbf16>
    %cst_49 = arith.constant dense<0.000000e+00> : vector<512x8xf32>
    %77 = tpu.matmul %74, %76, %cst_49 {dimension_numbers = #tpu.dot_dimension_numbers<[1], [0], [0], [1], [0, 0, 1, 1], [], []>} : vector<512x3xbf16>, vector<3x8xbf16>, vector<512x8xf32> -> vector<512x8xf32>
    %78 = arith.addf %68, %77 : vector<512x8xf32>
    %c2_i32_50 = arith.constant 2 : i32
    %79 = arith.addi %7, %c2_i32_50 : i32
    %c0_51 = arith.constant 0 : index
    %80 = arith.index_cast %79 : i32 to index
    %c1_52 = arith.constant 1 : index
    %c0_53 = arith.constant 0 : index
    %81 = vector.load %arg3[%c0_51, %80, %c1_52, %c0_53] : memref<1x66x66x3xf32, #tpu.memory_space<vmem>>, vector<1x8x64x3xf32>
    %82 = vector.shape_cast %81 : vector<1x8x64x3xf32> to vector<8x64x3xf32>
    %83 = vector.shape_cast %82 : vector<8x64x3xf32> to vector<512x3xf32>
    %84 = arith.truncf %83 : vector<512x3xf32> to vector<512x3xbf16>
    %c7 = arith.constant 7 : index
    %c0_54 = arith.constant 0 : index
    %c0_55 = arith.constant 0 : index
    %85 = vector.load %arg4[%c7, %c0_54, %c0_55] : memref<9x3x8xbf16, #tpu.memory_space<vmem>>, vector<1x3x8xbf16>
    %86 = vector.shape_cast %85 : vector<1x3x8xbf16> to vector<3x8xbf16>
    %cst_56 = arith.constant dense<0.000000e+00> : vector<512x8xf32>
    %87 = tpu.matmul %84, %86, %cst_56 {dimension_numbers = #tpu.dot_dimension_numbers<[1], [0], [0], [1], [0, 0, 1, 1], [], []>} : vector<512x3xbf16>, vector<3x8xbf16>, vector<512x8xf32> -> vector<512x8xf32>
    %88 = arith.addf %78, %87 : vector<512x8xf32>
    %c2_i32_57 = arith.constant 2 : i32
    %89 = arith.addi %7, %c2_i32_57 : i32
    %c0_58 = arith.constant 0 : index
    %90 = arith.index_cast %89 : i32 to index
    %c2_59 = arith.constant 2 : index
    %c0_60 = arith.constant 0 : index
    %91 = vector.load %arg3[%c0_58, %90, %c2_59, %c0_60] : memref<1x66x66x3xf32, #tpu.memory_space<vmem>>, vector<1x8x64x3xf32>
    %92 = vector.shape_cast %91 : vector<1x8x64x3xf32> to vector<8x64x3xf32>
    %93 = vector.shape_cast %92 : vector<8x64x3xf32> to vector<512x3xf32>
    %94 = arith.truncf %93 : vector<512x3xf32> to vector<512x3xbf16>
    %c8 = arith.constant 8 : index
    %c0_61 = arith.constant 0 : index
    %c0_62 = arith.constant 0 : index
    %95 = vector.load %arg4[%c8, %c0_61, %c0_62] : memref<9x3x8xbf16, #tpu.memory_space<vmem>>, vector<1x3x8xbf16>
    %96 = vector.shape_cast %95 : vector<1x3x8xbf16> to vector<3x8xbf16>
    %cst_63 = arith.constant dense<0.000000e+00> : vector<512x8xf32>
    %97 = tpu.matmul %94, %96, %cst_63 {dimension_numbers = #tpu.dot_dimension_numbers<[1], [0], [0], [1], [0, 0, 1, 1], [], []>} : vector<512x3xbf16>, vector<3x8xbf16>, vector<512x8xf32> -> vector<512x8xf32>
    %98 = arith.addf %88, %97 : vector<512x8xf32>
    %c0_i32_64 = arith.constant 0 : i32
    %99 = arith.cmpi eq, %arg0, %c0_i32_64 : i32
    %100 = arith.extui %99 : i1 to i32
    %c0_i32_65 = arith.constant 0 : i32
    %101 = arith.cmpi ne, %100, %c0_i32_65 : i32
    scf.if %101 {
      %c0_68 = arith.constant 0 : index
      %c0_69 = arith.constant 0 : index
      %105 = vector.load %arg7[%c0_68, %c0_69] : memref<1x8xf32, #tpu.memory_space<vmem>>, vector<1x8xf32>
      %cst_70 = arith.constant dense<0.000000e+00> : vector<8xf32>
      %106 = vector.multi_reduction <add>, %98, %cst_70 [0] : vector<512x8xf32> to vector<8xf32>
      %107 = vector.shape_cast %106 : vector<8xf32> to vector<1x8xf32>
      %108 = arith.addf %105, %107 : vector<1x8xf32>
      %c0_71 = arith.constant 0 : index
      %c0_72 = arith.constant 0 : index
      %109 = vector.load %arg7[%c0_71, %c0_72] : memref<1x8xf32, #tpu.memory_space<vmem>>, vector<1x8xf32>
      tpu.vector_store %arg7[%c0_71, %c0_72], %108 {strides = array<i32>} : memref<1x8xf32, #tpu.memory_space<vmem>>, vector<1x8xf32>,
      %c0_73 = arith.constant 0 : index
      %c0_74 = arith.constant 0 : index
      %110 = vector.load %arg8[%c0_73, %c0_74] : memref<1x8xf32, #tpu.memory_space<vmem>>, vector<1x8xf32>
      %111 = arith.mulf %98, %98 : vector<512x8xf32>
      %cst_75 = arith.constant dense<0.000000e+00> : vector<8xf32>
      %112 = vector.multi_reduction <add>, %111, %cst_75 [0] : vector<512x8xf32> to vector<8xf32>
      %113 = vector.shape_cast %112 : vector<8xf32> to vector<1x8xf32>
      %114 = arith.addf %110, %113 : vector<1x8xf32>
      %c0_76 = arith.constant 0 : index
      %c0_77 = arith.constant 0 : index
      %115 = vector.load %arg8[%c0_76, %c0_77] : memref<1x8xf32, #tpu.memory_space<vmem>>, vector<1x8xf32>
      tpu.vector_store %arg8[%c0_76, %c0_77], %114 {strides = array<i32>} : memref<1x8xf32, #tpu.memory_space<vmem>>, vector<1x8xf32>,
    } else {
    }
    %c1_i32_66 = arith.constant 1 : i32
    %102 = arith.cmpi eq, %arg0, %c1_i32_66 : i32
    %103 = arith.extui %102 : i1 to i32
    %c0_i32_67 = arith.constant 0 : i32
    %104 = arith.cmpi ne, %103, %c0_i32_67 : i32
    scf.if %104 {
      %c0_68 = arith.constant 0 : index
      %c0_69 = arith.constant 0 : index
      %105 = vector.load %arg7[%c0_68, %c0_69] : memref<1x8xf32, #tpu.memory_space<vmem>>, vector<1x8xf32>
      %cst_70 = arith.constant 1.22070313E-4 : f32
      %106 = vector.broadcast %cst_70 : f32 to vector<1x8xf32>
      %107 = arith.mulf %105, %106 : vector<1x8xf32>
      %c0_71 = arith.constant 0 : index
      %c0_72 = arith.constant 0 : index
      %108 = vector.load %arg8[%c0_71, %c0_72] : memref<1x8xf32, #tpu.memory_space<vmem>>, vector<1x8xf32>
      %cst_73 = arith.constant 1.22070313E-4 : f32
      %109 = vector.broadcast %cst_73 : f32 to vector<1x8xf32>
      %110 = arith.mulf %108, %109 : vector<1x8xf32>
      %111 = arith.mulf %107, %107 : vector<1x8xf32>
      %112 = arith.subf %110, %111 : vector<1x8xf32>
      %c0_74 = arith.constant 0 : index
      %c0_75 = arith.constant 0 : index
      %113 = vector.load %arg5[%c0_74, %c0_75] : memref<2x8xf32, #tpu.memory_space<vmem>>, vector<1x8xf32>
      %cst_76 = arith.constant 9.99999974E-6 : f32
      %114 = vector.broadcast %cst_76 : f32 to vector<1x8xf32>
      %115 = arith.addf %112, %114 : vector<1x8xf32>
      %116 = math.rsqrt %115 : vector<1x8xf32>
      %117 = arith.mulf %113, %116 : vector<1x8xf32>
      %c1_77 = arith.constant 1 : index
      %c0_78 = arith.constant 0 : index
      %118 = vector.load %arg5[%c1_77, %c0_78] : memref<2x8xf32, #tpu.memory_space<vmem>>, vector<1x8xf32>
      %119 = arith.mulf %107, %117 : vector<1x8xf32>
      %120 = arith.subf %118, %119 : vector<1x8xf32>
      %121 = vector.broadcast %117 : vector<1x8xf32> to vector<512x8xf32>
      %122 = arith.mulf %98, %121 : vector<512x8xf32>
      %123 = vector.broadcast %120 : vector<1x8xf32> to vector<512x8xf32>
      %124 = arith.addf %122, %123 : vector<512x8xf32>
      %cst_79 = arith.constant 0.000000e+00 : f32
      %125 = vector.broadcast %cst_79 : f32 to vector<512x8xf32>
      %126 = arith.maximumf %124, %125 : vector<512x8xf32>
      %127 = vector.shape_cast %126 : vector<512x8xf32> to vector<1x8x64x8xf32>
      %c0_80 = arith.constant 0 : index
      %c0_81 = arith.constant 0 : index
      %c0_82 = arith.constant 0 : index
      %c0_83 = arith.constant 0 : index
      %128 = vector.load %arg6[%c0_80, %c0_81, %c0_82, %c0_83] : memref<1x8x64x8xf32, #tpu.memory_space<vmem>>, vector<1x8x64x8xf32>
      tpu.vector_store %arg6[%c0_80, %c0_81, %c0_82, %c0_83], %127 {strides = array<i32>} : memref<1x8x64x8xf32, #tpu.memory_space<vmem>>, vector<1x8x64x8xf32>,
    } else {
    }
    return
  }
  func.func @transform_0(%arg0: i32, %arg1: i32, %arg2: i32) -> (i32, i32, i32, i32) {
    %c0_i32 = arith.constant 0 : i32
    %c0_i32_0 = arith.constant 0 : i32
    %c0_i32_1 = arith.constant 0 : i32
    %c0_i32_2 = arith.constant 0 : i32
    return %arg1, %c0_i32, %c0_i32_0, %c0_i32_1 : i32, i32, i32, i32
  }
  func.func @transform_1(%arg0: i32, %arg1: i32, %arg2: i32) -> (i32, i32, i32) {
    %c0_i32 = arith.constant 0 : i32
    %c0_i32_0 = arith.constant 0 : i32
    %c0_i32_1 = arith.constant 0 : i32
    %c0_i32_2 = arith.constant 0 : i32
    return %c0_i32, %c0_i32_0, %c0_i32_1 : i32, i32, i32
  }
  func.func @transform_2(%arg0: i32, %arg1: i32, %arg2: i32) -> (i32, i32) {
    %c0_i32 = arith.constant 0 : i32
    %c0_i32_0 = arith.constant 0 : i32
    %c0_i32_1 = arith.constant 0 : i32
    return %c0_i32, %c0_i32_0 : i32, i32
  }
  func.func @transform_3(%arg0: i32, %arg1: i32, %arg2: i32) -> (i32, i32, i32, i32) {
    %0 = arith.muli %arg1, %arg0 : i32
    %1 = arith.muli %arg2, %arg0 : i32
    %c0_i32 = arith.constant 0 : i32
    %c0_i32_0 = arith.constant 0 : i32
    %c0_i32_1 = arith.constant 0 : i32
    return %0, %1, %c0_i32, %c0_i32_0 : i32, i32, i32, i32
  }
}

</mosaic_0001>

<bundles_post_ra>
// kernel: tpu_custom_call.1
= control target key start
LH: loop header
LB: loop body
LE: loop exit
PB: predicated region body
PF: predicated region fallthrough
CT: control target
= control target key end

     0   :  { %s8040_s12 = smov 0   ;;  %s8042_s13 = smov 0   ;;  %s9941_s0 = inlined_call_operand.vmem [shape: f32[2,66,66,3], index: 0, kind: input, shape index: {}]   ;;  %s9942_s1 = inlined_call_operand.vmem [shape: bf16[9,3,8], index: 1, kind: input, shape index: {}]   ;;  %s9943_s2 = inlined_call_operand.vmem [shape: f32[2,8], index: 2, kind: input, shape index: {}]   ;;  %s9944_s3 = inlined_call_operand.vmem [shape: f32[2,64,64,8], index: 3, kind: output, shape index: {}]  }
   0x1   :  { %s8044_s14 = smov 0   ;;  %s8046_s15 = smov 0  }
   0x2   :  { %s8048_s16 = smov 0   ;;  %s8050_s17 = smov 0  }
   0x3   :  { %s8052_s18 = smov 0  }
   0x4 LB: > { %s25_s19 = sadd.s32 1, %s8004_s15  ;;  %s28_s20 = sadd.s32 1, %s8008_s16  ;;  %s8016_s18 = sphi %s8052_s18, %s13_s18   ;;  %s8012_s17 = sphi %s8050_s17, %s10078_s17   ;;  %s8008_s16 = sphi %s8048_s16, %s10077_s16   ;;  %s8004_s15 = sphi %s8046_s15, %s10076_s15   ;;  %s8000_s14 = sphi %s8044_s14, %s10075_s14   ;;  %s7996_s13 = sphi %s8042_s13, %s10074_s13   ;;  %s7992_s12 = sphi %s8040_s12, %s10073_s12  }
   0x5   : > { %p26_p0 = scmp.ge.s32.totalorder %s25_s19, 8  ;;  %p5800_p1 = scmp.ge.s32.totalorder %s8016_s18, 1 }
   0x6   : > { %p162_p2 = scmp.lt.s32.totalorder %s8016_s18, 33  ;;  %s32_s21 = sadd.s32 1, %s8012_s17 }
   0x7   : > { %s10080_s19 = smov (%p26_p0, %s25_s19), 0  ;;  %s10082_s20 = smov (!%p26_p0, %s28_s20), %s8008_s16 }
   0x8   : > { %p163_p3 = pnand %p5800_p1, %p162_p2  ;;  %p30_p4 = scmp.ge.s32.totalorder %s10082_s20, 2 }
   0xa   : > { %s10084_s20 = smov (%p30_p4, %s10082_s20), 0  ;;  %s10086_s21 = smov (!%p30_p4, %s32_s21), %s8012_s17 }
   0xb   : > { %p34_p5 = scmp.ge.s32.totalorder %s10086_s21, 2  ;;  %166 = sbr.rel (%p163_p3) target bundleno = 1083 (0x43b), region = 32 }
   0xd   : > { %s10088_s21 = smov (%p34_p5, %s10086_s21), 0 }
  0x12   : > { %p193_p6 = scmp.lt.s32.totalorder %s7996_s13, 1  ;;  %s198_s22 = smul.u32 %s7996_s13, %s8000_s14 }
  0x13   : > { %s199_s23 = smul.u32 %s7992_s12, %s8000_s14  ;;  %p214_p7 = scmp.eq.s32.totalorder %s8000_s14, 0 }
  0x14   : > { %s194_s24 = scalar_select %p193_p6, %s7996_s13, 1 }
  0x15   : > { %s5802_s25 = sshll.u32 %s199_s23, 3  ;;  %p201_p8 = scmp.lt.s32.totalorder %s198_s22, 1 }
  0x16   : > { %s7901_s26 = smul.u32 4752, %s194_s24  ;;  %p203_p9 = scmp.lt.s32.totalorder %s5802_s25, 63 }
  0x17   : > { %s10090_s22 = smov (!%p201_p8, %s198_s22), 1  ;;  %p215_p10 = scmp.eq.s32.totalorder %s7996_s13, 0 }
  0x18   : > { %s197_s29 = scalar_lea.vmem %s9941_s0, %s7901_s26  ;;  %s10092_s25 = smov (!%p203_p9, %s5802_s25), 63 }
  0x19   : > { %s5804_s30 = sshll.u32 %s10090_s22, 9  ;;  %p216_p11 = pnand %p215_p10, %p214_p7 }
  0x1a   : > { %s5803_s4 = sshll.u32 %s10092_s25, 3  ;;  %p218_p12 = scmp.eq.s32.totalorder %s7992_s12, 0 }
  0x1b   : > { %s207_s5 = sadd.s32 %s5804_s30, %s5803_s4  ;;  %p217_p13 = pneg %p216_p11 }
  0x1c   : > { %s5805_s6 = sshll.u32 %s207_s5, 3 }
  0x1d   : > { %s8103_s9 = scalar_lea.vmem %s9944_s3, %s5805_s6  ;;  %p219_p0 = pnand %p218_p12, %p217_p13 }
  0x1e   : > { %vm223_vm0 = vcmask (!%p219_p0), 57344   ;;  %v8018_v0 = vmov (!%p219_p0), 0.0  }
  0x1f   : > { %222 = sbr.rel (%p219_p0) target bundleno = 38 (0x26), region = 36  ;;  %224 = vst.msk [vmem:[#allocation2] sm:$0x1] (!%p219_p0), %vm223_vm0, %v8018_v0  ;;  %225 = vst.msk [vmem:[#allocation3] sm:$0x1] (!%p219_p0), %vm223_vm0, %v8018_v0 }
  0x26 PF: > { %v5808_v1 = vld [vmem:[%s9942_s1 + $0x2] sm:$0x3]  ;;  %vm521_vm1 = vcmask 1040384   ;;  %vm522_vm2 = vcmask 1041408   ;;  %s5807_s13 = smul.u32 576, %s7992_s12  ;;  %v8019_v2 = vmov 65535  }
  0x27   : > { %v523_v3 = vsel %vm521_vm1, 4294967295, %v8019_v2  ;;  %v6069_v4 = vld [vmem:[%s9942_s1 + $0x8] sm:$0x3]  ;;  %v325_v5 = vld [vmem:[%s9942_s1] sm:$0x3]  ;;  %vm424_vm3 = vcmask 23552  }
  0x28   : > { %v8115_v6 = vsel %vm522_vm2, %v523_v3, 0  ;;  %s8117_s26 = scalar_lea.vmem %s197_s29, %s5807_s13  ;;  %v6166_v7 = vld [vmem:[%s9942_s1 + $0xa] sm:$0x3]  ;;  %v6265_v13 = vld [vmem:[%s9942_s1 + $0xc] sm:$0x3]  ;;  %p6492_p1 = scmp.ne.s32.totalorder %s8000_s14, 0 }
  0x29   : > { %v526_v8 = vand.u32 %v5808_v1, %v8115_v6  ;;  %v8124_v9 = vand.u32 %v6069_v4, %v8115_v6  ;;  %v326_v10 = vld [vmem:[%s8117_s26 + $0x1] sm:$0xff]  ;;  %v327_v11 = vld [vmem:[%s8117_s26 + $0x9] sm:$0xff]  ;;  %v6006_v15 = vld [vmem:[%s8117_s26 + $0x51] sm:$0xff]  ;;  %v914_v18 = vand.u32 %v8115_v6, %v325_v5  ;;  %v3053_v19 = vand.u32 %v6166_v7, %v8115_v6 }
  0x2a   : > { %v6005_v12 = vld [vmem:[%s8117_s26 + $0x49] sm:$0xff]  ;;  %v390_v14 = vpack.c.bf16 %v327_v11, %v326_v10  ;;  %v328_v16 = vld [vmem:[%s8117_s26 + $0x11] sm:$0xff]  ;;  %v329_v17 = vld [vmem:[%s8117_s26 + $0x19] sm:$0xff]  ;;  %v8148_v31 = vand.u32 %v6265_v13, %v8115_v6  ;;  %vm5065_vm4 = vcmask (!%p6492_p1), 64512   ;;  %vm5200_vm5 = vcmask (!%p6492_p1), 57344  }
  0x2b   : > { %6793 = vmatprep.subr.bf16.mxu1 %v526_v8  ;;  %7057 = vmatprep.subr.bf16.mxu0 %v8124_v9  ;;  %v2372_v20 = vpack.c.bf16 %v6006_v15, %v6005_v12  ;;  %v391_v21 = vpack.c.bf16 %v329_v17, %v328_v16  ;;  %v6007_v22 = vld [vmem:[%s8117_s26 + $0x59] sm:$0xff]  ;;  %v6008_v23 = vld [vmem:[%s8117_s26 + $0x61] sm:$0xff]  ;;  %v331_v26 = vld [vmem:[%s8117_s26 + $0x29] sm:$0xff] }
  0x2c   : > { %v330_v24 = vld [vmem:[%s8117_s26 + $0x21] sm:$0xff]  ;;  %6794 = vmatpush3.bf16.msra.mxu1 %v526_v8  ;;  %7058 = vmatpush3.bf16.msra.mxu0 %v8124_v9  ;;  %v2373_v25 = vpack.c.bf16 %v6008_v23, %v6007_v22  ;;  %v6009_v27 = vld [vmem:[%s8117_s26 + $0x69] sm:$0xff]  ;;  %v6010_v28 = vld [vmem:[%s8117_s26 + $0x71] sm:$0xff] }
  0x2d   : > { %6795 = vmatprep.mubr.msk.bf16.mxu1 %vm424_vm3, %v390_v14  ;;  %7059 = vmatprep.mubr.msk.bf16.mxu0 %vm424_vm3, %v2372_v20  ;;  %v392_v29 = vpack.c.bf16 %v331_v26, %v330_v24  ;;  %v2374_v30 = vpack.c.bf16 %v6010_v28, %v6009_v27  ;;  %v332_v32 = vld [vmem:[%s8117_s26 + $0x31] sm:$0xff]  ;;  %v333_v33 = vld [vmem:[%s8117_s26 + $0x39] sm:$0xff]  ;;  %v6012_v35 = vld [vmem:[%s8117_s26 + $0x81] sm:$0xff] }
  0x2e   : > { %6859 = vmatprep.subr.bf16.mxu1 %v914_v18  ;;  %7123 = vmatprep.subr.bf16.mxu0 %v3053_v19  ;;  %v6011_v34 = vld [vmem:[%s8117_s26 + $0x79] sm:$0xff]  ;;  %v6013_v36 = vld [vmem:[%s8117_s26 + $0x91] sm:$0xff]  ;;  %v393_v38 = vpack.c.bf16 %v333_v33, %v332_v32  ;;  %v6015_v41 = vld [vmem:[%s8117_s26 + $0xa1] sm:$0xff] }
  0x2f   : > { %6796 = vmatmul.mubr.msk.bf16.vlgmr.msra.gmra.mrb[0].mxu1 %vm424_vm3, %v391_v21  ;;  %7060 = vmatmul.mubr.msk.bf16.vlgmr.msra.gmra.mrb[0].mxu0 %vm424_vm3, %v2373_v25  ;;  %v6014_v37 = vld [vmem:[%s8117_s26 + $0x99] sm:$0xff]  ;;  %v2375_v39 = vpack.c.bf16 %v6012_v35, %v6011_v34  ;;  %v6016_v42 = vld [vmem:[%s8117_s26 + $0xa9] sm:$0xff]  ;;  %v6017_v43 = vld [vmem:[%s8117_s26 + $0xb1] sm:$0xff] }
  0x30   : > { %6860 = vmatpush3.bf16.msra.mxu1 %v914_v18  ;;  %7124 = vmatpush3.bf16.msra.mxu0 %v3053_v19  ;;  %v2376_v40 = vpack.c.bf16 %v6014_v37, %v6013_v36  ;;  %v6018_v44 = vld [vmem:[%s8117_s26 + $0xb9] sm:$0xff]  ;;  %v2377_v45 = vpack.c.bf16 %v6016_v42, %v6015_v41  ;;  %v6019_v47 = vld [vmem:[%s8117_s26 + $0xc1] sm:$0xff]  ;;  %v6020_v48 = vld [vmem:[%s8117_s26 + $0xc9] sm:$0xff] }
  0x31   : > { %6799 = vmatprep.mubr.msk.bf16.mxu1 %vm424_vm3, %v392_v29  ;;  %7063 = vmatprep.mubr.msk.bf16.mxu0 %vm424_vm3, %v2374_v30  ;;  %v2378_v46 = vpack.c.bf16 %v6018_v44, %v6017_v43  ;;  %v6021_v49 = vld [vmem:[%s8117_s26 + $0xd9] sm:$0xff]  ;;  %v6022_v50 = vld [vmem:[%s8117_s26 + $0xe1] sm:$0xff]  ;;  %v2379_v51 = vpack.c.bf16 %v6020_v48, %v6019_v47  ;;  %v6023_v53 = vld [vmem:[%s8117_s26 + $0xe9] sm:$0xff] }
  0x32   : > { %7189 = vmatprep.subr.bf16.mxu0 %v8148_v31  ;;  %v2380_v52 = vpack.c.bf16 %v6022_v50, %v6021_v49  ;;  %v6024_v54 = vld [vmem:[%s8117_s26 + $0xf1] sm:$0xff]  ;;  %v6025_v55 = vld [vmem:[%s8117_s26 + $0xf9] sm:$0xff]  ;;  %v6026_v56 = vld [vmem:[%s8117_s26 + $0x101] sm:$0xff] }
  0x33   : > { %v2381_v57 = vpack.c.bf16 %v6024_v54, %v6023_v53  ;;  %v5873_v58 = vld [vmem:[%s9942_s1 + $0x4] sm:$0x3]  ;;  %v2382_v59 = vpack.c.bf16 %v6026_v56, %v6025_v55  ;;  %v6027_v61 = vld [vmem:[%s8117_s26 + $0x109] sm:$0xff]  ;;  %v6028_v62 = vld [vmem:[%s8117_s26 + $0x111] sm:$0xff] }
  0x34   : > { %v8189_v60 = vand.u32 %v5873_v58, %v8115_v6  ;;  %v6029_v63 = vld [vmem:[%s8117_s26 + $0x121] sm:$0xff]  ;;  %v6030_v0 = vld [vmem:[%s8117_s26 + $0x129] sm:$0xff]  ;;  %v2383_v1 = vpack.c.bf16 %v6028_v62, %v6027_v61  ;;  %v6031_v3 = vld [vmem:[%s8117_s26 + $0x131] sm:$0xff] }
  0x35   : > { %v2384_v2 = vpack.c.bf16 %v6030_v0, %v6029_v63  ;;  %v6032_v4 = vld [vmem:[%s8117_s26 + $0x139] sm:$0xff]  ;;  %v6033_v5 = vld [vmem:[%s8117_s26 + $0x141] sm:$0xff]  ;;  %v6034_v7 = vld [vmem:[%s8117_s26 + $0x149] sm:$0xff] }
  0x36   : > { %6925 = vmatprep.subr.bf16.mxu1 %v8189_v60  ;;  %v2385_v8 = vpack.c.bf16 %v6032_v4, %v6031_v3  ;;  %v2386_v10 = vpack.c.bf16 %v6034_v7, %v6033_v5  ;;  %v6035_v11 = vld [vmem:[%s8117_s26 + $0x151] sm:$0xff]  ;;  %v6036_v12 = vld [vmem:[%s8117_s26 + $0x159] sm:$0xff]  ;;  %v6105_v18 = vld [vmem:[%s8117_s26 + $0x62] sm:$0xff] }
  0x37   : > { %6800 = vmatmul.mubr.msk.bf16.gmra.mrb[4].mxu1 %vm424_vm3, %v393_v38  ;;  %7064 = vmatmul.mubr.msk.bf16.gmra.mrb[4].mxu0 %vm424_vm3, %v2375_v39  ;;  %v6102_v13 = vld [vmem:[%s8117_s26 + $0x4a] sm:$0xff]  ;;  %v6103_v14 = vld [vmem:[%s8117_s26 + $0x52] sm:$0xff]  ;;  %v2387_v15 = vpack.c.bf16 %v6036_v12, %v6035_v11  ;;  %v6104_v17 = vld [vmem:[%s8117_s26 + $0x5a] sm:$0xff] }
  0x38   : > { %6803 = vmatprep.mubr.msk.bf16.mxu1 %vm424_vm3, %v2372_v20  ;;  %7067 = vmatprep.mubr.msk.bf16.mxu0 %vm424_vm3, %v2376_v40  ;;  %v8216_v16 = vpack.c.bf16 %v6103_v14, %v6102_v13  ;;  %v6106_v19 = vld [vmem:[%s8117_s26 + $0x6a] sm:$0xff]  ;;  %v6107_v20 = vld [vmem:[%s8117_s26 + $0x72] sm:$0xff]  ;;  %v8227_v21 = vpack.c.bf16 %v6105_v18, %v6104_v17  ;;  %v6108_v24 = vld [vmem:[%s8117_s26 + $0x7a] sm:$0xff] }
  0x39   : > { %v8229_v22 = vpack.c.bf16 %v6107_v20, %v6106_v19  ;;  %v6362_v23 = vld [vmem:[%s9942_s1 + $0xe] sm:$0x3]  ;;  %v367_v28 = vld [vmem:[%s8117_s26 + $0x171] sm:$0xff]  ;;  %v368_v34 = vld [vmem:[%s8117_s26 + $0x179] sm:$0xff] }
  0x3a   : > { %v366_v26 = vld [vmem:[%s8117_s26 + $0x169] sm:$0xff]  ;;  %v8243_v27 = vand.u32 %v6362_v23, %v8115_v6  ;;  %v6110_v29 = vld [vmem:[%s8117_s26 + $0x92] sm:$0xff]  ;;  %v369_v35 = vld [vmem:[%s8117_s26 + $0x181] sm:$0xff] }
  0x3b   : > { %v410_v32 = vpack.c.bf16 %v367_v28, %v366_v26  ;;  %v6112_v36 = vld [vmem:[%s8117_s26 + $0xa2] sm:$0xff]  ;;  %v6113_v37 = vld [vmem:[%s8117_s26 + $0xaa] sm:$0xff]  ;;  %v6115_v41 = vld [vmem:[%s8117_s26 + $0xba] sm:$0xff]  ;;  %v411_v42 = vpack.c.bf16 %v369_v35, %v368_v34 }
  0x3c   : > { %v370_v38 = vld [vmem:[%s8117_s26 + $0x189] sm:$0xff]  ;;  %v8269_v43 = vpack.c.bf16 %v6113_v37, %v6112_v36  ;;  %v373_v47 = vld [vmem:[%s8117_s26 + $0x1a1] sm:$0xff]  ;;  %v374_v50 = vld [vmem:[%s8117_s26 + $0x1b1] sm:$0xff] }
  0x3d   : > { %v6116_v48 = vld [vmem:[%s8117_s26 + $0xc2] sm:$0xff]  ;;  %v6117_v49 = vld [vmem:[%s8117_s26 + $0xca] sm:$0xff]  ;;  %v6121_v62 = vld [vmem:[%s8117_s26 + $0xf2] sm:$0xff] }
  0x3e   : > { %v6119_v53 = vld [vmem:[%s8117_s26 + $0xe2] sm:$0xff]  ;;  %v8287_v55 = vpack.c.bf16 %v6117_v49, %v6116_v48  ;;  %v6120_v61 = vld [vmem:[%s8117_s26 + $0xea] sm:$0xff]  ;;  %v379_v0 = vld [vmem:[%s8117_s26 + $0x1d9] sm:$0xff] }
  0x3f   : > { %6804 = vmatmul.mubr.msk.bf16.gmra.mrb[8].mxu1 %vm424_vm3, %v2373_v25  ;;  %7068 = vmatmul.mubr.msk.bf16.gmra.mrb[8].mxu0 %vm424_vm3, %v2377_v45  ;;  %v6109_v25 = vld [vmem:[%s8117_s26 + $0x82] sm:$0xff]  ;;  %v378_v63 = vld [vmem:[%s8117_s26 + $0x1d1] sm:$0xff]  ;;  %v8305_v4 = vpack.c.bf16 %v6121_v62, %v6120_v61  ;;  %v382_v13 = vld [vmem:[%s8117_s26 + $0x1f9] sm:$0xff] }
  0x40   : > { %6807 = vmatprep.mubr.msk.bf16.mxu1 %vm424_vm3, %v2374_v30  ;;  %7071 = vmatprep.mubr.msk.bf16.mxu0 %vm424_vm3, %v2378_v46  ;;  %v6111_v30 = vld [vmem:[%s8117_s26 + $0x9a] sm:$0xff]  ;;  %v416_v5 = vpack.c.bf16 %v379_v0, %v378_v63  ;;  %v6124_v11 = vld [vmem:[%s8117_s26 + $0x10a] sm:$0xff]  ;;  %v6125_v12 = vld [vmem:[%s8117_s26 + $0x112] sm:$0xff] }
  0x41   : > { %v8253_v33 = vpack.c.bf16 %v6111_v30, %v6110_v29  ;;  %v376_v58 = vld [vmem:[%s8117_s26 + $0x1c1] sm:$0xff]  ;;  %v6127_v17 = vld [vmem:[%s8117_s26 + $0x12a] sm:$0xff]  ;;  %v8323_v19 = vpack.c.bf16 %v6125_v12, %v6124_v11  ;;  %v6128_v26 = vld [vmem:[%s8117_s26 + $0x132] sm:$0xff] }
  0x42   : > { %v383_v14 = vld [vmem:[%s8117_s26 + $0x201] sm:$0xff]  ;;  %v386_v29 = vld [vmem:[%s8117_s26 + $0x219] sm:$0xff]  ;;  %v6131_v34 = vld [vmem:[%s8117_s26 + $0x14a] sm:$0xff] }
  0x43   : > { %v418_v20 = vpack.c.bf16 %v383_v14, %v382_v13  ;;  %v6129_v28 = vld [vmem:[%s8117_s26 + $0x13a] sm:$0xff]  ;;  %v6135_v48 = vld [vmem:[%s8117_s26 + $0x172] sm:$0xff]  ;;  %v234_v61 = vld [vmem:[%s8117_s26 + $0x28] sm:$0xff] }
  0x44   : > { %v387_v30 = vld [vmem:[%s8117_s26 + $0x221] sm:$0xff]  ;;  %v8341_v36 = vpack.c.bf16 %v6129_v28, %v6128_v26  ;;  %v6138_v62 = vld [vmem:[%s8117_s26 + $0x18a] sm:$0xff]  ;;  %v6139_v63 = vld [vmem:[%s8117_s26 + $0x192] sm:$0xff] }
  0x45   : > { %v420_v37 = vpack.c.bf16 %v387_v30, %v386_v29  ;;  %v6140_v11 = vld [vmem:[%s8117_s26 + $0x19a] sm:$0xff]  ;;  %v6141_v12 = vld [vmem:[%s8117_s26 + $0x1a2] sm:$0xff]  ;;  %v6145_v30 = vld [vmem:[%s8117_s26 + $0x1ca] sm:$0xff] }
  0x46   : > { %v237_v13 = vld [vmem:[%s8117_s26 + $0x48] sm:$0xff]  ;;  %v239_v26 = vld [vmem:[%s8117_s26 + $0x58] sm:$0xff]  ;;  %v240_v28 = vld [vmem:[%s8117_s26 + $0x60] sm:$0xff] }
  0x47   : > { %6808 = vmatmul.mubr.msk.bf16.gmra.mrb[12].mxu1 %vm424_vm3, %v2375_v39  ;;  %7072 = vmatmul.mubr.msk.bf16.gmra.mrb[12].mxu0 %vm424_vm3, %v2379_v51  ;;  %v371_v39 = vld [vmem:[%s8117_s26 + $0x191] sm:$0xff]  ;;  %v6144_v29 = vld [vmem:[%s8117_s26 + $0x1c2] sm:$0xff] }
  0x48   : > { %6811 = vmatprep.mubr.msk.bf16.mxu1 %vm424_vm3, %v2376_v40  ;;  %7075 = vmatprep.mubr.msk.bf16.mxu0 %vm424_vm3, %v2380_v52  ;;  %v6114_v40 = vld [vmem:[%s8117_s26 + $0xb2] sm:$0xff]  ;;  %v412_v44 = vpack.c.bf16 %v371_v39, %v370_v38  ;;  %v388_v39 = vld [vmem:[%s8117_s26 + $0x229] sm:$0xff] }
  0x4f   : > { %6812 = vmatmul.mubr.msk.bf16.gmra.mrb[16].mxu1 %vm424_vm3, %v2377_v45  ;;  %7076 = vmatmul.mubr.msk.bf16.gmra.mrb[16].mxu0 %vm424_vm3, %v2381_v57  ;;  %v8271_v45 = vpack.c.bf16 %v6115_v41, %v6114_v40  ;;  %v389_v40 = vld [vmem:[%s8117_s26 + $0x231] sm:$0xff] }
  0x50   : > { %6815 = vmatprep.mubr.msk.bf16.mxu1 %vm424_vm3, %v2378_v46  ;;  %7079 = vmatprep.mubr.msk.bf16.mxu0 %vm424_vm3, %v2382_v59  ;;  %v372_v46 = vld [vmem:[%s8117_s26 + $0x199] sm:$0xff]  ;;  %v421_v49 = vpack.c.bf16 %v389_v40, %v388_v39  ;;  %v8424_v39 = vpack.c.bf16 %v240_v28, %v239_v26  ;;  %v8426_v40 = vpack.c.bf16 %v6145_v30, %v6144_v29  ;;  %v6156_v26 = vld [vmem:[%s8117_s26 + $0x22a] sm:$0xff] }
  0x51   : > { %v413_v54 = vpack.c.bf16 %v373_v47, %v372_v46  ;;  %v6132_v41 = vld [vmem:[%s8117_s26 + $0x152] sm:$0xff]  ;;  %v230_v46 = vld [vmem:[%s8117_s26 + $0x8] sm:$0xff]  ;;  %v254_v30 = vld [vmem:[%s8117_s26 + $0xe0] sm:$0xff] }
  0x52   : > { %v6134_v47 = vld [vmem:[%s8117_s26 + $0x16a] sm:$0xff]  ;;  %v6157_v28 = vld [vmem:[%s8117_s26 + $0x232] sm:$0xff] }
  0x53   : > { %v253_v29 = vld [vmem:[%s8117_s26 + $0xd8] sm:$0xff] }
  0x57   : > { %6816 = vmatmul.mubr.msk.bf16.gmra.mrb[20].mxu1 %vm424_vm3, %v2379_v51  ;;  %7080 = vmatmul.mubr.msk.bf16.gmra.mrb[20].mxu0 %vm424_vm3, %v2383_v1  ;;  %v375_v51 = vld [vmem:[%s8117_s26 + $0x1b9] sm:$0xff] }
  0x58   : > { %6819 = vmatprep.mubr.msk.bf16.mxu1 %vm424_vm3, %v2380_v52  ;;  %7083 = vmatprep.mubr.msk.bf16.mxu0 %vm424_vm3, %v2384_v2  ;;  %v6118_v52 = vld [vmem:[%s8117_s26 + $0xda] sm:$0xff]  ;;  %v414_v56 = vpack.c.bf16 %v375_v51, %v374_v50 }
  0x5f   : > { %6820 = vmatmul.mubr.msk.bf16.gmra.mrb[24].mxu1 %vm424_vm3, %v2381_v57  ;;  %7084 = vmatmul.mubr.msk.bf16.gmra.mrb[24].mxu0 %vm424_vm3, %v2385_v8  ;;  %v8289_v57 = vpack.c.bf16 %v6119_v53, %v6118_v52  ;;  %v8361_v52 = vpack.c.bf16 %v6135_v48, %v6134_v47  ;;  %v231_v53 = vld [vmem:[%s8117_s26 + $0x10] sm:$0xff]  ;;  %v6148_v47 = vld [vmem:[%s8117_s26 + $0x1e2] sm:$0xff] }
  0x60   : > { %6823 = vmatprep.mubr.msk.bf16.mxu1 %vm424_vm3, %v2382_v59  ;;  %7087 = vmatprep.mubr.msk.bf16.mxu0 %vm424_vm3, %v2386_v10  ;;  %v377_v59 = vld [vmem:[%s8117_s26 + $0x1c9] sm:$0xff] }
  0x61   : > { %v415_v3 = vpack.c.bf16 %v377_v59, %v376_v58  ;;  %v6137_v58 = vld [vmem:[%s8117_s26 + $0x182] sm:$0xff]  ;;  %v6149_v48 = vld [vmem:[%s8117_s26 + $0x1ea] sm:$0xff] }
  0x62   : > { %v233_v59 = vld [vmem:[%s8117_s26 + $0x20] sm:$0xff] }
  0x67   : > { %6824 = vmatmul.mubr.msk.bf16.gmra.mrb[28].mxu1 %vm424_vm3, %v2383_v1  ;;  %7088 = vmatmul.mubr.msk.bf16.gmra.mrb[28].mxu0 %vm424_vm3, %v2387_v15  ;;  %v6122_v1 = vld [vmem:[%s8117_s26 + $0xfa] sm:$0xff] }
  0x68   : > { %6827 = vmatprep.mubr.msk.bf16.mxu1 %vm424_vm3, %v2384_v2  ;;  %7125 = vmatprep.mubr.msk.bf16.mxu0 %vm424_vm3, %v8216_v16  ;;  %v6123_v2 = vld [vmem:[%s8117_s26 + $0x102] sm:$0xff] }
  0x69   : > { %v8307_v7 = vpack.c.bf16 %v6123_v2, %v6122_v1  ;;  %v295_v2 = vpack.c.bf16 %v234_v61, %v233_v59 }
  0x6f   : > { %6828 = vmatmul.mubr.msk.bf16.gmra.mrb[32].mxu1 %vm424_vm3, %v2385_v8  ;;  %7126 = vmatmul.mubr.msk.bf16.vlgmr.msra.gmra.mrb[0].mxu0 %vm424_vm3, %v8227_v21  ;;  %v380_v8 = vld [vmem:[%s8117_s26 + $0x1e1] sm:$0xff] }
  0x70   : > { %7190 = vmatpush3.bf16.msra.mxu0 %v8148_v31  ;;  %6831 = vmatprep.mubr.msk.bf16.mxu1 %vm424_vm3, %v2386_v10  ;;  %v8251_v31 = vpack.c.bf16 %v6109_v25, %v6108_v24  ;;  %v381_v10 = vld [vmem:[%s8117_s26 + $0x1e9] sm:$0xff]  ;;  %v385_v25 = vld [vmem:[%s8117_s26 + $0x211] sm:$0xff] }
  0x71   : > { %7129 = vmatprep.mubr.msk.bf16.mxu0 %vm424_vm3, %v8229_v22  ;;  %7255 = vmatprep.subr.bf16.mxu0 %v8243_v27  ;;  %v417_v18 = vpack.c.bf16 %v381_v10, %v380_v8  ;;  %v384_v24 = vld [vmem:[%s8117_s26 + $0x209] sm:$0xff]  ;;  %v236_v8 = vld [vmem:[%s8117_s26 + $0x38] sm:$0xff]  ;;  %v5972_v10 = vld [vmem:[%s9942_s1 + $0x6] sm:$0x3] }
  0x72   : > { %v419_v35 = vpack.c.bf16 %v385_v25, %v384_v24  ;;  %v8395_v14 = vand.u32 %v5972_v10, %v8115_v6  ;;  %v6154_v10 = vld [vmem:[%s8117_s26 + $0x21a] sm:$0xff] }
  0x77   : > { %6832 = vmatmul.mubr.msk.bf16.gmra.mrb[36].mxu1 %vm424_vm3, %v2387_v15  ;;  %7130 = vmatmul.mubr.msk.bf16.gmra.mrb[4].mxu0 %vm424_vm3, %v8251_v31  ;;  %v6126_v15 = vld [vmem:[%s8117_s26 + $0x122] sm:$0xff] }
  0x78   : > { %6835 = vmatprep.mubr.msk.bf16.mxu1 %vm424_vm3, %v410_v32  ;;  %7133 = vmatprep.mubr.msk.bf16.mxu0 %vm424_vm3, %v8253_v33  ;;  %v8325_v23 = vpack.c.bf16 %v6127_v17, %v6126_v15  ;;  %v6130_v32 = vld [vmem:[%s8117_s26 + $0x142] sm:$0xff]  ;;  %v238_v15 = vld [vmem:[%s8117_s26 + $0x50] sm:$0xff] }
  0x79   : > { %v8343_v38 = vpack.c.bf16 %v6131_v34, %v6130_v32  ;;  %v6142_v17 = vld [vmem:[%s8117_s26 + $0x1b2] sm:$0xff]  ;;  %v8405_v24 = vpack.c.bf16 %v238_v15, %v237_v13  ;;  %v241_v32 = vld [vmem:[%s8117_s26 + $0x68] sm:$0xff] }
  0x7a   : > { %v242_v34 = vld [vmem:[%s8117_s26 + $0x70] sm:$0xff] }
  0x7f   : > { %6836 = vmatmul.mubr.msk.bf16.gmra.mrb[40].mxu1 %vm424_vm3, %v411_v42  ;;  %7134 = vmatmul.mubr.msk.bf16.gmra.mrb[8].mxu0 %vm424_vm3, %v8269_v43  ;;  %v6133_v42 = vld [vmem:[%s8117_s26 + $0x15a] sm:$0xff] }
  0x80   : > { %6839 = vmatprep.mubr.msk.bf16.mxu1 %vm424_vm3, %v412_v44  ;;  %7137 = vmatprep.mubr.msk.bf16.mxu0 %vm424_vm3, %v8271_v45  ;;  %v229_v44 = vld [vmem:[%s8117_s26] sm:$0xff]  ;;  %v8359_v50 = vpack.c.bf16 %v6133_v42, %v6132_v41  ;;  %v8428_v41 = vpack.c.bf16 %v242_v34, %v241_v32  ;;  %v6159_v34 = vld [vmem:[%s8117_s26 + $0x24a] sm:$0xff] }
  0x81   : > { %v293_v51 = vpack.c.bf16 %v230_v46, %v229_v44  ;;  %v243_v44 = vld [vmem:[%s8117_s26 + $0x78] sm:$0xff]  ;;  %v244_v46 = vld [vmem:[%s8117_s26 + $0x80] sm:$0xff] }
  0x82   : > { %v6158_v32 = vld [vmem:[%s8117_s26 + $0x242] sm:$0xff] }
  0x87   : > { %6840 = vmatmul.mubr.msk.bf16.gmra.mrb[44].mxu1 %vm424_vm3, %v413_v54  ;;  %7138 = vmatmul.mubr.msk.bf16.gmra.mrb[12].mxu0 %vm424_vm3, %v8287_v55  ;;  %v232_v54 = vld [vmem:[%s8117_s26 + $0x18] sm:$0xff] }
  0x88   : > { %6843 = vmatprep.mubr.msk.bf16.mxu1 %vm424_vm3, %v414_v56  ;;  %7141 = vmatprep.mubr.msk.bf16.mxu0 %vm424_vm3, %v8289_v57  ;;  %v6136_v56 = vld [vmem:[%s8117_s26 + $0x17a] sm:$0xff]  ;;  %v294_v0 = vpack.c.bf16 %v232_v54, %v231_v53  ;;  %v6151_v54 = vld [vmem:[%s8117_s26 + $0x202] sm:$0xff] }
  0x89   : > { %v8377_v1 = vpack.c.bf16 %v6137_v58, %v6136_v56  ;;  %v6150_v53 = vld [vmem:[%s8117_s26 + $0x1fa] sm:$0xff]  ;;  %v8448_v56 = vpack.c.bf16 %v244_v46, %v243_v44  ;;  %v8450_v58 = vpack.c.bf16 %v6149_v48, %v6148_v47  ;;  %v8500_v44 = vpack.c.bf16 %v254_v30, %v253_v29  ;;  %v255_v47 = vld [vmem:[%s8117_s26 + $0xe8] sm:$0xff]  ;;  %v256_v48 = vld [vmem:[%s8117_s26 + $0xf0] sm:$0xff] }
  0x8a   : > { %v8454_v61 = vpack.c.bf16 %v6151_v54, %v6150_v53  ;;  %v2950_v46 = vpack.c.bf16 %v6159_v34, %v6158_v32  ;;  %v257_v53 = vld [vmem:[%s8117_s26 + $0xf8] sm:$0xff]  ;;  %v258_v54 = vld [vmem:[%s8117_s26 + $0x100] sm:$0xff]  ;;  %v263_v34 = vld [vmem:[%s8117_s26 + $0x130] sm:$0xff] }
  0x8f   : > { %6844 = vmatmul.mubr.msk.bf16.gmra.mrb[48].mxu1 %vm424_vm3, %v415_v3  ;;  %7142 = vmatmul.mubr.msk.bf16.gmra.mrb[16].mxu0 %vm424_vm3, %v8305_v4  ;;  %v8379_v3 = vpack.c.bf16 %v6139_v63, %v6138_v62  ;;  %v247_v62 = vld [vmem:[%s8117_s26 + $0xa0] sm:$0xff]  ;;  %v248_v63 = vld [vmem:[%s8117_s26 + $0xa8] sm:$0xff] }
  0x90   : > { %6847 = vmatprep.mubr.msk.bf16.mxu1 %vm424_vm3, %v416_v5  ;;  %7145 = vmatprep.mubr.msk.bf16.mxu0 %vm424_vm3, %v8307_v7  ;;  %v235_v5 = vld [vmem:[%s8117_s26 + $0x30] sm:$0xff] }
  0x97   : > { %6848 = vmatmul.mubr.msk.bf16.gmra.mrb[52].mxu1 %vm424_vm3, %v417_v18  ;;  %7146 = vmatmul.mubr.msk.bf16.gmra.mrb[20].mxu0 %vm424_vm3, %v8323_v19  ;;  %v296_v18 = vpack.c.bf16 %v236_v8, %v235_v5  ;;  %v249_v5 = vld [vmem:[%s8117_s26 + $0xb0] sm:$0xff]  ;;  %v250_v8 = vld [vmem:[%s8117_s26 + $0xb8] sm:$0xff] }
  0x98   : > { %6851 = vmatprep.mubr.msk.bf16.mxu1 %vm424_vm3, %v418_v20  ;;  %7149 = vmatprep.mubr.msk.bf16.mxu0 %vm424_vm3, %v8325_v23  ;;  %v8403_v20 = vpack.c.bf16 %v6141_v12, %v6140_v11  ;;  %v6155_v11 = vld [vmem:[%s8117_s26 + $0x222] sm:$0xff]  ;;  %v8472_v12 = vpack.c.bf16 %v248_v63, %v247_v62  ;;  %v8476_v15 = vpack.c.bf16 %v250_v8, %v249_v5  ;;  %v6163_v63 = vld [vmem:[%s8117_s26 + $0x26a] sm:$0xff] }
  0x99   : > { %v6162_v62 = vld [vmem:[%s8117_s26 + $0x262] sm:$0xff]  ;;  %v8519_v5 = vpack.c.bf16 %v258_v54, %v257_v53  ;;  %v6459_v53 = vld [vmem:[%s9942_s1 + $0x10] sm:$0x3] }
  0x9a   : > { %v2952_v8 = vpack.c.bf16 %v6163_v63, %v6162_v62  ;;  %v267_v54 = vld [vmem:[%s8117_s26 + $0x150] sm:$0xff]  ;;  %v268_v62 = vld [vmem:[%s8117_s26 + $0x158] sm:$0xff]  ;;  %v8565_v63 = vand.u32 %v6459_v53, %v8115_v6 }
  0x9b   : > { %v271_v6 = vld [vmem:[%s8117_s26 + $0x178] sm:$0xff] }
  0x9f   : > { %6852 = vmatmul.mubr.msk.bf16.gmra.mrb[56].mxu1 %vm424_vm3, %v419_v35  ;;  %7150 = vmatmul.mubr.msk.bf16.gmra.mrb[24].mxu0 %vm424_vm3, %v8341_v36  ;;  %v6146_v35 = vld [vmem:[%s8117_s26 + $0x1d2] sm:$0xff] }
  0xa0   : > { %6855 = vmatprep.mubr.msk.bf16.mxu1 %vm424_vm3, %v420_v37  ;;  %7153 = vmatprep.mubr.msk.bf16.mxu0 %vm424_vm3, %v8343_v38  ;;  %v6147_v37 = vld [vmem:[%s8117_s26 + $0x1da] sm:$0xff] }
  0xa1   : > { %v8430_v42 = vpack.c.bf16 %v6147_v37, %v6146_v35  ;;  %v8498_v37 = vpack.c.bf16 %v6157_v28, %v6156_v26  ;;  %v261_v26 = vld [vmem:[%s8117_s26 + $0x120] sm:$0xff]  ;;  %v262_v28 = vld [vmem:[%s8117_s26 + $0x128] sm:$0xff] }
  0xa2   : > { %v8535_v32 = vpack.c.bf16 %v262_v28, %v261_v26 }
  0xa7   : > { %6856 = vmatmul.mubr.msk.bf16.gmra.mrb[60].mxu1 %vm424_vm3, %v421_v49  ;;  %7154 = vmatmul.mubr.msk.bf16.gmra.mrb[28].mxu0 %vm424_vm3, %v8359_v50  ;;  %v245_v49 = vld [vmem:[%s8117_s26 + $0x90] sm:$0xff] }
  0xa8   : > { %6861 = vmatprep.mubr.msk.bf16.mxu1 %vm424_vm3, %v293_v51  ;;  %7157 = vmatprep.mubr.msk.bf16.mxu0 %vm424_vm3, %v8361_v52  ;;  %v246_v51 = vld [vmem:[%s8117_s26 + $0x98] sm:$0xff] }
  0xa9   : > { %v8452_v59 = vpack.c.bf16 %v246_v51, %v245_v49  ;;  %v6160_v49 = vld [vmem:[%s8117_s26 + $0x252] sm:$0xff]  ;;  %v6161_v51 = vld [vmem:[%s8117_s26 + $0x25a] sm:$0xff] }
  0xaf   : > { %6862 = vmatmul.mubr.msk.bf16.vlgmr.msra.gmra.mrb[0].mxu1 %vm424_vm3, %v294_v0  ;;  %7158 = vmatmul.mubr.msk.bf16.gmra.mrb[32].mxu0 %vm424_vm3, %v8377_v1  ;;  %v6152_v0 = vld [vmem:[%s8117_s26 + $0x20a] sm:$0xff] }
  0xb0   : > { %6926 = vmatpush3.bf16.msra.mxu1 %v8189_v60  ;;  %6865 = vmatprep.mubr.msk.bf16.mxu1 %vm424_vm3, %v295_v2  ;;  %v6143_v60 = vld [vmem:[%s8117_s26 + $0x1ba] sm:$0xff]  ;;  %v6153_v2 = vld [vmem:[%s8117_s26 + $0x212] sm:$0xff] }
  0xb1   : > { %7161 = vmatprep.mubr.msk.bf16.mxu0 %vm424_vm3, %v8379_v3  ;;  %6991 = vmatprep.subr.bf16.mxu1 %v8395_v14  ;;  %v8407_v25 = vpack.c.bf16 %v6143_v60, %v6142_v17  ;;  %v8474_v13 = vpack.c.bf16 %v6153_v2, %v6152_v0  ;;  %v8478_v17 = vpack.c.bf16 %v6155_v11, %v6154_v10  ;;  %v251_v60 = vld [vmem:[%s8117_s26 + $0xc0] sm:$0xff]  ;;  %v259_v10 = vld [vmem:[%s8117_s26 + $0x108] sm:$0xff]  ;;  %v260_v11 = vld [vmem:[%s8117_s26 + $0x110] sm:$0xff] }
  0xb2   : > { %v8517_v0 = vpack.c.bf16 %v256_v48, %v255_v47  ;;  %v2951_v2 = vpack.c.bf16 %v6161_v51, %v6160_v49  ;;  %v8533_v29 = vpack.c.bf16 %v260_v11, %v259_v10  ;;  %v265_v47 = vld [vmem:[%s8117_s26 + $0x140] sm:$0xff]  ;;  %v266_v48 = vld [vmem:[%s8117_s26 + $0x148] sm:$0xff]  ;;  %v8572_v10 = vpack.c.bf16 %v268_v62, %v267_v54 }
  0xb3   : > { %v8550_v51 = vpack.c.bf16 %v266_v48, %v265_v47  ;;  %v272_v11 = vld [vmem:[%s8117_s26 + $0x180] sm:$0xff]  ;;  %v278_v47 = vld [vmem:[%s8117_s26 + $0x1b8] sm:$0xff]  ;;  %v280_v62 = vld [vmem:[%s8117_s26 + $0x1c8] sm:$0xff] }
  0xb4   : > { %9983 = vst [vmem:[#allocation4_spill] sm:$0xff] %v8572_v10  ;;  %v8588_v26 = vpack.c.bf16 %v272_v11, %v271_v6  ;;  %v279_v54 = vld [vmem:[%s8117_s26 + $0x1c0] sm:$0xff] }
  0xb5   : > { %v8620_v6 = vpack.c.bf16 %v280_v62, %v279_v54  ;;  %v287_v54 = vld [vmem:[%s8117_s26 + $0x208] sm:$0xff]  ;;  %v288_v62 = vld [vmem:[%s8117_s26 + $0x210] sm:$0xff] }
  0xb6   : > { %9985 = vst [vmem:[#allocation6_spill] sm:$0xff] %v8588_v26 }
  0xb7   : > { %6866 = vmatmul.mubr.msk.bf16.gmra.mrb[4].mxu1 %vm424_vm3, %v296_v18  ;;  %7162 = vmatmul.mubr.msk.bf16.gmra.mrb[36].mxu0 %vm424_vm3, %v8403_v20  ;;  %v252_v18 = vld [vmem:[%s8117_s26 + $0xc8] sm:$0xff] }
  0xb8   : > { %6869 = vmatprep.mubr.msk.bf16.mxu1 %vm424_vm3, %v8405_v24  ;;  %7165 = vmatprep.mubr.msk.bf16.mxu0 %vm424_vm3, %v8407_v25  ;;  %v8496_v35 = vpack.c.bf16 %v252_v18, %v251_v60  ;;  %v6164_v60 = vld [vmem:[%s8117_s26 + $0x272] sm:$0xff]  ;;  %v6165_v18 = vld [vmem:[%s8117_s26 + $0x27a] sm:$0xff] }
  0xb9   : > { %v2953_v30 = vpack.c.bf16 %v6165_v18, %v6164_v60  ;;  %v273_v60 = vld [vmem:[%s8117_s26 + $0x188] sm:$0xff]  ;;  %v274_v18 = vld [vmem:[%s8117_s26 + $0x190] sm:$0xff] }
  0xba   : > { %v8590_v28 = vpack.c.bf16 %v274_v18, %v273_v60  ;;  %v283_v60 = vld [vmem:[%s8117_s26 + $0x1e0] sm:$0xff]  ;;  %v284_v18 = vld [vmem:[%s8117_s26 + $0x1e8] sm:$0xff] }
  0xbc   : > { %9986 = vst [vmem:[#allocation7_spill] sm:$0xff] %v8590_v28 }
  0xbf   : > { %6870 = vmatmul.mubr.msk.bf16.gmra.mrb[8].mxu1 %vm424_vm3, %v8424_v39  ;;  %7166 = vmatmul.mubr.msk.bf16.gmra.mrb[40].mxu0 %vm424_vm3, %v8426_v40 }
  0xc0   : > { %6873 = vmatprep.mubr.msk.bf16.mxu1 %vm424_vm3, %v8428_v41  ;;  %7169 = vmatprep.mubr.msk.bf16.mxu0 %vm424_vm3, %v8430_v42 }
  0xc7   : > { %6874 = vmatmul.mubr.msk.bf16.gmra.mrb[12].mxu1 %vm424_vm3, %v8448_v56  ;;  %7170 = vmatmul.mubr.msk.bf16.gmra.mrb[44].mxu0 %vm424_vm3, %v8450_v58 }
  0xc8   : > { %6877 = vmatprep.mubr.msk.bf16.mxu1 %vm424_vm3, %v8452_v59  ;;  %7173 = vmatprep.mubr.msk.bf16.mxu0 %vm424_vm3, %v8454_v61 }
  0xcf   : > { %6878 = vmatmul.mubr.msk.bf16.gmra.mrb[16].mxu1 %vm424_vm3, %v8472_v12  ;;  %7174 = vmatmul.mubr.msk.bf16.gmra.mrb[48].mxu0 %vm424_vm3, %v8474_v13 }
  0xd0   : > { %6881 = vmatprep.mubr.msk.bf16.mxu1 %vm424_vm3, %v8476_v15  ;;  %7177 = vmatprep.mubr.msk.bf16.mxu0 %vm424_vm3, %v8478_v17 }
  0xd7   : > { %6882 = vmatmul.mubr.msk.bf16.gmra.mrb[20].mxu1 %vm424_vm3, %v8496_v35  ;;  %7178 = vmatmul.mubr.msk.bf16.gmra.mrb[52].mxu0 %vm424_vm3, %v8498_v37 }
  0xd8   : > { %6885 = vmatprep.mubr.msk.bf16.mxu1 %vm424_vm3, %v8500_v44  ;;  %7181 = vmatprep.mubr.msk.bf16.mxu0 %vm424_vm3, %v2950_v46  ;;  %v264_v46 = vld [vmem:[%s8117_s26 + $0x138] sm:$0xff] }
  0xd9   : > { %v8548_v49 = vpack.c.bf16 %v264_v46, %v263_v34  ;;  %v276_v34 = vld [vmem:[%s8117_s26 + $0x1a0] sm:$0xff]  ;;  %v277_v46 = vld [vmem:[%s8117_s26 + $0x1b0] sm:$0xff] }
  0xda   : > { %v8606_v53 = vpack.c.bf16 %v278_v47, %v277_v46  ;;  %v8636_v46 = vpack.c.bf16 %v284_v18, %v283_v60  ;;  %v8652_v60 = vpack.c.bf16 %v288_v62, %v287_v54  ;;  %v1205_v54 = vld [vmem:[%s8117_s26 + $0x2] sm:$0xff]  ;;  %v1206_v62 = vld [vmem:[%s8117_s26 + $0xa] sm:$0xff] }
  0xdf   : > { %6886 = vmatmul.mubr.msk.bf16.gmra.mrb[24].mxu1 %vm424_vm3, %v8517_v0  ;;  %7182 = vmatmul.mubr.msk.bf16.gmra.mrb[56].mxu0 %vm424_vm3, %v2951_v2  ;;  %v269_v2 = vld [vmem:[%s8117_s26 + $0x168] sm:$0xff] }
  0xe0   : > { %6889 = vmatprep.mubr.msk.bf16.mxu1 %vm424_vm3, %v8519_v5  ;;  %7185 = vmatprep.mubr.msk.bf16.mxu0 %vm424_vm3, %v2952_v8  ;;  %v270_v8 = vld [vmem:[%s8117_s26 + $0x170] sm:$0xff] }
  0xe7   : > { %6890 = vmatmul.mubr.msk.bf16.gmra.mrb[28].mxu1 %vm424_vm3, %v8533_v29  ;;  %7186 = vmatmul.mubr.msk.bf16.gmra.mrb[60].mxu0 %vm424_vm3, %v2953_v30  ;;  %v275_v30 = vld [vmem:[%s8117_s26 + $0x198] sm:$0xff] }
  0xe8   : > { %6893 = vmatprep.mubr.msk.bf16.mxu1 %vm424_vm3, %v8535_v32  ;;  %7191 = vmatprep.mubr.msk.bf16.mxu0 %vm424_vm3, %v8452_v59  ;;  %v8604_v48 = vpack.c.bf16 %v276_v34, %v275_v30  ;;  %v285_v30 = vld [vmem:[%s8117_s26 + $0x1f8] sm:$0xff]  ;;  %v286_v34 = vld [vmem:[%s8117_s26 + $0x200] sm:$0xff] }
  0xe9   : > { %v8638_v47 = vpack.c.bf16 %v286_v34, %v285_v30  ;;  %v291_v30 = vld [vmem:[%s8117_s26 + $0x228] sm:$0xff]  ;;  %v292_v34 = vld [vmem:[%s8117_s26 + $0x230] sm:$0xff] }
  0xef   : > { %6894 = vmatmul.mubr.msk.bf16.gmra.mrb[32].mxu1 %vm424_vm3, %v8548_v49  ;;  %7192 = vmatmul.mubr.msk.bf16.vlgmr.msra.gmra.mrb[0].mxu0 %vm424_vm3, %v8472_v12 }
  0xf0   : > { %7256 = vmatpush3.bf16.msra.mxu0 %v8243_v27  ;;  %6897 = vmatprep.mubr.msk.bf16.mxu1 %vm424_vm3, %v8550_v51  ;;  %v8574_v27 = vpack.c.bf16 %v270_v8, %v269_v2  ;;  %v281_v2 = vld [vmem:[%s8117_s26 + $0x1d0] sm:$0xff]  ;;  %v282_v8 = vld [vmem:[%s8117_s26 + $0x1d8] sm:$0xff] }
  0xf1   : > { %7195 = vmatprep.mubr.msk.bf16.mxu0 %vm424_vm3, %v8476_v15  ;;  %7321 = vmatprep.subr.bf16.mxu0 %v8565_v63  ;;  %v8622_v11 = vpack.c.bf16 %v282_v8, %v281_v2  ;;  %v289_v2 = vld [vmem:[%s8117_s26 + $0x218] sm:$0xff]  ;;  %v290_v8 = vld [vmem:[%s8117_s26 + $0x220] sm:$0xff] }
  0xf2   : > { %9984 = vst [vmem:[#allocation5_spill] sm:$0xff] %v8574_v27  ;;  %v8654_v18 = vpack.c.bf16 %v290_v8, %v289_v2  ;;  %v8668_v2 = vpack.c.bf16 %v292_v34, %v291_v30  ;;  %v1269_v8 = vpack.c.bf16 %v1206_v62, %v1205_v54  ;;  %v1211_v54 = vld [vmem:[%s8117_s26 + $0x32] sm:$0xff]  ;;  %v1212_v62 = vld [vmem:[%s8117_s26 + $0x3a] sm:$0xff] }
  0xf7   : > { %6898 = vmatmul.mubr.msk.bf16.gmra.mrb[36].mxu1 %vm424_vm3, %v8572_v10  ;;  %7196 = vmatmul.mubr.msk.bf16.gmra.mrb[4].mxu0 %vm424_vm3, %v8496_v35 }
  0xf8   : > { %6901 = vmatprep.mubr.msk.bf16.mxu1 %vm424_vm3, %v8574_v27  ;;  %7199 = vmatprep.mubr.msk.bf16.mxu0 %vm424_vm3, %v8500_v44 }
  0xff   : > { %6902 = vmatmul.mubr.msk.bf16.gmra.mrb[40].mxu1 %vm424_vm3, %v8588_v26  ;;  %7200 = vmatmul.mubr.msk.bf16.gmra.mrb[8].mxu0 %vm424_vm3, %v8517_v0 }
 0x100   : > { %6905 = vmatprep.mubr.msk.bf16.mxu1 %vm424_vm3, %v8590_v28  ;;  %7203 = vmatprep.mubr.msk.bf16.mxu0 %vm424_vm3, %v8519_v5 }
 0x107   : > { %6906 = vmatmul.mubr.msk.bf16.gmra.mrb[44].mxu1 %vm424_vm3, %v8604_v48  ;;  %7204 = vmatmul.mubr.msk.bf16.gmra.mrb[12].mxu0 %vm424_vm3, %v8533_v29 }
 0x108   : > { %6909 = vmatprep.mubr.msk.bf16.mxu1 %vm424_vm3, %v8606_v53  ;;  %7207 = vmatprep.mubr.msk.bf16.mxu0 %vm424_vm3, %v8535_v32 }
 0x10f   : > { %6910 = vmatmul.mubr.msk.bf16.gmra.mrb[48].mxu1 %vm424_vm3, %v8620_v6  ;;  %7208 = vmatmul.mubr.msk.bf16.gmra.mrb[16].mxu0 %vm424_vm3, %v8548_v49 }
 0x110   : > { %6913 = vmatprep.mubr.msk.bf16.mxu1 %vm424_vm3, %v8622_v11  ;;  %7211 = vmatprep.mubr.msk.bf16.mxu0 %vm424_vm3, %v8550_v51 }
 0x117   : > { %6914 = vmatmul.mubr.msk.bf16.gmra.mrb[52].mxu1 %vm424_vm3, %v8636_v46  ;;  %7212 = vmatmul.mubr.msk.bf16.gmra.mrb[20].mxu0 %vm424_vm3, %v8572_v10  ;;  %v1210_v10 = vld [vmem:[%s8117_s26 + $0x2a] sm:$0xff] }
 0x118   : > { %6917 = vmatprep.mubr.msk.bf16.mxu1 %vm424_vm3, %v8638_v47  ;;  %7215 = vmatprep.mubr.msk.bf16.mxu0 %vm424_vm3, %v8574_v27  ;;  %v1209_v27 = vld [vmem:[%s8117_s26 + $0x22] sm:$0xff] }
 0x119   : > { %v1271_v34 = vpack.c.bf16 %v1210_v10, %v1209_v27  ;;  %v6250_v10 = vld [vmem:[%s8117_s26 + $0x248] sm:$0xff]  ;;  %v6253_v27 = vld [vmem:[%s8117_s26 + $0x260] sm:$0xff] }
 0x11f   : > { %6918 = vmatmul.mubr.msk.bf16.gmra.mrb[56].mxu1 %vm424_vm3, %v8652_v60  ;;  %7216 = vmatmul.mubr.msk.bf16.gmra.mrb[24].mxu0 %vm424_vm3, %v8588_v26  ;;  %v1208_v26 = vld [vmem:[%s8117_s26 + $0x1a] sm:$0xff] }
 0x120   : > { %6921 = vmatprep.mubr.msk.bf16.mxu1 %vm424_vm3, %v8654_v18  ;;  %7219 = vmatprep.mubr.msk.bf16.mxu0 %vm424_vm3, %v8590_v28  ;;  %v1207_v28 = vld [vmem:[%s8117_s26 + $0x12] sm:$0xff] }
 0x121   : > { %v1270_v30 = vpack.c.bf16 %v1208_v26, %v1207_v28  ;;  %v1272_v26 = vpack.c.bf16 %v1212_v62, %v1211_v54  ;;  %v6254_v28 = vld [vmem:[%s8117_s26 + $0x268] sm:$0xff]  ;;  %v6258_v54 = vld [vmem:[%s8117_s26 + $0x290] sm:$0xff] }
 0x127   : > { %6922 = vmatmul.mubr.msk.bf16.gmra.mrb[60].mxu1 %vm424_vm3, %v8668_v2  ;;  %7220 = vmatmul.mubr.msk.bf16.gmra.mrb[28].mxu0 %vm424_vm3, %v8604_v48 }
 0x128   : > { %6927 = vmatprep.mubr.msk.bf16.mxu1 %vm424_vm3, %v1269_v8  ;;  %7223 = vmatprep.mubr.msk.bf16.mxu0 %vm424_vm3, %v8606_v53 }
 0x12f   : > { %6928 = vmatmul.mubr.msk.bf16.vlgmr.msra.gmra.mrb[0].mxu1 %vm424_vm3, %v1270_v30  ;;  %7224 = vmatmul.mubr.msk.bf16.gmra.mrb[32].mxu0 %vm424_vm3, %v8620_v6  ;;  %v8724_v30 = vpack.c.bf16 %v6254_v28, %v6253_v27  ;;  %v6298_v27 = vld [vmem:[%s8117_s26 + $0x91] sm:$0xff]  ;;  %v6299_v28 = vld [vmem:[%s8117_s26 + $0x99] sm:$0xff] }
 0x130   : > { %6992 = vmatpush3.bf16.msra.mxu1 %v8395_v14  ;;  %6931 = vmatprep.mubr.msk.bf16.mxu1 %vm424_vm3, %v1271_v34  ;;  %v6249_v14 = vld [vmem:[%s8117_s26 + $0x240] sm:$0xff]  ;;  %v6257_v34 = vld [vmem:[%s8117_s26 + $0x288] sm:$0xff] }
 0x131   : > { %7227 = vmatprep.mubr.msk.bf16.mxu0 %vm424_vm3, %v8622_v11  ;;  %7387 = vmatprep.subr.bf16.mxu1 %v8124_v9 }
 0x137   : > { %6932 = vmatmul.mubr.msk.bf16.gmra.mrb[4].mxu1 %vm424_vm3, %v1272_v26  ;;  %7228 = vmatmul.mubr.msk.bf16.gmra.mrb[36].mxu0 %vm424_vm3, %v8636_v46  ;;  %v3503_v26 = vpack.c.bf16 %v6258_v54, %v6257_v34  ;;  %v6302_v34 = vld [vmem:[%s8117_s26 + $0xb1] sm:$0xff]  ;;  %v6303_v54 = vld [vmem:[%s8117_s26 + $0xb9] sm:$0xff] }
 0x138   : > { %6935 = vmatprep.mubr.msk.bf16.mxu1 %vm424_vm3, %v8216_v16  ;;  %7231 = vmatprep.mubr.msk.bf16.mxu0 %vm424_vm3, %v8638_v47  ;;  %v8708_v16 = vpack.c.bf16 %v6250_v10, %v6249_v14  ;;  %v6261_v14 = vld [vmem:[%s8117_s26 + $0x2a8] sm:$0xff]  ;;  %v6262_v10 = vld [vmem:[%s8117_s26 + $0x2b0] sm:$0xff] }
 0x13f   : > { %6936 = vmatmul.mubr.msk.bf16.gmra.mrb[8].mxu1 %vm424_vm3, %v8227_v21  ;;  %7232 = vmatmul.mubr.msk.bf16.gmra.mrb[40].mxu0 %vm424_vm3, %v8652_v60  ;;  %v6251_v21 = vld [vmem:[%s8117_s26 + $0x250] sm:$0xff] }
 0x140   : > { %6939 = vmatprep.mubr.msk.bf16.mxu1 %vm424_vm3, %v8229_v22  ;;  %7235 = vmatprep.mubr.msk.bf16.mxu0 %vm424_vm3, %v8654_v18  ;;  %v6252_v22 = vld [vmem:[%s8117_s26 + $0x258] sm:$0xff] }
 0x141   : > { %v8722_v8 = vpack.c.bf16 %v6252_v22, %v6251_v21  ;;  %v3505_v22 = vpack.c.bf16 %v6262_v10, %v6261_v14  ;;  %v6307_v14 = vld [vmem:[%s8117_s26 + $0xe1] sm:$0xff] }
 0x147   : > { %6940 = vmatmul.mubr.msk.bf16.gmra.mrb[12].mxu1 %vm424_vm3, %v8251_v31  ;;  %7236 = vmatmul.mubr.msk.bf16.gmra.mrb[44].mxu0 %vm424_vm3, %v8668_v2  ;;  %v6255_v31 = vld [vmem:[%s8117_s26 + $0x270] sm:$0xff] }
 0x148   : > { %6943 = vmatprep.mubr.msk.bf16.mxu1 %vm424_vm3, %v8253_v33  ;;  %7239 = vmatprep.mubr.msk.bf16.mxu0 %vm424_vm3, %v8708_v16  ;;  %v6256_v33 = vld [vmem:[%s8117_s26 + $0x278] sm:$0xff] }
 0x149   : > { %v8738_v62 = vpack.c.bf16 %v6256_v33, %v6255_v31  ;;  %v4025_v33 = vpack.c.bf16 %v6299_v28, %v6298_v27  ;;  %v6314_v27 = vld [vmem:[%s8117_s26 + $0x121] sm:$0xff]  ;;  %v6315_v28 = vld [vmem:[%s8117_s26 + $0x129] sm:$0xff] }
 0x14f   : > { %6944 = vmatmul.mubr.msk.bf16.gmra.mrb[16].mxu1 %vm424_vm3, %v8269_v43  ;;  %7240 = vmatmul.mubr.msk.bf16.gmra.mrb[48].mxu0 %vm424_vm3, %v8722_v8  ;;  %v6259_v43 = vld [vmem:[%s8117_s26 + $0x298] sm:$0xff] }
 0x150   : > { %6947 = vmatprep.mubr.msk.bf16.mxu1 %vm424_vm3, %v8271_v45  ;;  %7243 = vmatprep.mubr.msk.bf16.mxu0 %vm424_vm3, %v8724_v30  ;;  %v6260_v45 = vld [vmem:[%s8117_s26 + $0x2a0] sm:$0xff] }
 0x151   : > { %v3504_v21 = vpack.c.bf16 %v6260_v45, %v6259_v43  ;;  %v4027_v43 = vpack.c.bf16 %v6303_v54, %v6302_v34  ;;  %v6306_v45 = vld [vmem:[%s8117_s26 + $0xd9] sm:$0xff] }
 0x157   : > { %6948 = vmatmul.mubr.msk.bf16.gmra.mrb[20].mxu1 %vm424_vm3, %v8287_v55  ;;  %7244 = vmatmul.mubr.msk.bf16.gmra.mrb[52].mxu0 %vm424_vm3, %v8738_v62  ;;  %v6263_v55 = vld [vmem:[%s8117_s26 + $0x2b8] sm:$0xff] }
 0x158   : > { %6951 = vmatprep.mubr.msk.bf16.mxu1 %vm424_vm3, %v8289_v57  ;;  %7247 = vmatprep.mubr.msk.bf16.mxu0 %vm424_vm3, %v3503_v26  ;;  %v6264_v57 = vld [vmem:[%s8117_s26 + $0x2c0] sm:$0xff] }
 0x159   : > { %v3506_v31 = vpack.c.bf16 %v6264_v57, %v6263_v55 }
 0x15f   : > { %6952 = vmatmul.mubr.msk.bf16.gmra.mrb[24].mxu1 %vm424_vm3, %v8305_v4  ;;  %7248 = vmatmul.mubr.msk.bf16.gmra.mrb[56].mxu0 %vm424_vm3, %v3504_v21  ;;  %v6300_v4 = vld [vmem:[%s8117_s26 + $0xa1] sm:$0xff]  ;;  %v4029_v21 = vpack.c.bf16 %v6307_v14, %v6306_v45  ;;  %v6326_v45 = vld [vmem:[%s8117_s26 + $0x189] sm:$0xff]  ;;  %v6327_v14 = vld [vmem:[%s8117_s26 + $0x191] sm:$0xff] }
 0x160   : > { %6955 = vmatprep.mubr.msk.bf16.mxu1 %vm424_vm3, %v8307_v7  ;;  %7251 = vmatprep.mubr.msk.bf16.mxu0 %vm424_vm3, %v3505_v22  ;;  %v6301_v7 = vld [vmem:[%s8117_s26 + $0xa9] sm:$0xff]  ;;  %v6311_v22 = vld [vmem:[%s8117_s26 + $0x101] sm:$0xff] }
 0x161   : > { %v4026_v26 = vpack.c.bf16 %v6301_v7, %v6300_v4  ;;  %v6318_v4 = vld [vmem:[%s8117_s26 + $0x141] sm:$0xff]  ;;  %v6319_v7 = vld [vmem:[%s8117_s26 + $0x149] sm:$0xff] }
 0x162   : > { %v4035_v54 = vpack.c.bf16 %v6319_v7, %v6318_v4  ;;  %v6346_v7 = vld [vmem:[%s8117_s26 + $0x241] sm:$0xff] }
 0x167   : > { %6956 = vmatmul.mubr.msk.bf16.gmra.mrb[28].mxu1 %vm424_vm3, %v8323_v19  ;;  %7252 = vmatmul.mubr.msk.bf16.gmra.mrb[60].mxu0 %vm424_vm3, %v3506_v31  ;;  %v6304_v19 = vld [vmem:[%s8117_s26 + $0xc1] sm:$0xff] }
 0x168   : > { %6959 = vmatprep.mubr.msk.bf16.mxu1 %vm424_vm3, %v8325_v23  ;;  %7257 = vmatprep.mubr.msk.bf16.mxu0 %vm424_vm3, %v4025_v33  ;;  %v6305_v23 = vld [vmem:[%s8117_s26 + $0xc9] sm:$0xff]  ;;  %v4033_v33 = vpack.c.bf16 %v6315_v28, %v6314_v27  ;;  %v6338_v27 = vld [vmem:[%s8117_s26 + $0x1f9] sm:$0xff]  ;;  %v6339_v28 = vld [vmem:[%s8117_s26 + $0x201] sm:$0xff] }
 0x169   : > { %v4028_v10 = vpack.c.bf16 %v6305_v23, %v6304_v19 }
 0x16f   : > { %6960 = vmatmul.mubr.msk.bf16.gmra.mrb[32].mxu1 %vm424_vm3, %v8341_v36  ;;  %7258 = vmatmul.mubr.msk.bf16.vlgmr.msra.gmra.mrb[0].mxu0 %vm424_vm3, %v4026_v26  ;;  %v6308_v36 = vld [vmem:[%s8117_s26 + $0xe9] sm:$0xff] }
 0x170   : > { %7322 = vmatpush3.bf16.msra.mxu0 %v8565_v63  ;;  %6963 = vmatprep.mubr.msk.bf16.mxu1 %vm424_vm3, %v8343_v38  ;;  %v6309_v38 = vld [vmem:[%s8117_s26 + $0xf1] sm:$0xff]  ;;  %v6310_v63 = vld [vmem:[%s8117_s26 + $0xf9] sm:$0xff]  ;;  %v6322_v26 = vld [vmem:[%s8117_s26 + $0x169] sm:$0xff] }
 0x171   : > { %7261 = vmatprep.mubr.msk.bf16.mxu0 %vm424_vm3, %v4027_v43  ;;  %v4030_v55 = vpack.c.bf16 %v6309_v38, %v6308_v36  ;;  %v4031_v57 = vpack.c.bf16 %v6311_v22, %v6310_v63  ;;  %v6323_v43 = vld [vmem:[%s8117_s26 + $0x171] sm:$0xff]  ;;  %v6331_v38 = vld [vmem:[%s8117_s26 + $0x1b9] sm:$0xff] }
 0x172   : > { %v8822_v23 = vpack.c.bf16 %v6323_v43, %v6322_v26  ;;  %v6330_v36 = vld [vmem:[%s8117_s26 + $0x1b1] sm:$0xff]  ;;  %v6351_v26 = vld [vmem:[%s8117_s26 + $0x269] sm:$0xff] }
 0x173   : > { %v8853_v22 = vpack.c.bf16 %v6331_v38, %v6330_v36 }
 0x177   : > { %6964 = vmatmul.mubr.msk.bf16.gmra.mrb[36].mxu1 %vm424_vm3, %v8359_v50  ;;  %7262 = vmatmul.mubr.msk.bf16.gmra.mrb[4].mxu0 %vm424_vm3, %v4028_v10  ;;  %v6312_v50 = vld [vmem:[%s8117_s26 + $0x109] sm:$0xff] }
 0x178   : > { %6967 = vmatprep.mubr.msk.bf16.mxu1 %vm424_vm3, %v8361_v52  ;;  %7265 = vmatprep.mubr.msk.bf16.mxu0 %vm424_vm3, %v4029_v21  ;;  %v6313_v52 = vld [vmem:[%s8117_s26 + $0x111] sm:$0xff]  ;;  %v8837_v21 = vpack.c.bf16 %v6327_v14, %v6326_v45 }
 0x179   : > { %v4032_v31 = vpack.c.bf16 %v6313_v52, %v6312_v50 }
 0x17f   : > { %6968 = vmatmul.mubr.msk.bf16.gmra.mrb[40].mxu1 %vm424_vm3, %v8377_v1  ;;  %7266 = vmatmul.mubr.msk.bf16.gmra.mrb[8].mxu0 %vm424_vm3, %v4030_v55  ;;  %v6316_v1 = vld [vmem:[%s8117_s26 + $0x131] sm:$0xff] }
 0x180   : > { %6971 = vmatprep.mubr.msk.bf16.mxu1 %vm424_vm3, %v8379_v3  ;;  %7269 = vmatprep.mubr.msk.bf16.mxu0 %vm424_vm3, %v4031_v57  ;;  %v6317_v3 = vld [vmem:[%s8117_s26 + $0x139] sm:$0xff]  ;;  %v6334_v55 = vld [vmem:[%s8117_s26 + $0x1d1] sm:$0xff] }
 0x181   : > { %v4034_v34 = vpack.c.bf16 %v6317_v3, %v6316_v1  ;;  %v6335_v57 = vld [vmem:[%s8117_s26 + $0x1d9] sm:$0xff]  ;;  %v6343_v1 = vld [vmem:[%s8117_s26 + $0x221] sm:$0xff] }
 0x182   : > { %v8869_v52 = vpack.c.bf16 %v6335_v57, %v6334_v55 }
 0x187   : > { %6972 = vmatmul.mubr.msk.bf16.gmra.mrb[44].mxu1 %vm424_vm3, %v8403_v20  ;;  %7270 = vmatmul.mubr.msk.bf16.gmra.mrb[12].mxu0 %vm424_vm3, %v4032_v31  ;;  %v6320_v20 = vld [vmem:[%s8117_s26 + $0x151] sm:$0xff] }
 0x188   : > { %6975 = vmatprep.mubr.msk.bf16.mxu1 %vm424_vm3, %v8407_v25  ;;  %7273 = vmatprep.mubr.msk.bf16.mxu0 %vm424_vm3, %v4033_v33  ;;  %v6321_v25 = vld [vmem:[%s8117_s26 + $0x159] sm:$0xff] }
 0x189   : > { %v4036_v19 = vpack.c.bf16 %v6321_v25, %v6320_v20  ;;  %v6342_v33 = vld [vmem:[%s8117_s26 + $0x219] sm:$0xff]  ;;  %v6350_v25 = vld [vmem:[%s8117_s26 + $0x261] sm:$0xff] }
 0x18a   : > { %v8902_v4 = vpack.c.bf16 %v6343_v1, %v6342_v33  ;;  %v9989_v33 = vld [vmem:[#allocation6_spill] sm:$0xff]  ;;  %v9990_v1 = vld [vmem:[#allocation7_spill] sm:$0xff] }
 0x18f   : > { %6976 = vmatmul.mubr.msk.bf16.gmra.mrb[48].mxu1 %vm424_vm3, %v8426_v40  ;;  %7274 = vmatmul.mubr.msk.bf16.gmra.mrb[16].mxu0 %vm424_vm3, %v4034_v34  ;;  %v6324_v40 = vld [vmem:[%s8117_s26 + $0x179] sm:$0xff]  ;;  %v6347_v34 = vld [vmem:[%s8117_s26 + $0x249] sm:$0xff] }
 0x190   : > { %6979 = vmatprep.mubr.msk.bf16.mxu1 %vm424_vm3, %v8430_v42  ;;  %7277 = vmatprep.mubr.msk.bf16.mxu0 %vm424_vm3, %v4035_v54  ;;  %v6325_v42 = vld [vmem:[%s8117_s26 + $0x181] sm:$0xff]  ;;  %v8918_v20 = vpack.c.bf16 %v6347_v34, %v6346_v7 }
 0x191   : > { %v8835_v10 = vpack.c.bf16 %v6325_v42, %v6324_v40  ;;  %v6354_v40 = vld [vmem:[%s8117_s26 + $0x289] sm:$0xff]  ;;  %v6355_v42 = vld [vmem:[%s8117_s26 + $0x291] sm:$0xff]  ;;  %v6403_v7 = vld [vmem:[%s8117_s26 + $0xda] sm:$0xff] }
 0x192   : > { %v4053_v14 = vpack.c.bf16 %v6355_v42, %v6354_v40  ;;  %v6404_v34 = vld [vmem:[%s8117_s26 + $0xe2] sm:$0xff] }
 0x197   : > { %6980 = vmatmul.mubr.msk.bf16.gmra.mrb[52].mxu1 %vm424_vm3, %v8450_v58  ;;  %7278 = vmatmul.mubr.msk.bf16.gmra.mrb[20].mxu0 %vm424_vm3, %v4036_v19  ;;  %v6328_v58 = vld [vmem:[%s8117_s26 + $0x199] sm:$0xff]  ;;  %v8934_v19 = vpack.c.bf16 %v6351_v26, %v6350_v25  ;;  %v6405_v25 = vld [vmem:[%s8117_s26 + $0xea] sm:$0xff] }
 0x198   : > { %6983 = vmatprep.mubr.msk.bf16.mxu1 %vm424_vm3, %v8454_v61  ;;  %7281 = vmatprep.mubr.msk.bf16.mxu0 %vm424_vm3, %v8822_v23  ;;  %v6329_v61 = vld [vmem:[%s8117_s26 + $0x1a1] sm:$0xff]  ;;  %v6406_v26 = vld [vmem:[%s8117_s26 + $0xf2] sm:$0xff] }
 0x199   : > { %v8851_v63 = vpack.c.bf16 %v6329_v61, %v6328_v58  ;;  %v6358_v58 = vld [vmem:[%s8117_s26 + $0x2a9] sm:$0xff]  ;;  %v6359_v61 = vld [vmem:[%s8117_s26 + $0x2b1] sm:$0xff]  ;;  %v4580_v40 = vpack.c.bf16 %v6406_v26, %v6405_v25 }
 0x19a   : > { %v4055_v38 = vpack.c.bf16 %v6359_v61, %v6358_v58  ;;  %v6415_v61 = vld [vmem:[%s8117_s26 + $0x142] sm:$0xff] }
 0x19b   : > { %v6440_v25 = vld [vmem:[%s8117_s26 + $0x222] sm:$0xff] }
 0x19f   : > { %6984 = vmatmul.mubr.msk.bf16.gmra.mrb[56].mxu1 %vm424_vm3, %v8474_v13  ;;  %7282 = vmatmul.mubr.msk.bf16.gmra.mrb[24].mxu0 %vm424_vm3, %v8835_v10  ;;  %v6332_v13 = vld [vmem:[%s8117_s26 + $0x1c1] sm:$0xff] }
 0x1a0   : > { %6987 = vmatprep.mubr.msk.bf16.mxu1 %vm424_vm3, %v8478_v17  ;;  %7285 = vmatprep.mubr.msk.bf16.mxu0 %vm424_vm3, %v8837_v21  ;;  %v6333_v17 = vld [vmem:[%s8117_s26 + $0x1c9] sm:$0xff] }
 0x1a1   : > { %v8867_v50 = vpack.c.bf16 %v6333_v17, %v6332_v13  ;;  %v6395_v13 = vld [vmem:[%s8117_s26 + $0x92] sm:$0xff]  ;;  %v6396_v17 = vld [vmem:[%s8117_s26 + $0x9a] sm:$0xff] }
 0x1a2   : > { %v4575_v57 = vpack.c.bf16 %v6396_v17, %v6395_v13  ;;  %v6420_v13 = vld [vmem:[%s8117_s26 + $0x172] sm:$0xff] }
 0x1a7   : > { %6988 = vmatmul.mubr.msk.bf16.gmra.mrb[60].mxu1 %vm424_vm3, %v8498_v37  ;;  %7286 = vmatmul.mubr.msk.bf16.gmra.mrb[28].mxu0 %vm424_vm3, %v8851_v63  ;;  %v6337_v37 = vld [vmem:[%s8117_s26 + $0x1e9] sm:$0xff] }
 0x1a8   : > { %6993 = vmatprep.mubr.msk.bf16.mxu1 %vm424_vm3, %v8405_v24  ;;  %7289 = vmatprep.mubr.msk.bf16.mxu0 %vm424_vm3, %v8853_v22  ;;  %v6336_v24 = vld [vmem:[%s8117_s26 + $0x1e1] sm:$0xff] }
 0x1a9   : > { %v8884_v31 = vpack.c.bf16 %v6337_v37, %v6336_v24  ;;  %v9987_v24 = vld [vmem:[#allocation4_spill] sm:$0xff]  ;;  %v6398_v37 = vld [vmem:[%s8117_s26 + $0xaa] sm:$0xff] }
 0x1af   : > { %6994 = vmatmul.mubr.msk.bf16.vlgmr.msra.gmra.mrb[0].mxu1 %vm424_vm3, %v8424_v39  ;;  %7290 = vmatmul.mubr.msk.bf16.gmra.mrb[32].mxu0 %vm424_vm3, %v8867_v50  ;;  %v8886_v39 = vpack.c.bf16 %v6339_v28, %v6338_v27  ;;  %v6399_v27 = vld [vmem:[%s8117_s26 + $0xb2] sm:$0xff]  ;;  %v6400_v28 = vld [vmem:[%s8117_s26 + $0xba] sm:$0xff] }
 0x1b0   : > { %7388 = vmatpush3.bf16.msra.mxu1 %v8124_v9  ;;  %6997 = vmatprep.mubr.msk.bf16.mxu1 %vm424_vm3, %v8428_v41  ;;  %v6340_v9 = vld [vmem:[%s8117_s26 + $0x209] sm:$0xff]  ;;  %v6341_v41 = vld [vmem:[%s8117_s26 + $0x211] sm:$0xff] }
 0x1b1   : > { %7293 = vmatprep.mubr.msk.bf16.mxu0 %vm424_vm3, %v8869_v52  ;;  %v8900_v3 = vpack.c.bf16 %v6341_v41, %v6340_v9  ;;  %v4577_v41 = vpack.c.bf16 %v6400_v28, %v6399_v27  ;;  %v6428_v27 = vld [vmem:[%s8117_s26 + $0x1ba] sm:$0xff] }
 0x1b7   : > { %6998 = vmatmul.mubr.msk.bf16.gmra.mrb[4].mxu1 %vm424_vm3, %v8448_v56  ;;  %7294 = vmatmul.mubr.msk.bf16.gmra.mrb[36].mxu0 %vm424_vm3, %v8884_v31  ;;  %v6344_v56 = vld [vmem:[%s8117_s26 + $0x229] sm:$0xff] }
 0x1b8   : > { %7001 = vmatprep.mubr.msk.bf16.mxu1 %vm424_vm3, %v8452_v59  ;;  %7297 = vmatprep.mubr.msk.bf16.mxu0 %vm424_vm3, %v8886_v39  ;;  %v6345_v59 = vld [vmem:[%s8117_s26 + $0x231] sm:$0xff] }
 0x1b9   : > { %v8916_v54 = vpack.c.bf16 %v6345_v59, %v6344_v56  ;;  %v6401_v56 = vld [vmem:[%s8117_s26 + $0xc2] sm:$0xff]  ;;  %v6402_v59 = vld [vmem:[%s8117_s26 + $0xca] sm:$0xff] }
 0x1bf   : > { %7002 = vmatmul.mubr.msk.bf16.gmra.mrb[8].mxu1 %vm424_vm3, %v8472_v12  ;;  %7298 = vmatmul.mubr.msk.bf16.gmra.mrb[40].mxu0 %vm424_vm3, %v8900_v3  ;;  %v6348_v12 = vld [vmem:[%s8117_s26 + $0x251] sm:$0xff] }
 0x1c0   : > { %7005 = vmatprep.mubr.msk.bf16.mxu1 %vm424_vm3, %v8476_v15  ;;  %7301 = vmatprep.mubr.msk.bf16.mxu0 %vm424_vm3, %v8902_v4  ;;  %v6349_v15 = vld [vmem:[%s8117_s26 + $0x259] sm:$0xff] }
 0x1c1   : > { %v8932_v43 = vpack.c.bf16 %v6349_v15, %v6348_v12  ;;  %v4578_v12 = vpack.c.bf16 %v6402_v59, %v6401_v56  ;;  %v4579_v15 = vpack.c.bf16 %v6404_v34, %v6403_v7  ;;  %v6435_v59 = vld [vmem:[%s8117_s26 + $0x1fa] sm:$0xff]  ;;  %v6436_v7 = vld [vmem:[%s8117_s26 + $0x202] sm:$0xff] }
 0x1c7   : > { %7006 = vmatmul.mubr.msk.bf16.gmra.mrb[12].mxu1 %vm424_vm3, %v8496_v35  ;;  %7302 = vmatmul.mubr.msk.bf16.gmra.mrb[44].mxu0 %vm424_vm3, %v8916_v54  ;;  %v6352_v35 = vld [vmem:[%s8117_s26 + $0x271] sm:$0xff] }
 0x1c8   : > { %7009 = vmatprep.mubr.msk.bf16.mxu1 %vm424_vm3, %v8500_v44  ;;  %7305 = vmatprep.mubr.msk.bf16.mxu0 %vm424_vm3, %v8918_v20  ;;  %v6353_v44 = vld [vmem:[%s8117_s26 + $0x279] sm:$0xff] }
 0x1c9   : > { %v8948_v45 = vpack.c.bf16 %v6353_v44, %v6352_v35  ;;  %v6407_v35 = vld [vmem:[%s8117_s26 + $0xfa] sm:$0xff]  ;;  %v6408_v44 = vld [vmem:[%s8117_s26 + $0x102] sm:$0xff] }
 0x1ca   : > { %v4581_v42 = vpack.c.bf16 %v6408_v44, %v6407_v35  ;;  %v6443_v44 = vld [vmem:[%s8117_s26 + $0x242] sm:$0xff] }
 0x1cf   : > { %7010 = vmatmul.mubr.msk.bf16.gmra.mrb[16].mxu1 %vm424_vm3, %v8517_v0  ;;  %7306 = vmatmul.mubr.msk.bf16.gmra.mrb[48].mxu0 %vm424_vm3, %v8932_v43  ;;  %v6356_v0 = vld [vmem:[%s8117_s26 + $0x299] sm:$0xff] }
 0x1d0   : > { %7013 = vmatprep.mubr.msk.bf16.mxu1 %vm424_vm3, %v8519_v5  ;;  %7309 = vmatprep.mubr.msk.bf16.mxu0 %vm424_vm3, %v8934_v19  ;;  %v6357_v5 = vld [vmem:[%s8117_s26 + $0x2a1] sm:$0xff] }
 0x1d1   : > { %v4054_v36 = vpack.c.bf16 %v6357_v5, %v6356_v0  ;;  %v6412_v0 = vld [vmem:[%s8117_s26 + $0x12a] sm:$0xff] }
 0x1d7   : > { %7014 = vmatmul.mubr.msk.bf16.gmra.mrb[20].mxu1 %vm424_vm3, %v8533_v29  ;;  %7310 = vmatmul.mubr.msk.bf16.gmra.mrb[52].mxu0 %vm424_vm3, %v8948_v45  ;;  %v6360_v29 = vld [vmem:[%s8117_s26 + $0x2b9] sm:$0xff] }
 0x1d8   : > { %7017 = vmatprep.mubr.msk.bf16.mxu1 %vm424_vm3, %v8535_v32  ;;  %7313 = vmatprep.mubr.msk.bf16.mxu0 %vm424_vm3, %v4053_v14  ;;  %v6361_v32 = vld [vmem:[%s8117_s26 + $0x2c1] sm:$0xff] }
 0x1d9   : > { %v4056_v55 = vpack.c.bf16 %v6361_v32, %v6360_v29  ;;  %v6411_v14 = vld [vmem:[%s8117_s26 + $0x122] sm:$0xff]  ;;  %v6419_v32 = vld [vmem:[%s8117_s26 + $0x16a] sm:$0xff] }
 0x1da   : > { %v4583_v58 = vpack.c.bf16 %v6412_v0, %v6411_v14  ;;  %v6448_v14 = vld [vmem:[%s8117_s26 + $0x26a] sm:$0xff] }
 0x1df   : > { %7018 = vmatmul.mubr.msk.bf16.gmra.mrb[24].mxu1 %vm424_vm3, %v8548_v49  ;;  %7314 = vmatmul.mubr.msk.bf16.gmra.mrb[56].mxu0 %vm424_vm3, %v4054_v36  ;;  %v9988_v49 = vld [vmem:[#allocation5_spill] sm:$0xff] }
 0x1e0   : > { %7021 = vmatprep.mubr.msk.bf16.mxu1 %vm424_vm3, %v8550_v51  ;;  %7317 = vmatprep.mubr.msk.bf16.mxu0 %vm424_vm3, %v4055_v38  ;;  %v6397_v51 = vld [vmem:[%s8117_s26 + $0xa2] sm:$0xff]  ;;  %v6416_v36 = vld [vmem:[%s8117_s26 + $0x14a] sm:$0xff] }
 0x1e1   : > { %v4576_v9 = vpack.c.bf16 %v6398_v37, %v6397_v51  ;;  %v4585_v29 = vpack.c.bf16 %v6416_v36, %v6415_v61  ;;  %v6427_v37 = vld [vmem:[%s8117_s26 + $0x1b2] sm:$0xff]  ;;  %v6455_v36 = vld [vmem:[%s8117_s26 + $0x2aa] sm:$0xff] }
 0x1e7   : > { %7022 = vmatmul.mubr.msk.bf16.gmra.mrb[28].mxu1 %vm424_vm3, %v9987_v24  ;;  %7318 = vmatmul.mubr.msk.bf16.gmra.mrb[60].mxu0 %vm424_vm3, %v4056_v55  ;;  %v4587_v55 = vpack.c.bf16 %v6420_v13, %v6419_v32  ;;  %v6424_v24 = vld [vmem:[%s8117_s26 + $0x192] sm:$0xff] }
 0x1e8   : > { %7025 = vmatprep.mubr.msk.bf16.mxu1 %vm424_vm3, %v9988_v49  ;;  %7323 = vmatprep.mubr.msk.bf16.mxu0 %vm424_vm3, %v4575_v57  ;;  %v6423_v57 = vld [vmem:[%s8117_s26 + $0x18a] sm:$0xff] }
 0x1e9   : > { %v4589_v51 = vpack.c.bf16 %v6424_v24, %v6423_v57 }
 0x1ef   : > { %7026 = vmatmul.mubr.msk.bf16.gmra.mrb[32].mxu1 %vm424_vm3, %v9989_v33  ;;  %7324 = vmatmul.mubr.msk.bf16.vlgmr.msra.gmra.mrb[0].mxu0 %vm424_vm3, %v4576_v9  ;;  %v4591_v9 = vpack.c.bf16 %v6428_v27, %v6427_v37  ;;  %v6432_v33 = vld [vmem:[%s8117_s26 + $0x1da] sm:$0xff] }
 0x1f0   : > { %7029 = vmatprep.mubr.msk.bf16.mxu1 %vm424_vm3, %v9990_v1  ;;  %7327 = vmatprep.mubr.msk.bf16.mxu0 %vm424_vm3, %v4577_v41  ;;  %v6431_v41 = vld [vmem:[%s8117_s26 + $0x1d2] sm:$0xff] }
 0x1f1   : > { %v4593_v56 = vpack.c.bf16 %v6432_v33, %v6431_v41 }
 0x1f7   : > { %7030 = vmatmul.mubr.msk.bf16.gmra.mrb[36].mxu1 %vm424_vm3, %v8604_v48  ;;  %7328 = vmatmul.mubr.msk.bf16.gmra.mrb[4].mxu0 %vm424_vm3, %v4578_v12  ;;  %v6409_v48 = vld [vmem:[%s8117_s26 + $0x10a] sm:$0xff]  ;;  %v4595_v12 = vpack.c.bf16 %v6436_v7, %v6435_v59 }
 0x1f8   : > { %7033 = vmatprep.mubr.msk.bf16.mxu1 %vm424_vm3, %v8606_v53  ;;  %7331 = vmatprep.mubr.msk.bf16.mxu0 %vm424_vm3, %v4579_v15  ;;  %v6410_v53 = vld [vmem:[%s8117_s26 + $0x112] sm:$0xff]  ;;  %v6439_v15 = vld [vmem:[%s8117_s26 + $0x21a] sm:$0xff] }
 0x1f9   : > { %v4582_v5 = vpack.c.bf16 %v6410_v53, %v6409_v48  ;;  %v4597_v35 = vpack.c.bf16 %v6440_v25, %v6439_v15  ;;  %v6447_v53 = vld [vmem:[%s8117_s26 + $0x262] sm:$0xff] }
 0x1ff   : > { %7034 = vmatmul.mubr.msk.bf16.gmra.mrb[40].mxu1 %vm424_vm3, %v8620_v6  ;;  %7332 = vmatmul.mubr.msk.bf16.gmra.mrb[8].mxu0 %vm424_vm3, %v4580_v40  ;;  %v6413_v6 = vld [vmem:[%s8117_s26 + $0x132] sm:$0xff]  ;;  %v6444_v40 = vld [vmem:[%s8117_s26 + $0x24a] sm:$0xff] }
 0x200   : > { %7037 = vmatprep.mubr.msk.bf16.mxu1 %vm424_vm3, %v8622_v11  ;;  %7335 = vmatprep.mubr.msk.bf16.mxu0 %vm424_vm3, %v4581_v42  ;;  %v6414_v11 = vld [vmem:[%s8117_s26 + $0x13a] sm:$0xff]  ;;  %v4599_v48 = vpack.c.bf16 %v6444_v40, %v6443_v44 }
 0x201   : > { %v4584_v38 = vpack.c.bf16 %v6414_v11, %v6413_v6  ;;  %v6452_v6 = vld [vmem:[%s8117_s26 + $0x292] sm:$0xff] }
 0x207   : > { %7038 = vmatmul.mubr.msk.bf16.gmra.mrb[44].mxu1 %vm424_vm3, %v8636_v46  ;;  %7336 = vmatmul.mubr.msk.bf16.gmra.mrb[12].mxu0 %vm424_vm3, %v4582_v5  ;;  %v6417_v46 = vld [vmem:[%s8117_s26 + $0x152] sm:$0xff]  ;;  %v4601_v5 = vpack.c.bf16 %v6448_v14, %v6447_v53 }
 0x208   : > { %7041 = vmatprep.mubr.msk.bf16.mxu1 %vm424_vm3, %v8638_v47  ;;  %7339 = vmatprep.mubr.msk.bf16.mxu0 %vm424_vm3, %v4583_v58  ;;  %v6418_v47 = vld [vmem:[%s8117_s26 + $0x15a] sm:$0xff]  ;;  %v6451_v58 = vld [vmem:[%s8117_s26 + $0x28a] sm:$0xff] }
 0x209   : > { %v4586_v17 = vpack.c.bf16 %v6418_v47, %v6417_v46  ;;  %v4603_v61 = vpack.c.bf16 %v6452_v6, %v6451_v58 }
 0x20f   : > { %7042 = vmatmul.mubr.msk.bf16.gmra.mrb[48].mxu1 %vm424_vm3, %v8652_v60  ;;  %7340 = vmatmul.mubr.msk.bf16.gmra.mrb[16].mxu0 %vm424_vm3, %v4584_v38  ;;  %v6421_v60 = vld [vmem:[%s8117_s26 + $0x17a] sm:$0xff]  ;;  %v6456_v38 = vld [vmem:[%s8117_s26 + $0x2b2] sm:$0xff] }
 0x210   : > { %7045 = vmatprep.mubr.msk.bf16.mxu1 %vm424_vm3, %v8654_v18  ;;  %7343 = vmatprep.mubr.msk.bf16.mxu0 %vm424_vm3, %v4585_v29  ;;  %v6422_v18 = vld [vmem:[%s8117_s26 + $0x182] sm:$0xff]  ;;  %v4605_v46 = vpack.c.bf16 %v6456_v38, %v6455_v36 }
 0x211   : > { %v4588_v49 = vpack.c.bf16 %v6422_v18, %v6421_v60 }
 0x217   : > { %7046 = vmatmul.mubr.msk.bf16.gmra.mrb[52].mxu1 %vm424_vm3, %v8668_v2  ;;  %7344 = vmatmul.mubr.msk.bf16.gmra.mrb[20].mxu0 %vm424_vm3, %v4586_v17  ;;  %v6425_v2 = vld [vmem:[%s8117_s26 + $0x19a] sm:$0xff] }
 0x218   : > { %7049 = vmatprep.mubr.msk.bf16.mxu1 %vm424_vm3, %v8708_v16  ;;  %7347 = vmatprep.mubr.msk.bf16.mxu0 %vm424_vm3, %v4587_v55  ;;  %v6426_v16 = vld [vmem:[%s8117_s26 + $0x1a2] sm:$0xff] }
 0x219   : > { %v4590_v28 = vpack.c.bf16 %v6426_v16, %v6425_v2 }
 0x21f   : > { %7050 = vmatmul.mubr.msk.bf16.gmra.mrb[56].mxu1 %vm424_vm3, %v8722_v8  ;;  %7348 = vmatmul.mubr.msk.bf16.gmra.mrb[24].mxu0 %vm424_vm3, %v4588_v49  ;;  %v6429_v8 = vld [vmem:[%s8117_s26 + $0x1c2] sm:$0xff] }
 0x220   : > { %7053 = vmatprep.mubr.msk.bf16.mxu1 %vm424_vm3, %v8724_v30  ;;  %7351 = vmatprep.mubr.msk.bf16.mxu0 %vm424_vm3, %v4589_v51  ;;  %v6430_v30 = vld [vmem:[%s8117_s26 + $0x1ca] sm:$0xff] }
 0x221   : > { %v4592_v1 = vpack.c.bf16 %v6430_v30, %v6429_v8 }
 0x227   : > { %7054 = vmatmul.mubr.msk.bf16.gmra.mrb[60].mxu1 %vm424_vm3, %v8738_v62  ;;  %7352 = vmatmul.mubr.msk.bf16.gmra.mrb[28].mxu0 %vm424_vm3, %v4590_v28  ;;  %v6433_v62 = vld [vmem:[%s8117_s26 + $0x1e2] sm:$0xff] }
 0x228   : > { %7091 = vmatprep.mubr.msk.bf16.mxu1 %vm424_vm3, %v8822_v23  ;;  %7355 = vmatprep.mubr.msk.bf16.mxu0 %vm424_vm3, %v4591_v9  ;;  %v6434_v23 = vld [vmem:[%s8117_s26 + $0x1ea] sm:$0xff] }
 0x229   : > { %v4594_v34 = vpack.c.bf16 %v6434_v23, %v6433_v62 }
 0x22f   : > { %7092 = vmatmul.mubr.msk.bf16.vlgmr.msra.gmra.mrb[32].mxu1 %vm424_vm3, %v8835_v10  ;;  %7356 = vmatmul.mubr.msk.bf16.gmra.mrb[32].mxu0 %vm424_vm3, %v4592_v1  ;;  %v6437_v10 = vld [vmem:[%s8117_s26 + $0x20a] sm:$0xff] }
 0x230   : > { %7095 = vmatprep.mubr.msk.bf16.mxu1 %vm424_vm3, %v8837_v21  ;;  %7359 = vmatprep.mubr.msk.bf16.mxu0 %vm424_vm3, %v4593_v56  ;;  %v6438_v21 = vld [vmem:[%s8117_s26 + $0x212] sm:$0xff] }
 0x231   : > { %v4596_v26 = vpack.c.bf16 %v6438_v21, %v6437_v10 }
 0x237   : > { %7096 = vmatmul.mubr.msk.bf16.gmra.mrb[36].mxu1 %vm424_vm3, %v8851_v63  ;;  %7360 = vmatmul.mubr.msk.bf16.gmra.mrb[36].mxu0 %vm424_vm3, %v4594_v34  ;;  %v6441_v63 = vld [vmem:[%s8117_s26 + $0x22a] sm:$0xff] }
 0x238   : > { %7099 = vmatprep.mubr.msk.bf16.mxu1 %vm424_vm3, %v8853_v22  ;;  %7363 = vmatprep.mubr.msk.bf16.mxu0 %vm424_vm3, %v4595_v12  ;;  %v6442_v22 = vld [vmem:[%s8117_s26 + $0x232] sm:$0xff] }
 0x239   : > { %v4598_v42 = vpack.c.bf16 %v6442_v22, %v6441_v63 }
 0x23f   : > { %7100 = vmatmul.mubr.msk.bf16.gmra.mrb[40].mxu1 %vm424_vm3, %v8867_v50  ;;  %7364 = vmatmul.mubr.msk.bf16.gmra.mrb[40].mxu0 %vm424_vm3, %v4596_v26  ;;  %v6445_v50 = vld [vmem:[%s8117_s26 + $0x252] sm:$0xff] }
 0x240   : > { %7103 = vmatprep.mubr.msk.bf16.mxu1 %vm424_vm3, %v8869_v52  ;;  %7367 = vmatprep.mubr.msk.bf16.mxu0 %vm424_vm3, %v4597_v35  ;;  %v6446_v52 = vld [vmem:[%s8117_s26 + $0x25a] sm:$0xff] }
 0x241   : > { %v4600_v0 = vpack.c.bf16 %v6446_v52, %v6445_v50 }
 0x247   : > { %7104 = vmatmul.mubr.msk.bf16.gmra.mrb[44].mxu1 %vm424_vm3, %v8884_v31  ;;  %7368 = vmatmul.mubr.msk.bf16.gmra.mrb[44].mxu0 %vm424_vm3, %v4598_v42  ;;  %v6449_v31 = vld [vmem:[%s8117_s26 + $0x272] sm:$0xff] }
 0x248   : > { %7107 = vmatprep.mubr.msk.bf16.mxu1 %vm424_vm3, %v8886_v39  ;;  %7371 = vmatprep.mubr.msk.bf16.mxu0 %vm424_vm3, %v4599_v48  ;;  %v6450_v39 = vld [vmem:[%s8117_s26 + $0x27a] sm:$0xff] }
 0x249   : > { %v4602_v11 = vpack.c.bf16 %v6450_v39, %v6449_v31 }
 0x24f   : > { %7108 = vmatmul.mubr.msk.bf16.gmra.mrb[48].mxu1 %vm424_vm3, %v8900_v3  ;;  %7372 = vmatmul.mubr.msk.bf16.gmra.mrb[48].mxu0 %vm424_vm3, %v4600_v0  ;;  %v6453_v3 = vld [vmem:[%s8117_s26 + $0x29a] sm:$0xff] }
 0x250   : > { %7111 = vmatprep.mubr.msk.bf16.mxu1 %vm424_vm3, %v8902_v4  ;;  %7375 = vmatprep.mubr.msk.bf16.mxu0 %vm424_vm3, %v4601_v5  ;;  %v6454_v4 = vld [vmem:[%s8117_s26 + $0x2a2] sm:$0xff] }
 0x251   : > { %v4604_v29 = vpack.c.bf16 %v6454_v4, %v6453_v3 }
 0x257   : > { %7112 = vmatmul.mubr.msk.bf16.gmra.mrb[52].mxu1 %vm424_vm3, %v8916_v54  ;;  %7376 = vmatmul.mubr.msk.bf16.gmra.mrb[52].mxu0 %vm424_vm3, %v4602_v11  ;;  %v6457_v54 = vld [vmem:[%s8117_s26 + $0x2ba] sm:$0xff] }
 0x258   : > { %7115 = vmatprep.mubr.msk.bf16.mxu1 %vm424_vm3, %v8918_v20  ;;  %7379 = vmatprep.mubr.msk.bf16.mxu0 %vm424_vm3, %v4603_v61  ;;  %v6458_v20 = vld [vmem:[%s8117_s26 + $0x2c2] sm:$0xff] }
 0x259   : > { %v4606_v47 = vpack.c.bf16 %v6458_v20, %v6457_v54 }
 0x25f   : > { %7116 = vmatmul.mubr.msk.bf16.gmra.mrb[56].mxu1 %vm424_vm3, %v8932_v43  ;;  %7380 = vmatmul.mubr.msk.bf16.gmra.mrb[56].mxu0 %vm424_vm3, %v4604_v29 }
 0x260   : > { %7119 = vmatprep.mubr.msk.bf16.mxu1 %vm424_vm3, %v8934_v19  ;;  %7383 = vmatprep.mubr.msk.bf16.mxu0 %vm424_vm3, %v4605_v46 }
 0x267   : > { %7120 = vmatmul.mubr.msk.bf16.gmra.mrb[60].mxu1 %vm424_vm3, %v8948_v45  ;;  %7384 = vmatmul.mubr.msk.bf16.gmra.mrb[60].mxu0 %vm424_vm3, %v4606_v47 }
 0x282   : > { %v6995_v32 = vpop.f32.mrb[0].mxu1 }
 0x283   : > { %v1989_v13 = vpop.f32.mrb[1].mxu1 }
 0x284   : > { %v6996_v17 = vpop.f32.mrb[2].mxu1 }
 0x285   : > { %v1992_v55 = vpop.f32.mrb[3].mxu1 }
 0x28a   : > { %v6999_v43 = vpop.f32.mrb[4].mxu1 }
 0x28b   : > { %v2005_v60 = vpop.f32.mrb[5].mxu1 }
 0x28c   : > { %v7000_v18 = vpop.f32.mrb[6].mxu1 }
 0x28d   : > { %v2008_v57 = vpop.f32.mrb[7].mxu1 }
 0x292   : > { %v7003_v24 = vpop.f32.mrb[8].mxu1 }
 0x293   : > { %v2021_v19 = vpop.f32.mrb[9].mxu1 }
 0x294   : > { %v7004_v49 = vpop.f32.mrb[10].mxu1 }
 0x295   : > { %v2024_v51 = vpop.f32.mrb[11].mxu1 }
 0x29a   : > { %v7007_v2 = vpop.f32.mrb[12].mxu1 }
 0x29b   : > { %v2037_v16 = vpop.f32.mrb[13].mxu1 }
 0x29c   : > { %v7008_v37 = vpop.f32.mrb[14].mxu1 }
 0x29d   : > { %v2040_v27 = vpop.f32.mrb[15].mxu1 }
 0x2a2   : > { %v7011_v28 = vpop.f32.mrb[16].mxu1 }
 0x2a3   : > { %v2053_v45 = vpop.f32.mrb[17].mxu1 }
 0x2a4   : > { %v7012_v9 = vpop.f32.mrb[18].mxu1 }
 0x2a5   : > { %v2056_v8 = vpop.f32.mrb[19].mxu1 }
 0x2aa   : > { %v7015_v30 = vpop.f32.mrb[20].mxu1 }
 0x2ab   : > { %v2069_v41 = vpop.f32.mrb[21].mxu1 }
 0x2ac   : > { %v7016_v33 = vpop.f32.mrb[22].mxu1 }
 0x2ad   : > { %v2072_v1 = vpop.f32.mrb[23].mxu1 }
 0x2b2   : > { %v7019_v56 = vpop.f32.mrb[24].mxu1 }
 0x2b3   : > { %v2085_v62 = vpop.f32.mrb[25].mxu1 }
 0x2b4   : > { %v7020_v23 = vpop.f32.mrb[26].mxu1 }
 0x2b5   : > { %v2088_v59 = vpop.f32.mrb[27].mxu1 }
 0x2ba   : > { %v7023_v7 = vpop.f32.mrb[28].mxu1 }
 0x2bb   : > { %v2101_v34 = vpop.f32.mrb[29].mxu1 }
 0x2bc   : > { %v9132_v12 = vpop.f32.mrb[30].mxu1 }
 0x2bd   : > { %v9134_v10 = vpop.f32.mrb[31].mxu1 }
 0x2c2   : > { %v7325_v21 = vpop.f32.mrb[0].mxu0 }
 0x2c3   : > { %v9136_v15 = vadd.f32 %v7325_v21, %v6995_v32  ;;  %v4742_v25 = vpop.f32.mrb[1].mxu0 }
 0x2c4   : > { %v9138_v26 = vadd.f32 %v4742_v25, %v1989_v13  ;;  %v7326_v35 = vpop.f32.mrb[2].mxu0 }
 0x2c5   : > { %9991 = vst [vmem:[#allocation4_spill] sm:$0xff] %v9136_v15  ;;  %v9140_v63 = vadd.f32 %v7326_v35, %v6996_v17  ;;  %v4745_v22 = vpop.f32.mrb[3].mxu0 }
 0x2c6   : > { %9992 = vst [vmem:[#allocation5_spill] sm:$0xff] %v9138_v26  ;;  %v9142_v44 = vadd.f32 %v4745_v22, %v1992_v55 }
 0x2c7   : > { %9993 = vst [vmem:[#allocation6_spill] sm:$0xff] %v9140_v63 }
 0x2c8   : > { %9994 = vst [vmem:[#allocation7_spill] sm:$0xff] %v9142_v44 }
 0x2ca   : > { %v7329_v40 = vpop.f32.mrb[4].mxu0 }
 0x2cb   : > { %v9144_v42 = vadd.f32 %v7329_v40, %v6999_v43  ;;  %v4758_v48 = vpop.f32.mrb[5].mxu0 }
 0x2cc   : > { %v9146_v50 = vadd.f32 %v4758_v48, %v2005_v60  ;;  %v7330_v52 = vpop.f32.mrb[6].mxu0 }
 0x2cd   : > { %v9148_v53 = vadd.f32 %v7330_v52, %v7000_v18  ;;  %v4761_v14 = vpop.f32.mrb[7].mxu0 }
 0x2ce   : > { %9995 = vst [vmem:[#allocation8_spill] sm:$0xff] %v9146_v50  ;;  %v9150_v0 = vadd.f32 %v4761_v14, %v2008_v57 }
 0x2d2   : > { %v7333_v5 = vpop.f32.mrb[8].mxu0 }
 0x2d3   : > { %v9152_v31 = vadd.f32 %v7333_v5, %v7003_v24  ;;  %v4774_v39 = vpop.f32.mrb[9].mxu0 }
 0x2d4   : > { %v9154_v58 = vadd.f32 %v4774_v39, %v2021_v19  ;;  %v7334_v6 = vpop.f32.mrb[10].mxu0 }
 0x2d5   : > { %v9156_v11 = vadd.f32 %v7334_v6, %v7004_v49  ;;  %v4777_v61 = vpop.f32.mrb[11].mxu0 }
 0x2d6   : > { %v9158_v3 = vadd.f32 %v4777_v61, %v2024_v51 }
 0x2da   : > { %v7337_v4 = vpop.f32.mrb[12].mxu0 }
 0x2db   : > { %v9160_v36 = vadd.f32 %v7337_v4, %v7007_v2  ;;  %v4790_v38 = vpop.f32.mrb[13].mxu0 }
 0x2dc   : > { %v9162_v29 = vadd.f32 %v4790_v38, %v2037_v16  ;;  %v7338_v46 = vpop.f32.mrb[14].mxu0 }
 0x2dd   : > { %v9164_v54 = vadd.f32 %v7338_v46, %v7008_v37  ;;  %v4793_v20 = vpop.f32.mrb[15].mxu0 }
 0x2de   : > { %v9166_v47 = vadd.f32 %v4793_v20, %v2040_v27 }
 0x2e2   : > { %v7341_v32 = vpop.f32.mrb[16].mxu0 }
 0x2e3   : > { %v9168_v13 = vadd.f32 %v7341_v32, %v7011_v28  ;;  %v4806_v17 = vpop.f32.mrb[17].mxu0 }
 0x2e4   : > { %v9170_v55 = vadd.f32 %v4806_v17, %v2053_v45  ;;  %v7342_v43 = vpop.f32.mrb[18].mxu0 }
 0x2e5   : > { %v9172_v60 = vadd.f32 %v7342_v43, %v7012_v9  ;;  %v4809_v18 = vpop.f32.mrb[19].mxu0 }
 0x2e6   : > { %v9174_v57 = vadd.f32 %v4809_v18, %v2056_v8 }
 0x2ea   : > { %v7345_v24 = vpop.f32.mrb[20].mxu0 }
 0x2eb   : > { %v9176_v19 = vadd.f32 %v7345_v24, %v7015_v30  ;;  %v4822_v49 = vpop.f32.mrb[21].mxu0 }
 0x2ec   : > { %v9178_v51 = vadd.f32 %v4822_v49, %v2069_v41  ;;  %v7346_v2 = vpop.f32.mrb[22].mxu0 }
 0x2ed   : > { %v9180_v16 = vadd.f32 %v7346_v2, %v7016_v33  ;;  %v4825_v37 = vpop.f32.mrb[23].mxu0 }
 0x2ee   : > { %v9182_v27 = vadd.f32 %v4825_v37, %v2072_v1 }
 0x2f2   : > { %v7349_v28 = vpop.f32.mrb[24].mxu0 }
 0x2f3   : > { %v9184_v45 = vadd.f32 %v7349_v28, %v7019_v56  ;;  %v4838_v9 = vpop.f32.mrb[25].mxu0 }
 0x2f4   : > { %v9186_v21 = vadd.f32 %v4838_v9, %v2085_v62  ;;  %v7350_v8 = vpop.f32.mrb[26].mxu0 }
 0x2f5   : > { %v9188_v25 = vadd.f32 %v7350_v8, %v7020_v23  ;;  %v4841_v30 = vpop.f32.mrb[27].mxu0 }
 0x2f6   : > { %v9190_v35 = vadd.f32 %v4841_v30, %v2088_v59 }
 0x2fa   : > { %v7353_v41 = vpop.f32.mrb[28].mxu0 }
 0x2fb   : > { %v9192_v22 = vadd.f32 %v7353_v41, %v7023_v7  ;;  %v4854_v33 = vpop.f32.mrb[29].mxu0 }
 0x2fc   : > { %v9194_v40 = vadd.f32 %v4854_v33, %v2101_v34  ;;  %v7354_v1 = vpop.f32.mrb[30].mxu0 }
 0x2fd   : > { %9996 = vst [vmem:[#allocation9_spill] sm:$0xff] %v9192_v22  ;;  %v9197_v48 = vadd.f32 %v7354_v1, %v9132_v12  ;;  %v4857_v56 = vpop.f32.mrb[31].mxu0 }
 0x2fe   : > { %v9200_v62 = vadd.f32 %v4857_v56, %v9134_v10 }
 0x2ff   : > { %9997 = vst [vmem:[#allocation10_spill] sm:$0xff] %v9197_v48 }
 0x302   : > { %v7093_v52 = vpop.f32.mrb[32].mxu1  ;;  %v7357_v23 = vpop.f32.mrb[32].mxu0 }
 0x303   : > { %v9202_v14 = vadd.f32 %v7357_v23, %v7093_v52  ;;  %v2667_v59 = vpop.f32.mrb[33].mxu1  ;;  %v4870_v5 = vpop.f32.mrb[33].mxu0 }
 0x304   : > { %v9204_v39 = vadd.f32 %v4870_v5, %v2667_v59  ;;  %v7094_v7 = vpop.f32.mrb[34].mxu1  ;;  %v7358_v6 = vpop.f32.mrb[34].mxu0 }
 0x305   : > { %9998 = vst [vmem:[#allocation11_spill] sm:$0xff] %v9202_v14  ;;  %v9206_v34 = vadd.f32 %v7358_v6, %v7094_v7  ;;  %v2670_v61 = vpop.f32.mrb[35].mxu1  ;;  %v4873_v4 = vpop.f32.mrb[35].mxu0 }
 0x306   : > { %9999 = vst [vmem:[#allocation12_spill] sm:$0xff] %v9204_v39  ;;  %v9208_v12 = vadd.f32 %v4873_v4, %v2670_v61 }
 0x307   : > { %10000 = vst [vmem:[#allocation13_spill] sm:$0xff] %v9206_v34 }
 0x308   : > { %10001 = vst [vmem:[#allocation14_spill] sm:$0xff] %v9208_v12 }
 0x30a   : > { %v7097_v38 = vpop.f32.mrb[36].mxu1  ;;  %v7361_v46 = vpop.f32.mrb[36].mxu0 }
 0x30b   : > { %v9210_v10 = vadd.f32 %v7361_v46, %v7097_v38  ;;  %v2683_v20 = vpop.f32.mrb[37].mxu1  ;;  %v4886_v32 = vpop.f32.mrb[37].mxu0 }
 0x30c   : > { %v9212_v17 = vadd.f32 %v4886_v32, %v2683_v20  ;;  %v7098_v43 = vpop.f32.mrb[38].mxu1  ;;  %v7362_v18 = vpop.f32.mrb[38].mxu0 }
 0x30d   : > { %10002 = vst [vmem:[#allocation15_spill] sm:$0xff] %v9210_v10  ;;  %v9214_v24 = vadd.f32 %v7362_v18, %v7098_v43  ;;  %v2686_v49 = vpop.f32.mrb[39].mxu1  ;;  %v4889_v2 = vpop.f32.mrb[39].mxu0 }
 0x30e   : > { %10003 = vst [vmem:[#allocation16_spill] sm:$0xff] %v9212_v17  ;;  %v9216_v37 = vadd.f32 %v4889_v2, %v2686_v49 }
 0x310   : > { %10004 = vst [vmem:[#allocation17_spill] sm:$0xff] %v9216_v37 }
 0x312   : > { %v7101_v28 = vpop.f32.mrb[40].mxu1  ;;  %v7365_v9 = vpop.f32.mrb[40].mxu0 }
 0x313   : > { %v9218_v8 = vadd.f32 %v7365_v9, %v7101_v28  ;;  %v2699_v30 = vpop.f32.mrb[41].mxu1  ;;  %v4902_v41 = vpop.f32.mrb[41].mxu0 }
 0x314   : > { %v9220_v33 = vadd.f32 %v4902_v41, %v2699_v30  ;;  %v7102_v1 = vpop.f32.mrb[42].mxu1  ;;  %v7366_v56 = vpop.f32.mrb[42].mxu0 }
 0x315   : > { %10005 = vst [vmem:[#allocation18_spill] sm:$0xff] %v9218_v8  ;;  %v9222_v52 = vadd.f32 %v7366_v56, %v7102_v1  ;;  %v2702_v23 = vpop.f32.mrb[43].mxu1  ;;  %v4905_v59 = vpop.f32.mrb[43].mxu0 }
 0x316   : > { %10006 = vst [vmem:[#allocation19_spill] sm:$0xff] %v9220_v33  ;;  %v9224_v5 = vadd.f32 %v4905_v59, %v2702_v23 }
 0x317   : > { %10007 = vst [vmem:[#allocation20_spill] sm:$0xff] %v9222_v52 }
 0x31a   : > { %v7105_v7 = vpop.f32.mrb[44].mxu1  ;;  %v7369_v6 = vpop.f32.mrb[44].mxu0 }
 0x31b   : > { %v9226_v61 = vadd.f32 %v7369_v6, %v7105_v7  ;;  %v2715_v4 = vpop.f32.mrb[45].mxu1  ;;  %v4918_v38 = vpop.f32.mrb[45].mxu0 }
 0x31c   : > { %v9228_v46 = vadd.f32 %v4918_v38, %v2715_v4  ;;  %v7106_v20 = vpop.f32.mrb[46].mxu1  ;;  %v7370_v32 = vpop.f32.mrb[46].mxu0 }
 0x31d   : > { %10008 = vst [vmem:[#allocation21_spill] sm:$0xff] %v9226_v61  ;;  %v9230_v43 = vadd.f32 %v7370_v32, %v7106_v20  ;;  %v2718_v18 = vpop.f32.mrb[47].mxu1  ;;  %v4921_v49 = vpop.f32.mrb[47].mxu0 }
 0x31e   : > { %10009 = vst [vmem:[#allocation22_spill] sm:$0xff] %v9228_v46  ;;  %v9232_v2 = vadd.f32 %v4921_v49, %v2718_v18 }
 0x31f   : > { %10010 = vst [vmem:[#allocation23_spill] sm:$0xff] %v9230_v43 }
 0x320   : > { %10011 = vst [vmem:[#allocation24_spill] sm:$0xff] %v9232_v2 }
 0x322   : > { %v7109_v28 = vpop.f32.mrb[48].mxu1  ;;  %v7373_v9 = vpop.f32.mrb[48].mxu0 }
 0x323   : > { %v9234_v30 = vadd.f32 %v7373_v9, %v7109_v28  ;;  %v2731_v41 = vpop.f32.mrb[49].mxu1  ;;  %v4934_v1 = vpop.f32.mrb[49].mxu0 }
 0x324   : > { %v9236_v56 = vadd.f32 %v4934_v1, %v2731_v41  ;;  %v7110_v23 = vpop.f32.mrb[50].mxu1  ;;  %v7374_v59 = vpop.f32.mrb[50].mxu0 }
 0x325   : > { %10012 = vst [vmem:[#allocation25_spill] sm:$0xff] %v9234_v30  ;;  %v9238_v7 = vadd.f32 %v7374_v59, %v7110_v23  ;;  %v2734_v6 = vpop.f32.mrb[51].mxu1  ;;  %v4937_v4 = vpop.f32.mrb[51].mxu0 }
 0x326   : > { %10013 = vst [vmem:[#allocation26_spill] sm:$0xff] %v9236_v56  ;;  %v9240_v38 = vadd.f32 %v4937_v4, %v2734_v6 }
 0x327   : > { %10014 = vst [vmem:[#allocation27_spill] sm:$0xff] %v9238_v7 }
 0x328   : > { %10015 = vst [vmem:[#allocation28_spill] sm:$0xff] %v9240_v38 }
 0x32a   : > { %v7113_v20 = vpop.f32.mrb[52].mxu1  ;;  %v7377_v32 = vpop.f32.mrb[52].mxu0 }
 0x32b   : > { %v9242_v18 = vadd.f32 %v7377_v32, %v7113_v20  ;;  %v2747_v49 = vpop.f32.mrb[53].mxu1  ;;  %v4950_v43 = vpop.f32.mrb[53].mxu0 }
 0x32c   : > { %v9244_v28 = vadd.f32 %v4950_v43, %v2747_v49  ;;  %v7114_v9 = vpop.f32.mrb[54].mxu1  ;;  %v7378_v30 = vpop.f32.mrb[54].mxu0 }
 0x32d   : > { %10016 = vst [vmem:[#allocation29_spill] sm:$0xff] %v9242_v18  ;;  %v9246_v41 = vadd.f32 %v7378_v30, %v7114_v9  ;;  %v2750_v1 = vpop.f32.mrb[55].mxu1  ;;  %v4953_v56 = vpop.f32.mrb[55].mxu0 }
 0x32e   : > { %10017 = vst [vmem:[#allocation30_spill] sm:$0xff] %v9244_v28  ;;  %v9248_v23 = vadd.f32 %v4953_v56, %v2750_v1 }
 0x32f   : > { %10018 = vst [vmem:[#allocation31_spill] sm:$0xff] %v9246_v41 }
 0x330   : > { %10019 = vst [vmem:[#allocation32_spill] sm:$0xff] %v9248_v23 }
 0x332   : > { %v7117_v59 = vpop.f32.mrb[56].mxu1  ;;  %v7381_v7 = vpop.f32.mrb[56].mxu0 }
 0x333   : > { %v9250_v6 = vadd.f32 %v7381_v7, %v7117_v59  ;;  %v2763_v4 = vpop.f32.mrb[57].mxu1  ;;  %v4966_v38 = vpop.f32.mrb[57].mxu0 }
 0x334   : > { %v9252_v20 = vadd.f32 %v4966_v38, %v2763_v4  ;;  %v7118_v32 = vpop.f32.mrb[58].mxu1  ;;  %v7382_v18 = vpop.f32.mrb[58].mxu0 }
 0x335   : > { %10020 = vst [vmem:[#allocation33_spill] sm:$0xff] %v9250_v6  ;;  %v9254_v43 = vadd.f32 %v7382_v18, %v7118_v32  ;;  %v2766_v49 = vpop.f32.mrb[59].mxu1  ;;  %v4969_v28 = vpop.f32.mrb[59].mxu0 }
 0x336   : > { %10021 = vst [vmem:[#allocation34_spill] sm:$0xff] %v9252_v20  ;;  %v9256_v30 = vadd.f32 %v4969_v28, %v2766_v49  ;;  %v5066_v28 = vsel (!%p6492_p1), %vm5065_vm4, %v9138_v26, 0.0 }
 0x33a   : > { %v7121_v9 = vpop.f32.mrb[60].mxu1  ;;  %v7385_v41 = vpop.f32.mrb[60].mxu0  ;;  %5063 = sbr.rel (%p6492_p1) target bundleno = 1001 (0x3e9), region = 40 }
 0x33b   : > { %v9258_v56 = vadd.f32 %v7385_v41, %v7121_v9  ;;  %v2779_v1 = vpop.f32.mrb[61].mxu1  ;;  %v4982_v23 = vpop.f32.mrb[61].mxu0  ;;  %v5067_v41 = vsel (!%p6492_p1), %vm5065_vm4, %v9142_v44, 0.0 }
 0x33c   : > { %v9260_v7 = vadd.f32 %v4982_v23, %v2779_v1  ;;  %v7122_v59 = vpop.f32.mrb[62].mxu1  ;;  %v7386_v6 = vpop.f32.mrb[62].mxu0  ;;  %v5069_v23 = vsel (!%p6492_p1), %vm5065_vm4, %v9136_v15, 0.0  ;;  %v5068_v32 = vadd.f32 (!%p6492_p1), %v5067_v41, %v5066_v28  ;;  %v5075_v1 = vsel (!%p6492_p1), %vm5065_vm4, %v9150_v0, 0.0 }
 0x33d   : > { %10022 = vst [vmem:[#allocation35_spill] sm:$0xff] %v9258_v56  ;;  %v9262_v38 = vadd.f32 %v7386_v6, %v7122_v59  ;;  %v2782_v4 = vpop.f32.mrb[63].mxu1  ;;  %v4985_v20 = vpop.f32.mrb[63].mxu0  ;;  %v5071_v6 = vsel (!%p6492_p1), %vm5065_vm4, %v9140_v63, 0.0  ;;  %v5079_v56 = vsel (!%p6492_p1), %vm5065_vm4, %v9148_v53, 0.0  ;;  %v5081_v41 = vsel (!%p6492_p1), %vm5065_vm4, %v9154_v58, 0.0 }
 0x33e   : > { %v9264_v18 = vadd.f32 %v4985_v20, %v2782_v4  ;;  %v5070_v49 = vadd.f32 (!%p6492_p1), %v5069_v23, %v5068_v32  ;;  %v5073_v20 = vsel (!%p6492_p1), %vm5065_vm4, %v9146_v50, 0.0  ;;  %v5077_v4 = vsel (!%p6492_p1), %vm5065_vm4, %v9144_v42, 0.0 }
 0x33f   : > { %10023 = vst [vmem:[#allocation36_spill] sm:$0xff] %v9262_v38  ;;  %v5083_v32 = vsel (!%p6492_p1), %vm5065_vm4, %v9158_v3, 0.0 }
 0x340   : > { %10024 = vst [vmem:[#allocation37_spill] sm:$0xff] %v9264_v18  ;;  %v5072_v9 = vadd.f32 (!%p6492_p1), %v5071_v6, %v5070_v49  ;;  %v5085_v49 = vsel (!%p6492_p1), %vm5065_vm4, %v9152_v31, 0.0 }
 0x342   : > { %v5074_v59 = vadd.f32 %v5073_v20, %v5072_v9  ;;  %v5087_v9 = vsel %vm5065_vm4, %v9156_v11, 0.0 }
 0x344   : > { %v5076_v38 = vadd.f32 %v5075_v1, %v5074_v59  ;;  %v5089_v59 = vsel %vm5065_vm4, %v9162_v29, 0.0 }
 0x346   : > { %v5078_v28 = vadd.f32 %v5077_v4, %v5076_v38  ;;  %v5091_v4 = vsel %vm5065_vm4, %v9166_v47, 0.0 }
 0x348   : > { %v5080_v23 = vadd.f32 %v5079_v56, %v5078_v28  ;;  %v5093_v28 = vsel %vm5065_vm4, %v9160_v36, 0.0 }
 0x34a   : > { %v5082_v6 = vadd.f32 %v5081_v41, %v5080_v23  ;;  %v5095_v23 = vsel %vm5065_vm4, %v9164_v54, 0.0 }
 0x34c   : > { %v5084_v20 = vadd.f32 %v5083_v32, %v5082_v6  ;;  %v5097_v6 = vsel %vm5065_vm4, %v9170_v55, 0.0 }
 0x34e   : > { %v5086_v1 = vadd.f32 %v5085_v49, %v5084_v20  ;;  %v5099_v20 = vsel %vm5065_vm4, %v9174_v57, 0.0 }
 0x350   : > { %v5088_v38 = vadd.f32 %v5087_v9, %v5086_v1  ;;  %v5101_v1 = vsel %vm5065_vm4, %v9168_v13, 0.0 }
 0x352   : > { %v5090_v56 = vadd.f32 %v5089_v59, %v5088_v38  ;;  %v5203_v59 = vmul.f32 %v9138_v26, %v9138_v26  ;;  %v5204_v38 = vmul.f32 %v9142_v44, %v9142_v44  ;;  %v5107_v26 = vsel %vm5065_vm4, %v9182_v27, 0.0 }
 0x354   : > { %v5092_v41 = vadd.f32 %v5091_v4, %v5090_v56  ;;  %v5205_v4 = vmul.f32 %v9136_v15, %v9136_v15  ;;  %v5268_v44 = vsel %vm5065_vm4, %v5204_v38, 0.0 }
 0x356   : > { %v5094_v32 = vadd.f32 %v5093_v28, %v5092_v41  ;;  %v5103_v28 = vsel %vm5065_vm4, %v9172_v60, 0.0  ;;  %v5206_v41 = vmul.f32 %v9140_v63, %v9140_v63  ;;  %v5270_v15 = vsel %vm5065_vm4, %v5205_v4, 0.0 }
 0x358   : > { %v5096_v49 = vadd.f32 %v5095_v23, %v5094_v32  ;;  %v5105_v32 = vsel %vm5065_vm4, %v9178_v51, 0.0 }
 0x35a   : > { %v5098_v9 = vadd.f32 %v5097_v6, %v5096_v49  ;;  %v5207_v6 = vmul.f32 %v9146_v50, %v9146_v50  ;;  %v5267_v49 = vsel %vm5065_vm4, %v5203_v59, 0.0  ;;  %v5109_v50 = vsel %vm5065_vm4, %v9176_v19, 0.0 }
 0x35b   : > { %v5209_v59 = vmul.f32 %v9144_v42, %v9144_v42 }
 0x35c   : > { %v5100_v56 = vadd.f32 %v5099_v20, %v5098_v9  ;;  %v5269_v9 = vadd.f32 %v5268_v44, %v5267_v49  ;;  %v5274_v38 = vsel %vm5065_vm4, %v5207_v6, 0.0  ;;  %v5113_v49 = vsel %vm5065_vm4, %v9186_v21, 0.0 }
 0x35d   : > { %v5278_v6 = vsel %vm5065_vm4, %v5209_v59, 0.0 }
 0x35e   : > { %v5102_v23 = vadd.f32 %v5101_v1, %v5100_v56  ;;  %v5208_v1 = vmul.f32 %v9150_v0, %v9150_v0  ;;  %v5272_v56 = vsel %vm5065_vm4, %v5206_v41, 0.0  ;;  %v5271_v18 = vadd.f32 %v5270_v15, %v5269_v9 }
 0x35f   : > { %v5212_v9 = vmul.f32 %v9158_v3, %v9158_v3 }
 0x360   : > { %v5104_v20 = vadd.f32 %v5103_v28, %v5102_v23  ;;  %v5273_v44 = vadd.f32 %v5272_v56, %v5271_v18  ;;  %v5111_v28 = vsel %vm5065_vm4, %v9180_v16, 0.0  ;;  %v5210_v23 = vmul.f32 %v9148_v53, %v9148_v53 }
 0x361   : > { %v5276_v41 = vsel %vm5065_vm4, %v5208_v1, 0.0  ;;  %v5115_v18 = vsel %vm5065_vm4, %v9190_v35, 0.0 }
 0x362   : > { %v5106_v63 = vadd.f32 %v5105_v32, %v5104_v20  ;;  %v5275_v15 = vadd.f32 %v5274_v38, %v5273_v44  ;;  %v5211_v20 = vmul.f32 %v9154_v58, %v9154_v58  ;;  %v5280_v1 = vsel %vm5065_vm4, %v5210_v23, 0.0 }
 0x363   : > { %v5117_v38 = vsel %vm5065_vm4, %v9184_v45, 0.0  ;;  %v5284_v23 = vsel %vm5065_vm4, %v5212_v9, 0.0 }
 0x364   : > { %v5108_v4 = vadd.f32 %v5107_v26, %v5106_v63  ;;  %v5277_v63 = vadd.f32 %v5276_v41, %v5275_v15  ;;  %v5282_v59 = vsel %vm5065_vm4, %v5211_v20, 0.0  ;;  %v5119_v41 = vsel %vm5065_vm4, %v9188_v25, 0.0 }
 0x366   : > { %v5110_v32 = vadd.f32 %v5109_v50, %v5108_v4  ;;  %v5279_v56 = vadd.f32 %v5278_v6, %v5277_v63  ;;  %v5213_v4 = vmul.f32 %v9152_v31, %v9152_v31  ;;  %v5121_v6 = vsel %vm5065_vm4, %v9194_v40, 0.0 }
 0x368   : > { %v5112_v26 = vadd.f32 %v5111_v28, %v5110_v32  ;;  %v5281_v28 = vadd.f32 %v5280_v1, %v5279_v56  ;;  %v5214_v32 = vmul.f32 %v9156_v11, %v9156_v11  ;;  %v5286_v20 = vsel %vm5065_vm4, %v5213_v4, 0.0 }
 0x369   : > { %v5123_v1 = vsel %vm5065_vm4, %v9200_v62, 0.0 }
 0x36a   : > { %v5114_v50 = vadd.f32 %v5113_v49, %v5112_v26  ;;  %v5283_v49 = vadd.f32 %v5282_v59, %v5281_v28  ;;  %v5215_v26 = vmul.f32 %v9162_v29, %v9162_v29  ;;  %v5288_v9 = vsel %vm5065_vm4, %v5214_v32, 0.0 }
 0x36b   : > { %v5125_v59 = vsel %vm5065_vm4, %v9192_v22, 0.0 }
 0x36c   : > { %v5116_v44 = vadd.f32 %v5115_v18, %v5114_v50  ;;  %v5285_v18 = vadd.f32 %v5284_v23, %v5283_v49  ;;  %v5216_v50 = vmul.f32 %v9166_v47, %v9166_v47  ;;  %v5290_v4 = vsel %vm5065_vm4, %v5215_v26, 0.0 }
 0x36d   : > { %v5127_v23 = vsel %vm5065_vm4, %v9197_v48, 0.0 }
 0x36e   : > { %v5118_v15 = vadd.f32 %v5117_v38, %v5116_v44  ;;  %v5287_v38 = vadd.f32 %v5286_v20, %v5285_v18  ;;  %v5217_v44 = vmul.f32 %v9160_v36, %v9160_v36  ;;  %v5292_v32 = vsel %vm5065_vm4, %v5216_v50, 0.0 }
 0x36f   : > { %v5129_v20 = vsel %vm5065_vm4, %v9204_v39, 0.0 }
 0x370   : > { %v5120_v63 = vadd.f32 %v5119_v41, %v5118_v15  ;;  %v5289_v41 = vadd.f32 %v5288_v9, %v5287_v38  ;;  %v5218_v15 = vmul.f32 %v9164_v54, %v9164_v54  ;;  %v5294_v26 = vsel %vm5065_vm4, %v5217_v44, 0.0 }
 0x371   : > { %v5131_v9 = vsel %vm5065_vm4, %v9208_v12, 0.0 }
 0x372   : > { %v5122_v56 = vadd.f32 %v5121_v6, %v5120_v63  ;;  %v5291_v6 = vadd.f32 %v5290_v4, %v5289_v41  ;;  %v5219_v63 = vmul.f32 %v9170_v55, %v9170_v55  ;;  %v5296_v50 = vsel %vm5065_vm4, %v5218_v15, 0.0 }
 0x373   : > { %v5133_v4 = vsel %vm5065_vm4, %v9202_v14, 0.0 }
 0x374   : > { %v5124_v28 = vadd.f32 %v5123_v1, %v5122_v56  ;;  %v5293_v1 = vadd.f32 %v5292_v32, %v5291_v6  ;;  %v5220_v56 = vmul.f32 %v9174_v57, %v9174_v57  ;;  %v5298_v44 = vsel %vm5065_vm4, %v5219_v63, 0.0 }
 0x375   : > { %v5135_v32 = vsel %vm5065_vm4, %v9206_v34, 0.0 }
 0x376   : > { %v5126_v49 = vadd.f32 %v5125_v59, %v5124_v28  ;;  %v5295_v59 = vadd.f32 %v5294_v26, %v5293_v1  ;;  %v5221_v28 = vmul.f32 %v9168_v13, %v9168_v13  ;;  %v5300_v15 = vsel %vm5065_vm4, %v5220_v56, 0.0 }
 0x377   : > { %v5137_v26 = vsel %vm5065_vm4, %v9212_v17, 0.0 }
 0x378   : > { %v5128_v18 = vadd.f32 %v5127_v23, %v5126_v49  ;;  %v5297_v23 = vadd.f32 %v5296_v50, %v5295_v59  ;;  %v5222_v49 = vmul.f32 %v9172_v60, %v9172_v60  ;;  %v5302_v63 = vsel %vm5065_vm4, %v5221_v28, 0.0 }
 0x379   : > { %v5139_v50 = vsel %vm5065_vm4, %v9216_v37, 0.0 }
 0x37a   : > { %v5130_v38 = vadd.f32 %v5129_v20, %v5128_v18  ;;  %v5299_v20 = vadd.f32 %v5298_v44, %v5297_v23  ;;  %v5223_v18 = vmul.f32 %v9178_v51, %v9178_v51  ;;  %v5304_v56 = vsel %vm5065_vm4, %v5222_v49, 0.0 }
 0x37b   : > { %v5141_v44 = vsel %vm5065_vm4, %v9210_v10, 0.0 }
 0x37c   : > { %v5132_v41 = vadd.f32 %v5131_v9, %v5130_v38  ;;  %v5301_v9 = vadd.f32 %v5300_v15, %v5299_v20  ;;  %v5224_v38 = vmul.f32 %v9182_v27, %v9182_v27  ;;  %v5306_v28 = vsel %vm5065_vm4, %v5223_v18, 0.0 }
 0x37d   : > { %v5143_v15 = vsel %vm5065_vm4, %v9214_v24, 0.0 }
 0x37e   : > { %v5134_v6 = vadd.f32 %v5133_v4, %v5132_v41  ;;  %v5303_v4 = vadd.f32 %v5302_v63, %v5301_v9  ;;  %v5225_v41 = vmul.f32 %v9176_v19, %v9176_v19  ;;  %v5308_v49 = vsel %vm5065_vm4, %v5224_v38, 0.0 }
 0x37f   : > { %v5145_v63 = vsel %vm5065_vm4, %v9220_v33, 0.0 }
 0x380   : > { %v5136_v1 = vadd.f32 %v5135_v32, %v5134_v6  ;;  %v5305_v32 = vadd.f32 %v5304_v56, %v5303_v4  ;;  %v5226_v6 = vmul.f32 %v9180_v16, %v9180_v16  ;;  %v5310_v18 = vsel %vm5065_vm4, %v5225_v41, 0.0 }
 0x381   : > { %v5147_v56 = vsel %vm5065_vm4, %v9224_v5, 0.0 }
 0x382   : > { %v5138_v59 = vadd.f32 %v5137_v26, %v5136_v1  ;;  %v5307_v26 = vadd.f32 %v5306_v28, %v5305_v32  ;;  %v5227_v1 = vmul.f32 %v9186_v21, %v9186_v21  ;;  %v5312_v38 = vsel %vm5065_vm4, %v5226_v6, 0.0 }
 0x383   : > { %v5149_v28 = vsel %vm5065_vm4, %v9218_v8, 0.0 }
 0x384   : > { %v5140_v23 = vadd.f32 %v5139_v50, %v5138_v59  ;;  %v5309_v50 = vadd.f32 %v5308_v49, %v5307_v26  ;;  %v5228_v59 = vmul.f32 %v9190_v35, %v9190_v35  ;;  %v5314_v41 = vsel %vm5065_vm4, %v5227_v1, 0.0 }
 0x385   : > { %v5151_v49 = vsel %vm5065_vm4, %v9222_v52, 0.0 }
 0x386   : > { %v5142_v20 = vadd.f32 %v5141_v44, %v5140_v23  ;;  %v5311_v44 = vadd.f32 %v5310_v18, %v5309_v50  ;;  %v5229_v23 = vmul.f32 %v9184_v45, %v9184_v45  ;;  %v5316_v6 = vsel %vm5065_vm4, %v5228_v59, 0.0 }
 0x387   : > { %v5153_v18 = vsel %vm5065_vm4, %v9228_v46, 0.0 }
 0x388   : > { %v5144_v9 = vadd.f32 %v5143_v15, %v5142_v20  ;;  %v5313_v15 = vadd.f32 %v5312_v38, %v5311_v44  ;;  %v5230_v20 = vmul.f32 %v9188_v25, %v9188_v25  ;;  %v5318_v1 = vsel %vm5065_vm4, %v5229_v23, 0.0 }
 0x389   : > { %v5155_v38 = vsel %vm5065_vm4, %v9232_v2, 0.0 }
 0x38a   : > { %v5146_v4 = vadd.f32 %v5145_v63, %v5144_v9  ;;  %v5315_v63 = vadd.f32 %v5314_v41, %v5313_v15  ;;  %v5231_v9 = vmul.f32 %v9194_v40, %v9194_v40  ;;  %v5320_v59 = vsel %vm5065_vm4, %v5230_v20, 0.0 }
 0x38b   : > { %v5157_v41 = vsel %vm5065_vm4, %v9226_v61, 0.0 }
 0x38c   : > { %v5148_v32 = vadd.f32 %v5147_v56, %v5146_v4  ;;  %v5317_v56 = vadd.f32 %v5316_v6, %v5315_v63  ;;  %v5232_v4 = vmul.f32 %v9200_v62, %v9200_v62  ;;  %v5322_v23 = vsel %vm5065_vm4, %v5231_v9, 0.0  ;;  %v10025_v6 = vld [vmem:[#allocation23_spill] sm:$0xff] }
 0x38d   : > { %v5234_v63 = vmul.f32 %v9197_v48, %v9197_v48  ;;  %v5236_v48 = vmul.f32 %v9208_v12, %v9208_v12  ;;  %v5238_v12 = vmul.f32 %v9206_v34, %v9206_v34  ;;  %v5240_v34 = vmul.f32 %v9216_v37, %v9216_v37 }
 0x38e   : > { %v5150_v26 = vadd.f32 %v5149_v28, %v5148_v32  ;;  %v5319_v28 = vadd.f32 %v5318_v1, %v5317_v56  ;;  %v5233_v32 = vmul.f32 %v9192_v22, %v9192_v22  ;;  %v5324_v20 = vsel %vm5065_vm4, %v5232_v4, 0.0 }
 0x38f   : > { %v5235_v22 = vmul.f32 %v9204_v39, %v9204_v39  ;;  %v5328_v4 = vsel %vm5065_vm4, %v5234_v63, 0.0  ;;  %v5237_v39 = vmul.f32 %v9202_v14, %v9202_v14  ;;  %v5332_v63 = vsel %vm5065_vm4, %v5236_v48, 0.0 }
 0x390   : > { %v5152_v50 = vadd.f32 %v5151_v49, %v5150_v26  ;;  %v5321_v49 = vadd.f32 %v5320_v59, %v5319_v28  ;;  %v5159_v26 = vsel %vm5065_vm4, %v10025_v6, 0.0  ;;  %v5326_v9 = vsel %vm5065_vm4, %v5233_v32, 0.0 }
 0x391   : > { %v5330_v32 = vsel %vm5065_vm4, %v5235_v22, 0.0  ;;  %v5239_v14 = vmul.f32 %v9212_v17, %v9212_v17  ;;  %v5334_v22 = vsel %vm5065_vm4, %v5237_v39, 0.0  ;;  %v5336_v48 = vsel %vm5065_vm4, %v5238_v12, 0.0 }
 0x392   : > { %v5154_v44 = vadd.f32 %v5153_v18, %v5152_v50  ;;  %v5323_v1 = vadd.f32 %v5322_v23, %v5321_v49  ;;  %v10026_v50 = vld [vmem:[#allocation26_spill] sm:$0xff]  ;;  %v5241_v17 = vmul.f32 %v9210_v10, %v9210_v10  ;;  %v5242_v37 = vmul.f32 %v9214_v24, %v9214_v24 }
 0x393   : > { %v5161_v56 = vsel %vm5065_vm4, %v10026_v50, 0.0  ;;  %v5338_v39 = vsel %vm5065_vm4, %v5239_v14, 0.0  ;;  %v5340_v12 = vsel %vm5065_vm4, %v5240_v34, 0.0  ;;  %v5243_v10 = vmul.f32 %v9220_v33, %v9220_v33 }
 0x394   : > { %v5156_v15 = vadd.f32 %v5155_v38, %v5154_v44  ;;  %v5325_v59 = vadd.f32 %v5324_v20, %v5323_v1  ;;  %v10027_v44 = vld [vmem:[#allocation28_spill] sm:$0xff]  ;;  %v5342_v14 = vsel %vm5065_vm4, %v5241_v17, 0.0  ;;  %v5344_v34 = vsel %vm5065_vm4, %v5242_v37, 0.0 }
 0x395   : > { %v5163_v28 = vsel %vm5065_vm4, %v10027_v44, 0.0  ;;  %v5245_v33 = vmul.f32 %v9218_v8, %v9218_v8  ;;  %v5346_v17 = vsel %vm5065_vm4, %v5243_v10, 0.0 }
 0x396   : > { %v5158_v18 = vadd.f32 %v5157_v41, %v5156_v15  ;;  %v5327_v23 = vadd.f32 %v5326_v9, %v5325_v59  ;;  %v10028_v15 = vld [vmem:[#allocation25_spill] sm:$0xff] }
 0x397   : > { %v5165_v49 = vsel %vm5065_vm4, %v10028_v15, 0.0  ;;  %v5350_v10 = vsel %vm5065_vm4, %v5245_v33, 0.0 }
 0x398   : > { %v5160_v38 = vadd.f32 %v5159_v26, %v5158_v18  ;;  %v5329_v20 = vadd.f32 %v5328_v4, %v5327_v23  ;;  %v10029_v18 = vld [vmem:[#allocation27_spill] sm:$0xff] }
 0x399   : > { %v5167_v1 = vsel %vm5065_vm4, %v10029_v18, 0.0 }
 0x39a   : > { %v5162_v41 = vadd.f32 %v5161_v56, %v5160_v38  ;;  %v5331_v9 = vadd.f32 %v5330_v32, %v5329_v20  ;;  %v10030_v38 = vld [vmem:[#allocation30_spill] sm:$0xff] }
 0x39b   : > { %v5169_v59 = vsel %vm5065_vm4, %v10030_v38, 0.0 }
 0x39c   : > { %v5164_v26 = vadd.f32 %v5163_v28, %v5162_v41  ;;  %v5333_v4 = vadd.f32 %v5332_v63, %v5331_v9  ;;  %v10031_v41 = vld [vmem:[#allocation32_spill] sm:$0xff] }
 0x39d   : > { %v5171_v23 = vsel %vm5065_vm4, %v10031_v41, 0.0 }
 0x39e   : > { %v5166_v56 = vadd.f32 %v5165_v49, %v5164_v26  ;;  %v5335_v32 = vadd.f32 %v5334_v22, %v5333_v4  ;;  %v10032_v26 = vld [vmem:[#allocation29_spill] sm:$0xff] }
 0x39f   : > { %v5173_v20 = vsel %vm5065_vm4, %v10032_v26, 0.0 }
 0x3a0   : > { %v5168_v28 = vadd.f32 %v5167_v1, %v5166_v56  ;;  %v5337_v63 = vadd.f32 %v5336_v48, %v5335_v32  ;;  %v10033_v56 = vld [vmem:[#allocation31_spill] sm:$0xff]  ;;  %v5244_v32 = vmul.f32 %v9224_v5, %v9224_v5 }
 0x3a1   : > { %v5175_v9 = vsel %vm5065_vm4, %v10033_v56, 0.0 }
 0x3a2   : > { %v5170_v49 = vadd.f32 %v5169_v59, %v5168_v28  ;;  %v5339_v22 = vadd.f32 %v5338_v39, %v5337_v63  ;;  %v10034_v28 = vld [vmem:[#allocation34_spill] sm:$0xff]  ;;  %v5348_v37 = vsel %vm5065_vm4, %v5244_v32, 0.0 }
 0x3a3   : > { %v5177_v4 = vsel %vm5065_vm4, %v10034_v28, 0.0 }
 0x3a4   : > { %v5172_v1 = vadd.f32 %v5171_v23, %v5170_v49  ;;  %v5341_v48 = vadd.f32 %v5340_v12, %v5339_v22  ;;  %v5179_v49 = vsel %vm5065_vm4, %v9256_v30, 0.0  ;;  %v5246_v22 = vmul.f32 %v9222_v52, %v9222_v52 }
 0x3a5   : > { %v5248_v52 = vmul.f32 %v9232_v2, %v9232_v2  ;;  %v5250_v2 = vmul.f32 %v10025_v6, %v10025_v6  ;;  %v5253_v6 = vmul.f32 %v10028_v15, %v10028_v15  ;;  %v5256_v15 = vmul.f32 %v10031_v41, %v10031_v41 }
 0x3a6   : > { %v5174_v59 = vadd.f32 %v5173_v20, %v5172_v1  ;;  %v5343_v39 = vadd.f32 %v5342_v14, %v5341_v48  ;;  %v10035_v1 = vld [vmem:[#allocation33_spill] sm:$0xff]  ;;  %v5247_v48 = vmul.f32 %v9228_v46, %v9228_v46  ;;  %v5352_v32 = vsel %vm5065_vm4, %v5246_v22, 0.0 }
 0x3a7   : > { %v5181_v63 = vsel %vm5065_vm4, %v10035_v1, 0.0  ;;  %v5249_v46 = vmul.f32 %v9226_v61, %v9226_v61  ;;  %v5356_v22 = vsel %vm5065_vm4, %v5248_v52, 0.0 }
 0x3a8   : > { %v5176_v23 = vadd.f32 %v5175_v9, %v5174_v59  ;;  %v5345_v12 = vadd.f32 %v5344_v34, %v5343_v39  ;;  %v5183_v59 = vsel %vm5065_vm4, %v9254_v43, 0.0  ;;  %v5354_v33 = vsel %vm5065_vm4, %v5247_v48, 0.0 }
 0x3a9   : > { %v5252_v48 = vmul.f32 %v10027_v44, %v10027_v44  ;;  %v5255_v44 = vmul.f32 %v10030_v38, %v10030_v38  ;;  %v5258_v38 = vmul.f32 %v10033_v56, %v10033_v56  ;;  %v5261_v56 = vmul.f32 %v10035_v1, %v10035_v1 }
 0x3aa   : > { %v5178_v20 = vadd.f32 %v5177_v4, %v5176_v23  ;;  %v5347_v14 = vadd.f32 %v5346_v17, %v5345_v12  ;;  %v5185_v23 = vsel %vm5065_vm4, %v9260_v7, 0.0 }
 0x3ac   : > { %v5180_v9 = vadd.f32 %v5179_v49, %v5178_v20  ;;  %v5349_v34 = vadd.f32 %v5348_v37, %v5347_v14  ;;  %v10036_v20 = vld [vmem:[#allocation37_spill] sm:$0xff] }
 0x3ad   : > { %v5187_v39 = vsel %vm5065_vm4, %v10036_v20, 0.0 }
 0x3ae   : > { %v5182_v4 = vadd.f32 %v5181_v63, %v5180_v9  ;;  %v5351_v17 = vadd.f32 %v5350_v10, %v5349_v34  ;;  %v10037_v9 = vld [vmem:[#allocation35_spill] sm:$0xff]  ;;  %v5358_v34 = vsel %vm5065_vm4, %v5249_v46, 0.0  ;;  %v5364_v46 = vsel %vm5065_vm4, %v5252_v48, 0.0 }
 0x3af   : > { %v5189_v12 = vsel %vm5065_vm4, %v10037_v9, 0.0  ;;  %v5372_v48 = vsel %vm5065_vm4, %v5256_v15, 0.0  ;;  %v5265_v15 = vmul.f32 %v10037_v9, %v10037_v9 }
 0x3b0   : > { %v5184_v49 = vadd.f32 %v5183_v59, %v5182_v4  ;;  %v5353_v37 = vadd.f32 %v5352_v32, %v5351_v17  ;;  %v10038_v4 = vld [vmem:[#allocation36_spill] sm:$0xff] }
 0x3b1   : > { %v5191_v14 = vsel %vm5065_vm4, %v10038_v4, 0.0 }
 0x3b2   : > { %v5186_v63 = vadd.f32 %v5185_v23, %v5184_v49  ;;  %v5355_v10 = vadd.f32 %v5354_v33, %v5353_v37  ;;  %v5251_v49 = vmul.f32 %v10026_v50, %v10026_v50  ;;  %v5254_v50 = vmul.f32 %v10029_v18, %v10029_v18 }
 0x3b3   : > { %v5257_v18 = vmul.f32 %v10032_v26, %v10032_v26 }
 0x3b4   : > { %v5188_v59 = vadd.f32 %v5187_v39, %v5186_v63  ;;  %v5357_v8 = vadd.f32 %v5356_v22, %v5355_v10  ;;  %v5360_v39 = vsel %vm5065_vm4, %v5250_v2, 0.0  ;;  %v5362_v52 = vsel %vm5065_vm4, %v5251_v49, 0.0 }
 0x3b5   : > { %v5366_v2 = vsel %vm5065_vm4, %v5253_v6, 0.0  ;;  %v5370_v10 = vsel %vm5065_vm4, %v5255_v44, 0.0  ;;  %v5260_v6 = vmul.f32 %v9256_v30, %v9256_v30  ;;  %v5382_v44 = vsel %vm5065_vm4, %v5261_v56, 0.0 }
 0x3b6   : > { %v5190_v23 = vadd.f32 %v5189_v12, %v5188_v59  ;;  %v5359_v63 = vadd.f32 %v5358_v34, %v5357_v8 }
 0x3b8   : > { %v5192_v61 = vadd.f32 %v5191_v14, %v5190_v23  ;;  %v5361_v12 = vadd.f32 %v5360_v39, %v5359_v63  ;;  %v5064_v23 = vld [vmem:[#allocation2] sm:$0x1]  ;;  %v5374_v63 = vsel %vm5065_vm4, %v5257_v18, 0.0 }
 0x3ba   : > { %v5193_v32 = vrot.slane %v5192_v61, 4  ;;  %v5363_v59 = vadd.f32 %v5362_v52, %v5361_v12  ;;  %v5376_v52 = vsel %vm5065_vm4, %v5258_v38, 0.0 }
 0x3bc   : > { %v5194_v17 = vadd.f32 %v5193_v32, %v5192_v61  ;;  %v5365_v37 = vadd.f32 %v5364_v46, %v5363_v59  ;;  %v5368_v61 = vsel %vm5065_vm4, %v5254_v50, 0.0  ;;  %v5259_v32 = vmul.f32 %v10034_v28, %v10034_v28 }
 0x3bd   : > { %v5262_v28 = vmul.f32 %v9254_v43, %v9254_v43  ;;  %v5380_v46 = vsel %vm5065_vm4, %v5260_v6, 0.0  ;;  %v5263_v59 = vmul.f32 %v9260_v7, %v9260_v7 }
 0x3be   : > { %v5195_v33 = vrot.slane %v5194_v17, 2  ;;  %v5367_v22 = vadd.f32 %v5366_v2, %v5365_v37  ;;  %v5378_v12 = vsel %vm5065_vm4, %v5259_v32, 0.0 }
 0x3bf   : > { %v5384_v1 = vsel %vm5065_vm4, %v5262_v28, 0.0 }
 0x3c0   : > { %v5196_v8 = vadd.f32 %v5195_v33, %v5194_v17  ;;  %v5369_v34 = vadd.f32 %v5368_v61, %v5367_v22  ;;  %v5386_v61 = vsel %vm5065_vm4, %v5263_v59, 0.0  ;;  %v5266_v22 = vmul.f32 %v10038_v4, %v10038_v4 }
 0x3c2   : > { %v5197_v14 = vrot.slane %v5196_v8, 1  ;;  %v5371_v41 = vadd.f32 %v5370_v10, %v5369_v34  ;;  %v5390_v10 = vsel %vm5065_vm4, %v5265_v15, 0.0 }
 0x3c4   : > { %v5198_v49 = vadd.f32 %v5197_v14, %v5196_v8  ;;  %v5373_v26 = vadd.f32 %v5372_v48, %v5371_v41  ;;  %v5264_v8 = vmul.f32 %v10036_v20, %v10036_v20  ;;  %v5392_v20 = vsel %vm5065_vm4, %v5266_v22, 0.0 }
 0x3c6   : > { %v5199_v39 = vadd.f32 %v5198_v49, %v5064_v23  ;;  %v5375_v17 = vadd.f32 %v5374_v63, %v5373_v26  ;;  %v5388_v23 = vsel %vm5065_vm4, %v5264_v8, 0.0  ;;  %v5202_v63 = vld [vmem:[#allocation3] sm:$0x1] }
 0x3c8   : > { %5201 = vst.msk [vmem:[#allocation2] sm:$0x1] %vm5200_vm5, %v5199_v39  ;;  %v5377_v50 = vadd.f32 %v5376_v52, %v5375_v17 }
 0x3ca   : > { %v5379_v33 = vadd.f32 %v5378_v12, %v5377_v50 }
 0x3cc   : > { %v5381_v2 = vadd.f32 %v5380_v46, %v5379_v33 }
 0x3ce   : > { %v5383_v37 = vadd.f32 %v5382_v44, %v5381_v2 }
 0x3d0   : > { %v5385_v14 = vadd.f32 %v5384_v1, %v5383_v37 }
 0x3d2   : > { %v5387_v18 = vadd.f32 %v5386_v61, %v5385_v14 }
 0x3d4   : > { %v5389_v49 = vadd.f32 %v5388_v23, %v5387_v18 }
 0x3d6   : > { %v5391_v34 = vadd.f32 %v5390_v10, %v5389_v49 }
 0x3d8   : > { %v5393_v38 = vadd.f32 %v5392_v20, %v5391_v34 }
 0x3da   : > { %v5394_v48 = vrot.slane %v5393_v38, 4 }
 0x3dc   : > { %v5395_v39 = vadd.f32 %v5394_v48, %v5393_v38 }
 0x3de   : > { %v5396_v41 = vrot.slane %v5395_v39, 2 }
 0x3e0   : > { %v5397_v9 = vadd.f32 %v5396_v41, %v5395_v39 }
 0x3e2   : > { %v5398_v32 = vrot.slane %v5397_v9, 1 }
 0x3e4   : > { %v5399_v26 = vadd.f32 %v5398_v32, %v5397_v9 }
 0x3e6   : > { %v5400_v6 = vadd.f32 %v5399_v26, %v5202_v63 }
 0x3e8   : > { %5401 = vst.msk [vmem:[#allocation3] sm:$0x1] %vm5200_vm5, %v5400_v6 }
 0x3e9 PF: > { %p6493_p2 = scmp.ne.s32.totalorder %s8000_s14, 1 }
 0x3ea   : > { %v5406_v4 = vld [vmem:[#allocation2] sm:$0x1] (!%p6493_p2)  ;;  %v5419_v46 = vlaneseq (!%p6493_p2)  ;;  %v5416_v1 = vld [vmem:[%s9943_s2 + $0x1] sm:$0x1] (!%p6493_p2)  ;;  %vm5619_vm6 = vcmask (!%p6493_p2), 64512   ;;  %v10039_v14 = vld [vmem:[#allocation5_spill] sm:$0xff] (!%p6493_p2) }
 0x3eb   : > { %5405 = sbr.rel (%p6493_p2) target bundleno = 1083 (0x43b), region = 44  ;;  %v5407_v17 = vmul.f32 (!%p6493_p2), 0.00012207031, %v5406_v4  ;;  %v5412_v59 = vld [vmem:[%s9943_s2] sm:$0x1] (!%p6493_p2)  ;;  %v10041_v10 = vld [vmem:[#allocation4_spill] sm:$0xff] (!%p6493_p2)  ;;  %v10042_v20 = vld [vmem:[#allocation6_spill] sm:$0xff] (!%p6493_p2) }
 0x3ec   : > { %v5420_v33 = vshrl.u32 (!%p6493_p2), %v5419_v46, 7  ;;  %v10040_v23 = vld [vmem:[#allocation7_spill] sm:$0xff] (!%p6493_p2)  ;;  %v10043_v38 = vld [vmem:[#allocation8_spill] sm:$0xff] (!%p6493_p2) }
 0x3ed   : > { %v5410_v12 = vmul.f32 (!%p6493_p2), %v5407_v17, %v5407_v17 }
 0x3ee   : > { %v5421_v44 = vsub.s32 (!%p6493_p2), 0, %v5420_v33 }
 0x3ef   : > { %v5408_v52 = vld [vmem:[#allocation3] sm:$0x1] (!%p6493_p2) }
 0x3f0   : > { %v5409_v56 = vmul.f32 (!%p6493_p2), 0.00012207031, %v5408_v52 }
 0x3f2   : > { %v5411_v50 = vsub.f32 %v5409_v56, %v5410_v12 }
 0x3f4   : > { %v5413_v28 = vadd.f32 1e-05, %v5411_v50 }
 0x3f6   : > { %7960 = vrsqrt.f32 %v5413_v28 }
 0x400   : > { %v7961_v2 = vpop.eup %7960 }
 0x401   : > { %v5415_v8 = vmul.f32 %v7961_v2, %v5412_v59 }
 0x403   : > { %v5417_v37 = vmul.f32 %v5415_v8, %v5407_v17  ;;  %v9596_v15 = vrot.slane %v5415_v8, %v5421_v44 }
 0x405   : > { %v5418_v61 = vsub.f32 %v5416_v1, %v5417_v37  ;;  %v5423_v22 = vmul.f32 %v10039_v14, %v9596_v15  ;;  %v5424_v18 = vmul.f32 %v10040_v23, %v9596_v15  ;;  %v5425_v49 = vmul.f32 %v10041_v10, %v9596_v15 }
 0x406   : > { %v5426_v34 = vmul.f32 %v10042_v20, %v9596_v15  ;;  %v5427_v48 = vmul.f32 %v10043_v38, %v9596_v15  ;;  %v5428_v39 = vmul.f32 %v9150_v0, %v9596_v15  ;;  %v5429_v41 = vmul.f32 %v9144_v42, %v9596_v15 }
 0x407   : > { %v9612_v9 = vrot.slane %v5418_v61, %v5421_v44  ;;  %v5430_v32 = vmul.f32 %v9148_v53, %v9596_v15  ;;  %v5431_v63 = vmul.f32 %v9154_v58, %v9596_v15  ;;  %v5432_v26 = vmul.f32 %v9158_v3, %v9596_v15 }
 0x408   : > { %v5433_v6 = vmul.f32 %v9152_v31, %v9596_v15  ;;  %v5434_v0 = vmul.f32 %v9156_v11, %v9596_v15  ;;  %v5435_v42 = vmul.f32 %v9162_v29, %v9596_v15  ;;  %v5436_v4 = vmul.f32 %v9166_v47, %v9596_v15 }
 0x409   : > { %v5491_v53 = vadd.f32 %v9612_v9, %v5423_v22  ;;  %v5492_v58 = vadd.f32 %v9612_v9, %v5424_v18  ;;  %v5493_v3 = vadd.f32 %v9612_v9, %v5425_v49  ;;  %v5494_v31 = vadd.f32 %v9612_v9, %v5426_v34 }
 0x40a   : > { %v5495_v11 = vadd.f32 %v9612_v9, %v5427_v48  ;;  %v5496_v52 = vadd.f32 %v9612_v9, %v5428_v39  ;;  %v5497_v29 = vadd.f32 %v9612_v9, %v5429_v41  ;;  %v5498_v47 = vadd.f32 %v9612_v9, %v5430_v32 }
 0x40b   : > { %v5555_v17 = vmax.f32 %v5491_v53, 0.0  ;;  %v5556_v56 = vmax.f32 %v5492_v58, 0.0  ;;  %v5557_v12 = vmax.f32 %v5493_v3, 0.0  ;;  %v5558_v50 = vmax.f32 %v5494_v31, 0.0 }
 0x40c   : > { %v5559_v28 = vmax.f32 %v5495_v11, 0.0  ;;  %v5560_v46 = vmax.f32 %v5496_v52, 0.0  ;;  %v5561_v33 = vmax.f32 %v5497_v29, 0.0  ;;  %v5562_v59 = vmax.f32 %v5498_v47, 0.0 }
 0x40d   : > { %5620 = vst.msk [vmem:[%s8103_s9] sm:$0xff] %vm5619_vm6, %v5555_v17  ;;  %5621 = vst.msk [vmem:[%s8103_s9 + $0x8] sm:$0xff] %vm5619_vm6, %v5556_v56  ;;  %v5499_v44 = vadd.f32 %v9612_v9, %v5431_v63  ;;  %v5500_v2 = vadd.f32 %v9612_v9, %v5432_v26  ;;  %v5501_v8 = vadd.f32 %v9612_v9, %v5433_v6 }
 0x40e   : > { %5622 = vst.msk [vmem:[%s8103_s9 + $0x10] sm:$0xff] %vm5619_vm6, %v5557_v12  ;;  %5623 = vst.msk [vmem:[%s8103_s9 + $0x18] sm:$0xff] %vm5619_vm6, %v5558_v50  ;;  %v5502_v1 = vadd.f32 %v9612_v9, %v5434_v0  ;;  %v5503_v37 = vadd.f32 %v9612_v9, %v5435_v42  ;;  %v5504_v61 = vadd.f32 %v9612_v9, %v5436_v4 }
 0x40f   : > { %5624 = vst.msk [vmem:[%s8103_s9 + $0x20] sm:$0xff] %vm5619_vm6, %v5559_v28  ;;  %5625 = vst.msk [vmem:[%s8103_s9 + $0x28] sm:$0xff] %vm5619_vm6, %v5560_v46  ;;  %v5437_v14 = vmul.f32 %v9160_v36, %v9596_v15  ;;  %v5438_v22 = vmul.f32 %v9164_v54, %v9596_v15  ;;  %v5563_v23 = vmax.f32 %v5499_v44, 0.0  ;;  %v5564_v18 = vmax.f32 %v5500_v2, 0.0  ;;  %v10044_v46 = vld [vmem:[#allocation9_spill] sm:$0xff] }
 0x410   : > { %5626 = vst.msk [vmem:[%s8103_s9 + $0x30] sm:$0xff] %vm5619_vm6, %v5561_v33  ;;  %5627 = vst.msk [vmem:[%s8103_s9 + $0x38] sm:$0xff] %vm5619_vm6, %v5562_v59  ;;  %v5565_v10 = vmax.f32 %v5501_v8, 0.0  ;;  %v5566_v49 = vmax.f32 %v5502_v1, 0.0  ;;  %v5567_v20 = vmax.f32 %v5503_v37, 0.0  ;;  %v5568_v34 = vmax.f32 %v5504_v61, 0.0 }
 0x411   : > { %v5505_v38 = vadd.f32 %v9612_v9, %v5437_v14  ;;  %v5506_v48 = vadd.f32 %v9612_v9, %v5438_v22  ;;  %5628 = vst.msk [vmem:[%s8103_s9 + $0x40] sm:$0xff] %vm5619_vm6, %v5563_v23  ;;  %5629 = vst.msk [vmem:[%s8103_s9 + $0x48] sm:$0xff] %vm5619_vm6, %v5564_v18  ;;  %v5439_v36 = vmul.f32 %v9170_v55, %v9596_v15  ;;  %v10045_v59 = vld [vmem:[#allocation10_spill] sm:$0xff]  ;;  %v10046_v18 = vld [vmem:[#allocation12_spill] sm:$0xff] }
 0x412   : > { %5630 = vst.msk [vmem:[%s8103_s9 + $0x50] sm:$0xff] %vm5619_vm6, %v5565_v10  ;;  %5631 = vst.msk [vmem:[%s8103_s9 + $0x58] sm:$0xff] %vm5619_vm6, %v5566_v49  ;;  %v5440_v54 = vmul.f32 %v9174_v57, %v9596_v15  ;;  %v5441_v39 = vmul.f32 %v9168_v13, %v9596_v15  ;;  %v5442_v41 = vmul.f32 %v9172_v60, %v9596_v15  ;;  %v10047_v49 = vld [vmem:[#allocation14_spill] sm:$0xff] }
 0x413   : > { %5632 = vst.msk [vmem:[%s8103_s9 + $0x60] sm:$0xff] %vm5619_vm6, %v5567_v20  ;;  %5633 = vst.msk [vmem:[%s8103_s9 + $0x68] sm:$0xff] %vm5619_vm6, %v5568_v34  ;;  %v5569_v32 = vmax.f32 %v5505_v38, 0.0  ;;  %v5570_v63 = vmax.f32 %v5506_v48, 0.0  ;;  %v5443_v26 = vmul.f32 %v9178_v51, %v9596_v15  ;;  %v5444_v55 = vmul.f32 %v9182_v27, %v9596_v15  ;;  %v10048_v34 = vld [vmem:[#allocation11_spill] sm:$0xff]  ;;  %v10049_v48 = vld [vmem:[#allocation13_spill] sm:$0xff] }
 0x414   : > { %v5507_v57 = vadd.f32 %v9612_v9, %v5439_v36  ;;  %v5508_v6 = vadd.f32 %v9612_v9, %v5440_v54  ;;  %v5509_v13 = vadd.f32 %v9612_v9, %v5441_v39  ;;  %v5510_v60 = vadd.f32 %v9612_v9, %v5442_v41  ;;  %v10050_v41 = vld [vmem:[#allocation16_spill] sm:$0xff] }
 0x415   : > { %5634 = vst.msk [vmem:[%s8103_s9 + $0x70] sm:$0xff] %vm5619_vm6, %v5569_v32  ;;  %5635 = vst.msk [vmem:[%s8103_s9 + $0x78] sm:$0xff] %vm5619_vm6, %v5570_v63  ;;  %v5511_v51 = vadd.f32 %v9612_v9, %v5443_v26  ;;  %v5512_v27 = vadd.f32 %v9612_v9, %v5444_v55  ;;  %v5445_v0 = vmul.f32 %v9176_v19, %v9596_v15  ;;  %v10051_v63 = vld [vmem:[#allocation17_spill] sm:$0xff] }
 0x416   : > { %v5446_v42 = vmul.f32 %v9180_v16, %v9596_v15  ;;  %v5571_v4 = vmax.f32 %v5507_v57, 0.0  ;;  %v5572_v53 = vmax.f32 %v5508_v6, 0.0  ;;  %v5573_v58 = vmax.f32 %v5509_v13, 0.0 }
 0x417   : > { %v5574_v3 = vmax.f32 %v5510_v60, 0.0  ;;  %v5575_v31 = vmax.f32 %v5511_v51, 0.0  ;;  %v5576_v11 = vmax.f32 %v5512_v27, 0.0  ;;  %v5513_v52 = vadd.f32 %v9612_v9, %v5445_v0  ;;  %v10052_v27 = vld [vmem:[#allocation15_spill] sm:$0xff] }
 0x418   : > { %v5514_v29 = vadd.f32 %v9612_v9, %v5446_v42  ;;  %5636 = vst.msk [vmem:[%s8103_s9 + $0x80] sm:$0xff] %vm5619_vm6, %v5571_v4  ;;  %5637 = vst.msk [vmem:[%s8103_s9 + $0x88] sm:$0xff] %vm5619_vm6, %v5572_v53  ;;  %v5447_v19 = vmul.f32 %v9186_v21, %v9596_v15  ;;  %v5448_v16 = vmul.f32 %v9190_v35, %v9596_v15 }
 0x419   : > { %5638 = vst.msk [vmem:[%s8103_s9 + $0x90] sm:$0xff] %vm5619_vm6, %v5573_v58  ;;  %5639 = vst.msk [vmem:[%s8103_s9 + $0x98] sm:$0xff] %vm5619_vm6, %v5574_v3  ;;  %v5449_v47 = vmul.f32 %v9184_v45, %v9596_v15  ;;  %v5450_v17 = vmul.f32 %v9188_v25, %v9596_v15  ;;  %v5577_v56 = vmax.f32 %v5513_v52, 0.0  ;;  %v5451_v50 = vmul.f32 %v9194_v40, %v9596_v15 }
 0x41a   : > { %5640 = vst.msk [vmem:[%s8103_s9 + $0xa0] sm:$0xff] %vm5619_vm6, %v5575_v31  ;;  %5641 = vst.msk [vmem:[%s8103_s9 + $0xa8] sm:$0xff] %vm5619_vm6, %v5576_v11  ;;  %v5578_v12 = vmax.f32 %v5514_v29, 0.0  ;;  %v5452_v21 = vmul.f32 %v9200_v62, %v9596_v15  ;;  %v5515_v35 = vadd.f32 %v9612_v9, %v5447_v19  ;;  %v5516_v28 = vadd.f32 %v9612_v9, %v5448_v16 }
 0x41b   : > { %v5517_v45 = vadd.f32 %v9612_v9, %v5449_v47  ;;  %v5518_v25 = vadd.f32 %v9612_v9, %v5450_v17  ;;  %5642 = vst.msk [vmem:[%s8103_s9 + $0xb0] sm:$0xff] %vm5619_vm6, %v5577_v56  ;;  %v5519_v40 = vadd.f32 %v9612_v9, %v5451_v50  ;;  %v5453_v33 = vmul.f32 %v10044_v46, %v9596_v15  ;;  %v10054_v47 = vld [vmem:[#allocation18_spill] sm:$0xff]  ;;  %v10055_v56 = vld [vmem:[#allocation20_spill] sm:$0xff] }
 0x41c   : > { %5643 = vst.msk [vmem:[%s8103_s9 + $0xb8] sm:$0xff] %vm5619_vm6, %v5578_v12  ;;  %v5520_v62 = vadd.f32 %v9612_v9, %v5452_v21  ;;  %v5454_v44 = vmul.f32 %v10045_v59, %v9596_v15  ;;  %v5579_v2 = vmax.f32 %v5515_v35, 0.0  ;;  %v5580_v8 = vmax.f32 %v5516_v28, 0.0  ;;  %v10056_v35 = vld [vmem:[#allocation22_spill] sm:$0xff] }
 0x41d   : > { %v5581_v1 = vmax.f32 %v5517_v45, 0.0  ;;  %v5582_v37 = vmax.f32 %v5518_v25, 0.0  ;;  %v5583_v61 = vmax.f32 %v5519_v40, 0.0  ;;  %v5521_v22 = vadd.f32 %v9612_v9, %v5453_v33  ;;  %v10057_v45 = vld [vmem:[#allocation24_spill] sm:$0xff] }
 0x41e   : > { %v5584_v14 = vmax.f32 %v5520_v62, 0.0  ;;  %v5522_v23 = vadd.f32 %v9612_v9, %v5454_v44  ;;  %5644 = vst.msk [vmem:[%s8103_s9 + $0xc0] sm:$0xff] %vm5619_vm6, %v5579_v2  ;;  %5645 = vst.msk [vmem:[%s8103_s9 + $0xc8] sm:$0xff] %vm5619_vm6, %v5580_v8  ;;  %v5455_v10 = vmul.f32 %v10046_v18, %v9596_v15  ;;  %v5456_v20 = vmul.f32 %v10047_v49, %v9596_v15  ;;  %v10058_v44 = vld [vmem:[#allocation21_spill] sm:$0xff]  ;;  %v10059_v8 = vld [vmem:[#allocation23_spill] sm:$0xff] }
 0x41f   : > { %5646 = vst.msk [vmem:[%s8103_s9 + $0xd0] sm:$0xff] %vm5619_vm6, %v5581_v1  ;;  %5647 = vst.msk [vmem:[%s8103_s9 + $0xd8] sm:$0xff] %vm5619_vm6, %v5582_v37  ;;  %v5457_v38 = vmul.f32 %v10048_v34, %v9596_v15  ;;  %v5458_v36 = vmul.f32 %v10049_v48, %v9596_v15  ;;  %v5585_v54 = vmax.f32 %v5521_v22, 0.0  ;;  %v5459_v32 = vmul.f32 %v10050_v41, %v9596_v15 }
 0x420   : > { %5648 = vst.msk [vmem:[%s8103_s9 + $0xe0] sm:$0xff] %vm5619_vm6, %v5583_v61  ;;  %5649 = vst.msk [vmem:[%s8103_s9 + $0xe8] sm:$0xff] %vm5619_vm6, %v5584_v14  ;;  %v5586_v39 = vmax.f32 %v5522_v23, 0.0  ;;  %v5460_v26 = vmul.f32 %v10051_v63, %v9596_v15  ;;  %v5523_v55 = vadd.f32 %v9612_v9, %v5455_v10  ;;  %v5524_v57 = vadd.f32 %v9612_v9, %v5456_v20  ;;  %v10060_v20 = vld [vmem:[#allocation26_spill] sm:$0xff] }
 0x421   : > { %v5525_v6 = vadd.f32 %v9612_v9, %v5457_v38  ;;  %v5526_v13 = vadd.f32 %v9612_v9, %v5458_v36  ;;  %5650 = vst.msk [vmem:[%s8103_s9 + $0xf0] sm:$0xff] %vm5619_vm6, %v5585_v54  ;;  %v5527_v60 = vadd.f32 %v9612_v9, %v5459_v32  ;;  %v5461_v0 = vmul.f32 %v10052_v27, %v9596_v15  ;;  %v10061_v38 = vld [vmem:[#allocation28_spill] sm:$0xff]  ;;  %v10062_v36 = vld [vmem:[#allocation25_spill] sm:$0xff] }
 0x422   : > { %5651 = vst.msk [vmem:[%s8103_s9 + $0xf8] sm:$0xff] %vm5619_vm6, %v5586_v39  ;;  %v5528_v51 = vadd.f32 %v9612_v9, %v5460_v26  ;;  %v5462_v42 = vmul.f32 %v9214_v24, %v9596_v15  ;;  %v5587_v4 = vmax.f32 %v5523_v55, 0.0  ;;  %v5588_v53 = vmax.f32 %v5524_v57, 0.0  ;;  %v10053_v24 = vld [vmem:[#allocation19_spill] sm:$0xff]  ;;  %v10064_v26 = vld [vmem:[#allocation30_spill] sm:$0xff]  ;;  %v10065_v57 = vld [vmem:[#allocation32_spill] sm:$0xff] }
 0x423   : > { %v5589_v58 = vmax.f32 %v5525_v6, 0.0  ;;  %v5590_v3 = vmax.f32 %v5526_v13, 0.0  ;;  %v5591_v31 = vmax.f32 %v5527_v60, 0.0  ;;  %v5529_v52 = vadd.f32 %v9612_v9, %v5461_v0  ;;  %v10063_v39 = vld [vmem:[#allocation27_spill] sm:$0xff] }
 0x424   : > { %v5592_v11 = vmax.f32 %v5528_v51, 0.0  ;;  %v5530_v29 = vadd.f32 %v9612_v9, %v5462_v42  ;;  %5652 = vst.msk [vmem:[%s8103_s9 + $0x100] sm:$0xff] %vm5619_vm6, %v5587_v4  ;;  %5653 = vst.msk [vmem:[%s8103_s9 + $0x108] sm:$0xff] %vm5619_vm6, %v5588_v53  ;;  %v5463_v19 = vmul.f32 %v10053_v24, %v9596_v15  ;;  %v5464_v16 = vmul.f32 %v9224_v5, %v9596_v15  ;;  %v10066_v4 = vld [vmem:[#allocation29_spill] sm:$0xff] }
 0x425   : > { %5654 = vst.msk [vmem:[%s8103_s9 + $0x110] sm:$0xff] %vm5619_vm6, %v5589_v58  ;;  %5655 = vst.msk [vmem:[%s8103_s9 + $0x118] sm:$0xff] %vm5619_vm6, %v5590_v3  ;;  %v5465_v17 = vmul.f32 %v10054_v47, %v9596_v15  ;;  %v5466_v12 = vmul.f32 %v10055_v56, %v9596_v15  ;;  %v5593_v50 = vmax.f32 %v5529_v52, 0.0  ;;  %v5467_v28 = vmul.f32 %v10056_v35, %v9596_v15  ;;  %v10067_v58 = vld [vmem:[#allocation31_spill] sm:$0xff] }
 0x426   : > { %5656 = vst.msk [vmem:[%s8103_s9 + $0x120] sm:$0xff] %vm5619_vm6, %v5591_v31  ;;  %5657 = vst.msk [vmem:[%s8103_s9 + $0x128] sm:$0xff] %vm5619_vm6, %v5592_v11  ;;  %v5594_v21 = vmax.f32 %v5530_v29, 0.0  ;;  %v5468_v25 = vmul.f32 %v10057_v45, %v9596_v15  ;;  %v5531_v5 = vadd.f32 %v9612_v9, %v5463_v19  ;;  %v5532_v40 = vadd.f32 %v9612_v9, %v5464_v16 }
 0x427   : > { %v5533_v62 = vadd.f32 %v9612_v9, %v5465_v17  ;;  %v5534_v46 = vadd.f32 %v9612_v9, %v5466_v12  ;;  %5658 = vst.msk [vmem:[%s8103_s9 + $0x130] sm:$0xff] %vm5619_vm6, %v5593_v50  ;;  %v5535_v33 = vadd.f32 %v9612_v9, %v5467_v28  ;;  %v5469_v2 = vmul.f32 %v10058_v44, %v9596_v15  ;;  %v10068_v17 = vld [vmem:[#allocation34_spill] sm:$0xff]  ;;  %v10069_v50 = vld [vmem:[#allocation33_spill] sm:$0xff] }
 0x428   : > { %5659 = vst.msk [vmem:[%s8103_s9 + $0x138] sm:$0xff] %vm5619_vm6, %v5594_v21  ;;  %v5536_v59 = vadd.f32 %v9612_v9, %v5468_v25  ;;  %v5470_v1 = vmul.f32 %v10059_v8, %v9596_v15  ;;  %v5595_v37 = vmax.f32 %v5531_v5, 0.0  ;;  %v5596_v61 = vmax.f32 %v5532_v40, 0.0  ;;  %v10070_v5 = vld [vmem:[#allocation37_spill] sm:$0xff] }
 0x429   : > { %v5597_v14 = vmax.f32 %v5533_v62, 0.0  ;;  %v5598_v22 = vmax.f32 %v5534_v46, 0.0  ;;  %v5599_v23 = vmax.f32 %v5535_v33, 0.0  ;;  %v5537_v10 = vadd.f32 %v9612_v9, %v5469_v2  ;;  %v10072_v2 = vld [vmem:[#allocation36_spill] sm:$0xff] }
 0x42a   : > { %v5600_v18 = vmax.f32 %v5536_v59, 0.0  ;;  %v5538_v49 = vadd.f32 %v9612_v9, %v5470_v1  ;;  %5660 = vst.msk [vmem:[%s8103_s9 + $0x140] sm:$0xff] %vm5619_vm6, %v5595_v37  ;;  %5661 = vst.msk [vmem:[%s8103_s9 + $0x148] sm:$0xff] %vm5619_vm6, %v5596_v61  ;;  %v5471_v34 = vmul.f32 %v10060_v20, %v9596_v15  ;;  %v5472_v48 = vmul.f32 %v10061_v38, %v9596_v15  ;;  %v10071_v59 = vld [vmem:[#allocation35_spill] sm:$0xff] }
 0x42b   : > { %5662 = vst.msk [vmem:[%s8103_s9 + $0x150] sm:$0xff] %vm5619_vm6, %v5597_v14  ;;  %5663 = vst.msk [vmem:[%s8103_s9 + $0x158] sm:$0xff] %vm5619_vm6, %v5598_v22  ;;  %v5473_v54 = vmul.f32 %v10062_v36, %v9596_v15  ;;  %v5474_v41 = vmul.f32 %v10063_v39, %v9596_v15  ;;  %v5601_v32 = vmax.f32 %v5537_v10, 0.0  ;;  %v5475_v55 = vmul.f32 %v10064_v26, %v9596_v15 }
 0x42c   : > { %5664 = vst.msk [vmem:[%s8103_s9 + $0x160] sm:$0xff] %vm5619_vm6, %v5599_v23  ;;  %5665 = vst.msk [vmem:[%s8103_s9 + $0x168] sm:$0xff] %vm5619_vm6, %v5600_v18  ;;  %v5602_v63 = vmax.f32 %v5538_v49, 0.0  ;;  %v5476_v6 = vmul.f32 %v10065_v57, %v9596_v15  ;;  %v5539_v13 = vadd.f32 %v9612_v9, %v5471_v34  ;;  %v5540_v60 = vadd.f32 %v9612_v9, %v5472_v48 }
 0x42d   : > { %v5541_v51 = vadd.f32 %v9612_v9, %v5473_v54  ;;  %v5542_v27 = vadd.f32 %v9612_v9, %v5474_v41  ;;  %5666 = vst.msk [vmem:[%s8103_s9 + $0x170] sm:$0xff] %vm5619_vm6, %v5601_v32  ;;  %v5543_v0 = vadd.f32 %v9612_v9, %v5475_v55  ;;  %v5477_v53 = vmul.f32 %v10066_v4, %v9596_v15 }
 0x42e   : > { %5667 = vst.msk [vmem:[%s8103_s9 + $0x178] sm:$0xff] %vm5619_vm6, %v5602_v63  ;;  %v5544_v42 = vadd.f32 %v9612_v9, %v5476_v6  ;;  %v5478_v3 = vmul.f32 %v10067_v58, %v9596_v15  ;;  %v5603_v31 = vmax.f32 %v5539_v13, 0.0  ;;  %v5604_v11 = vmax.f32 %v5540_v60, 0.0 }
 0x42f   : > { %v5605_v52 = vmax.f32 %v5541_v51, 0.0  ;;  %v5606_v29 = vmax.f32 %v5542_v27, 0.0  ;;  %v5607_v24 = vmax.f32 %v5543_v0, 0.0  ;;  %v5545_v16 = vadd.f32 %v9612_v9, %v5477_v53 }
 0x430   : > { %v5608_v19 = vmax.f32 %v5544_v42, 0.0  ;;  %v5546_v47 = vadd.f32 %v9612_v9, %v5478_v3  ;;  %5668 = vst.msk [vmem:[%s8103_s9 + $0x180] sm:$0xff] %vm5619_vm6, %v5603_v31  ;;  %5669 = vst.msk [vmem:[%s8103_s9 + $0x188] sm:$0xff] %vm5619_vm6, %v5604_v11  ;;  %v5479_v56 = vmul.f32 %v10068_v17, %v9596_v15  ;;  %v5480_v12 = vmul.f32 %v9256_v30, %v9596_v15 }
 0x431   : > { %5670 = vst.msk [vmem:[%s8103_s9 + $0x190] sm:$0xff] %vm5619_vm6, %v5605_v52  ;;  %5671 = vst.msk [vmem:[%s8103_s9 + $0x198] sm:$0xff] %vm5619_vm6, %v5606_v29  ;;  %v5481_v21 = vmul.f32 %v10069_v50, %v9596_v15  ;;  %v5482_v35 = vmul.f32 %v9254_v43, %v9596_v15  ;;  %v5609_v28 = vmax.f32 %v5545_v16, 0.0  ;;  %v5483_v25 = vmul.f32 %v9260_v7, %v9596_v15 }
 0x432   : > { %5672 = vst.msk [vmem:[%s8103_s9 + $0x1a0] sm:$0xff] %vm5619_vm6, %v5607_v24  ;;  %5673 = vst.msk [vmem:[%s8103_s9 + $0x1a8] sm:$0xff] %vm5619_vm6, %v5608_v19  ;;  %v5610_v45 = vmax.f32 %v5546_v47, 0.0  ;;  %v5484_v40 = vmul.f32 %v10070_v5, %v9596_v15  ;;  %v5547_v30 = vadd.f32 %v9612_v9, %v5479_v56  ;;  %v5548_v62 = vadd.f32 %v9612_v9, %v5480_v12 }
 0x433   : > { %v5549_v46 = vadd.f32 %v9612_v9, %v5481_v21  ;;  %v5550_v43 = vadd.f32 %v9612_v9, %v5482_v35  ;;  %5674 = vst.msk [vmem:[%s8103_s9 + $0x1b0] sm:$0xff] %vm5619_vm6, %v5609_v28  ;;  %v5551_v7 = vadd.f32 %v9612_v9, %v5483_v25  ;;  %v5485_v44 = vmul.f32 %v10071_v59, %v9596_v15 }
 0x434   : > { %5675 = vst.msk [vmem:[%s8103_s9 + $0x1b8] sm:$0xff] %vm5619_vm6, %v5610_v45  ;;  %v5552_v33 = vadd.f32 %v9612_v9, %v5484_v40  ;;  %v5486_v8 = vmul.f32 %v10072_v2, %v9596_v15  ;;  %v5611_v1 = vmax.f32 %v5547_v30, 0.0  ;;  %v5612_v37 = vmax.f32 %v5548_v62, 0.0 }
 0x435   : > { %v5613_v61 = vmax.f32 %v5549_v46, 0.0  ;;  %v5614_v14 = vmax.f32 %v5550_v43, 0.0  ;;  %v5615_v22 = vmax.f32 %v5551_v7, 0.0  ;;  %v5553_v18 = vadd.f32 %v9612_v9, %v5485_v44 }
 0x436   : > { %v5616_v23 = vmax.f32 %v5552_v33, 0.0  ;;  %v5554_v10 = vadd.f32 %v9612_v9, %v5486_v8  ;;  %5676 = vst.msk [vmem:[%s8103_s9 + $0x1c0] sm:$0xff] %vm5619_vm6, %v5611_v1  ;;  %5677 = vst.msk [vmem:[%s8103_s9 + $0x1c8] sm:$0xff] %vm5619_vm6, %v5612_v37 }
 0x437   : > { %5678 = vst.msk [vmem:[%s8103_s9 + $0x1d0] sm:$0xff] %vm5619_vm6, %v5613_v61  ;;  %5679 = vst.msk [vmem:[%s8103_s9 + $0x1d8] sm:$0xff] %vm5619_vm6, %v5614_v14  ;;  %v5617_v15 = vmax.f32 %v5553_v18, 0.0 }
 0x438   : > { %5680 = vst.msk [vmem:[%s8103_s9 + $0x1e0] sm:$0xff] %vm5619_vm6, %v5615_v22  ;;  %5681 = vst.msk [vmem:[%s8103_s9 + $0x1e8] sm:$0xff] %vm5619_vm6, %v5616_v23  ;;  %v5618_v49 = vmax.f32 %v5554_v10, 0.0 }
 0x439   : > { %5682 = vst.msk [vmem:[%s8103_s9 + $0x1f0] sm:$0xff] %vm5619_vm6, %v5617_v15 }
 0x43a   : > { %5683 = vst.msk [vmem:[%s8103_s9 + $0x1f8] sm:$0xff] %vm5619_vm6, %v5618_v49 }
 0x43b PF: > { %s13_s18 = sadd.s32 1, %s8016_s18   ;;  %s10073_s12 = smov %s8004_s15 }
 0x43c   : > { %p10_p3 = scmp.ge.s32.totalorder %s13_s18, 34   ;;  %s10074_s13 = smov %s8008_s16 }
 0x43d   : > { %s10075_s14 = smov %s8012_s17  ;;  %s10076_s15 = smov %s10080_s19 }
 0x43e   : > { %s10077_s16 = smov %s10084_s20  ;;  %s10078_s17 = smov %s10088_s21 }
 0x43f   :  { %12 = sbr.rel (!%p10_p3) target bundleno = 4 (0x4), region = 85 }

</bundles_post_ra>
